<compile_context>
chip_gen: v5e
topology: v5e:2x2
jax: 0.10.0
libtpu: 0.0.40
codegen_flags: <defaults>
</compile_context>

<pallas_src>
import functools
import numpy as np
import jax
import jax.numpy as jnp
from jax.experimental import pallas as pl
from jax.experimental.pallas import tpu as pltpu


# ----------------------------------------------------------------------------
# sin-cos positional embedding (identical to the reference numpy code)
# ----------------------------------------------------------------------------
def get_1d_sincos_pos_embed_from_grid(embed_dim, pos):
    assert embed_dim % 2 == 0
    omega = np.arange(embed_dim // 2, dtype=np.float64)
    omega /= embed_dim / 2.0
    omega = 1.0 / 10000 ** omega
    pos = pos.reshape(-1)
    out = np.einsum("m,d->md", pos, omega)
    return np.concatenate([np.sin(out), np.cos(out)], axis=1)


def get_2d_sincos_pos_embed_from_grid(embed_dim, grid):
    assert embed_dim % 2 == 0
    emb_h = get_1d_sincos_pos_embed_from_grid(embed_dim // 2, grid[0])
    emb_w = get_1d_sincos_pos_embed_from_grid(embed_dim // 2, grid[1])
    return np.concatenate([emb_h, emb_w], axis=1)


def get_2d_sincos_pos_embed(embed_dim, grid_size, cls_token=False):
    grid_h = np.arange(grid_size[0], dtype=np.float32)
    grid_w = np.arange(grid_size[1], dtype=np.float32)
    grid = np.meshgrid(grid_w, grid_h)
    grid = np.stack(grid, axis=0)
    grid = grid.reshape([2, 1, grid_size[0], grid_size[1]])
    pos_embed = get_2d_sincos_pos_embed_from_grid(embed_dim, grid)
    if cls_token:
        pos_embed = np.concatenate([np.zeros([1, embed_dim]), pos_embed], axis=0)
    return pos_embed


# ----------------------------------------------------------------------------
# small helpers
# ----------------------------------------------------------------------------
def _gelu_exact(x):
    # exact (erf) GELU, matches torch.nn.GELU() default
    return 0.5 * x * (1.0 + jax.lax.erf(x / np.float32(np.sqrt(2.0))))


def _layernorm(x, g, b, eps):
    mean = jnp.mean(x, axis=-1, keepdims=True)
    var = jnp.mean(jnp.square(x - mean), axis=-1, keepdims=True)
    return (x - mean) * jax.lax.rsqrt(var + eps) * g + b


def _pick_tm(M, cap=512):
    """Largest row tile that divides M, is a multiple of 8 (or == M), stays <= cap,
    and gives a grid of >= 2 when possible (keeps both v7x TensorCores busy)."""
    tm = M
    while (tm > cap or tm == M) and tm % 2 == 0 and (tm // 2) % 8 == 0:
        tm //= 2
        if tm <= cap:
            break
    return tm


# ----------------------------------------------------------------------------
# Pallas kernels
# ----------------------------------------------------------------------------
def _embed_kernel(x_ref, w_ref, b_ref, pos_ref, o_ref):
    # x (1, L, Cin) -> (1, L, C): x @ W + b + pos_embed fused
    y = jnp.dot(x_ref[0], w_ref[...], preferred_element_type=jnp.float32)
    y = y + b_ref[...] + pos_ref[0]
    o_ref[0] = y.astype(o_ref.dtype)


def pallas_embed(x, w, b, pos):
    B, L, Cin = x.shape
    C = w.shape[1]
    return pl.pallas_call(
        _embed_kernel,
        out_shape=jax.ShapeDtypeStruct((B, L, C), jnp.float32),
        grid=(B,),
        in_specs=[
            pl.BlockSpec((1, L, Cin), lambda i: (i, 0, 0)),
            pl.BlockSpec((Cin, C), lambda i: (0, 0)),
            pl.BlockSpec((1, C), lambda i: (0, 0)),
            pl.BlockSpec((1, L, C), lambda i: (0, 0, 0)),
        ],
        out_specs=pl.BlockSpec((1, L, C), lambda i: (i, 0, 0)),
        compiler_params=pltpu.CompilerParams(dimension_semantics=("parallel",)),
    )(x, w, b.reshape(1, C), pos)


def _attn_block_kernel(xw_ref, g_ref, b_ref, qkv_w_ref, qkv_b_ref,
                       proj_w_ref, proj_b_ref, bias_ref, o_ref,
                       *, num_heads, scale, eps):
    # xw (Wb, N, C): all windows of one image.  Fused: LN1 -> QKV -> attn -> proj.
    Wb, N, C = xw_ref.shape
    hd = C // num_heads

    x = xw_ref[...]
    xn = _layernorm(x, g_ref[0], b_ref[0], eps)                    # LN1 (per token)

    qkv = jnp.dot(xn.reshape(Wb * N, C), qkv_w_ref[...],
                  preferred_element_type=jnp.float32) + qkv_b_ref[...]   # (Wb*N, 3C)
    bias_all = bias_ref[...]                                       # (Wb, nH, N, N)

    heads = []
    for h in range(num_heads):                                     # static unroll (nH small)
        q = qkv[:, h * hd:(h + 1) * hd].reshape(Wb, N, hd)
        k = qkv[:, C + h * hd:C + (h + 1) * hd].reshape(Wb, N, hd)
        v = qkv[:, 2 * C + h * hd:2 * C + (h + 1) * hd].reshape(Wb, N, hd)
        s = jnp.einsum("wqd,wkd->wqk", q, k,
                       preferred_element_type=jnp.float32) * scale
        s = s + bias_all[:, h]                                     # rel-pos bias (+ shift mask)
        m = jnp.max(s, axis=-1, keepdims=True)
        p = jnp.exp(s - m)
        denom = jnp.sum(p, axis=-1, keepdims=True)
        p = p * pl.reciprocal(denom, approx=True)                  # EUP divide
        heads.append(jnp.einsum("wqk,wkd->wqd", p, v,
                                preferred_element_type=jnp.float32))

    attn = jnp.concatenate(heads, axis=-1).reshape(Wb * N, C)
    out = jnp.dot(attn, proj_w_ref[...],
                  preferred_element_type=jnp.float32) + proj_b_ref[...]
    o_ref[...] = out.reshape(Wb, N, C).astype(o_ref.dtype)


def pallas_swin_attention(xw, g, b, qkv_w, qkv_b, proj_w, proj_b, bias,
                          num_heads, scale, eps=1e-5):
    """xw: (B_, N, C) windowed tokens (pre-LN); bias: (nW, nH, N, N) shared per image."""
    B_, N, C = xw.shape
    nW = bias.shape[0]
    kernel = functools.partial(_attn_block_kernel, num_heads=num_heads,
                               scale=scale, eps=eps)
    return pl.pallas_call(
        kernel,
        out_shape=jax.ShapeDtypeStruct((B_, N, C), jnp.float32),
        grid=(B_ // nW,),
        in_specs=[
            pl.BlockSpec((nW, N, C), lambda i: (i, 0, 0)),
            pl.BlockSpec((1, C), lambda i: (0, 0)),
            pl.BlockSpec((1, C), lambda i: (0, 0)),
            pl.BlockSpec((C, 3 * C), lambda i: (0, 0)),
            pl.BlockSpec((1, 3 * C), lambda i: (0, 0)),
            pl.BlockSpec((C, C), lambda i: (0, 0)),
            pl.BlockSpec((1, C), lambda i: (0, 0)),
            pl.BlockSpec((nW, num_heads, N, N), lambda i: (0, 0, 0, 0)),  # replicated for free
        ],
        out_specs=pl.BlockSpec((nW, N, C), lambda i: (i, 0, 0)),
        compiler_params=pltpu.CompilerParams(dimension_semantics=("parallel",)),
    )(xw, g.reshape(1, C), b.reshape(1, C),
      qkv_w, qkv_b.reshape(1, 3 * C), proj_w, proj_b.reshape(1, C), bias)


def _mlp_block_kernel(x_ref, y_ref, g_ref, b_ref, w1_ref, b1_ref, w2_ref, b2_ref,
                      o_ref, *, eps):
    # Fused: residual add + LN2 + fc1 + GELU + fc2 + residual add.
    x = x_ref[...] + y_ref[...]
    h = _layernorm(x, g_ref[...], b_ref[...], eps)
    h = jnp.dot(h, w1_ref[...], preferred_element_type=jnp.float32) + b1_ref[...]
    h = _gelu_exact(h)
    h = jnp.dot(h, w2_ref[...], preferred_element_type=jnp.float32) + b2_ref[...]
    o_ref[...] = (x + h).astype(o_ref.dtype)


def pallas_mlp_block(x, y, g, b, w1, b1, w2, b2, eps=1e-5):
    M, C = x.shape
    Ch = w1.shape[1]
    tm = _pick_tm(M)
    # TODO(synk): for large C (e.g. 1024+) tile the output dim of w1/w2 instead of loading
    #             full (K, N) weight blocks, to stay inside v7x's 64 MiB VMEM.
    kernel = functools.partial(_mlp_block_kernel, eps=eps)
    return pl.pallas_call(
        kernel,
        out_shape=jax.ShapeDtypeStruct((M, C), jnp.float32),
        grid=(M // tm,),
        in_specs=[
            pl.BlockSpec((tm, C), lambda i: (i, 0)),
            pl.BlockSpec((tm, C), lambda i: (i, 0)),
            pl.BlockSpec((1, C), lambda i: (0, 0)),
            pl.BlockSpec((1, C), lambda i: (0, 0)),
            pl.BlockSpec((C, Ch), lambda i: (0, 0)),
            pl.BlockSpec((1, Ch), lambda i: (0, 0)),
            pl.BlockSpec((Ch, C), lambda i: (0, 0)),
            pl.BlockSpec((1, C), lambda i: (0, 0)),
        ],
        out_specs=pl.BlockSpec((tm, C), lambda i: (i, 0)),
        compiler_params=pltpu.CompilerParams(dimension_semantics=("parallel",)),
    )(x, y, g.reshape(1, C), b.reshape(1, C), w1, b1.reshape(1, Ch), w2, b2.reshape(1, C))


def _head_kernel(x_ref, g_ref, b_ref, w_ref, pb_ref, o_ref, *, eps):
    # Fused final: LN + GELU + pred linear (output lane-padded to a multiple of 128).
    h = _layernorm(x_ref[...], g_ref[...], b_ref[...], eps)
    h = _gelu_exact(h)
    y = jnp.dot(h, w_ref[...], preferred_element_type=jnp.float32) + pb_ref[...]
    o_ref[...] = y.astype(o_ref.dtype)


def pallas_head(x, g, b, w_pad, b_pad, eps=1e-5):
    M, C = x.shape
    Npad = w_pad.shape[1]
    tm = _pick_tm(M)
    kernel = functools.partial(_head_kernel, eps=eps)
    return pl.pallas_call(
        kernel,
        out_shape=jax.ShapeDtypeStruct((M, Npad), jnp.float32),
        grid=(M // tm,),
        in_specs=[
            pl.BlockSpec((tm, C), lambda i: (i, 0)),
            pl.BlockSpec((1, C), lambda i: (0, 0)),
            pl.BlockSpec((1, C), lambda i: (0, 0)),
            pl.BlockSpec((C, Npad), lambda i: (0, 0)),
            pl.BlockSpec((1, Npad), lambda i: (0, 0)),
        ],
        out_specs=pl.BlockSpec((tm, Npad), lambda i: (i, 0)),
        compiler_params=pltpu.CompilerParams(dimension_semantics=("parallel",)),
    )(x, g.reshape(1, C), b.reshape(1, C), w_pad, b_pad.reshape(1, Npad))


# ----------------------------------------------------------------------------
# Swin helpers (glue: pure permutations / constant precompute)
# ----------------------------------------------------------------------------
def window_partition(x, ws):
    B, H, W, C = x.shape
    x = x.reshape(B, H // ws, ws, W // ws, ws, C)
    return jnp.transpose(x, (0, 1, 3, 2, 4, 5)).reshape(-1, ws, ws, C)


def window_reverse(windows, ws, H, W):
    B = windows.shape[0] // ((H * W) // (ws * ws))
    x = windows.reshape(B, H // ws, W // ws, ws, ws, -1)
    return jnp.transpose(x, (0, 1, 3, 2, 4, 5)).reshape(B, H, W, -1)


def relative_position_index(ws):
    coords_h = np.arange(ws)
    coords_w = np.arange(ws)
    coords = np.stack(np.meshgrid(coords_h, coords_w, indexing="ij"))
    coords_flatten = coords.reshape(2, -1)
    rel = coords_flatten[:, :, None] - coords_flatten[:, None, :]
    rel = rel.transpose(1, 2, 0).astype(np.int64)
    rel[:, :, 0] += ws - 1
    rel[:, :, 1] += ws - 1
    rel[:, :, 0] *= 2 * ws - 1
    return rel.sum(-1)  # (N, N)


def shifted_window_attn_mask(H, W, ws, shift):
    if shift == 0:
        return None
    img_mask = np.zeros((1, H, W, 1), dtype=np.float32)
    h_slices = (slice(0, -ws), slice(-ws, -shift), slice(-shift, None))
    w_slices = (slice(0, -ws), slice(-ws, -shift), slice(-shift, None))
    cnt = 0
    for hs in h_slices:
        for wslc in w_slices:
            img_mask[:, hs, wslc, :] = cnt
            cnt += 1
    mw = img_mask.reshape(1, H // ws, ws, W // ws, ws, 1)
    mw = mw.transpose(0, 1, 3, 2, 4, 5).reshape(-1, ws * ws)
    attn_mask = mw[:, None, :] - mw[:, :, None]
    return np.where(attn_mask != 0, -100.0, 0.0).astype(np.float32)  # (nW, N, N)


# ----------------------------------------------------------------------------
# Params & precomputed constants
# ----------------------------------------------------------------------------
def xavier_uniform(key, fan_in, fan_out):
    bound = float(np.sqrt(6.0 / (fan_in + fan_out)))
    return jax.random.uniform(key, (fan_in, fan_out), jnp.float32, -bound, bound)


def build_params(key, cfg):
    C = cfg["hidden_dim"]
    Cin = cfg["input_dim"]
    H, W = cfg["H"], cfg["W"]
    ws = min(cfg["window_size"], min(H, W))
    nH = cfg["num_heads"]
    depth = cfg["depth"]
    nc = cfg["num_class"]

    keys = jax.random.split(key, 3 + depth)
    params = {}
    params["embed_w"] = xavier_uniform(keys[0], Cin, C)
    params["embed_b"] = jnp.zeros((C,), jnp.float32)
    # mask_token exists in the module but is unused in forward
    params["mask_token"] = 0.02 * jax.random.normal(keys[2], (1, 1, Cin), jnp.float32)
    params["pos_embed"] = jnp.asarray(
        get_2d_sincos_pos_embed(C, (H, W), cls_token=False), jnp.float32
    )[None]  # (1, H*W, C)

    blocks = []
    for i in range(depth):
        bk = jax.random.split(keys[3 + i], 5)
        bp = {
            "norm1_g": jnp.ones((C,), jnp.float32),
            "norm1_b": jnp.zeros((C,), jnp.float32),
            "qkv_w": xavier_uniform(bk[0], C, 3 * C),
            "qkv_b": jnp.zeros((3 * C,), jnp.float32),
            "proj_w": xavier_uniform(bk[1], C, C),
            "proj_b": jnp.zeros((C,), jnp.float32),
            "norm2_g": jnp.ones((C,), jnp.float32),
            "norm2_b": jnp.zeros((C,), jnp.float32),
            "fc1_w": xavier_uniform(bk[2], C, 4 * C),
            "fc1_b": jnp.zeros((4 * C,), jnp.float32),
            "fc2_w": xavier_uniform(bk[3], 4 * C, C),
            "fc2_b": jnp.zeros((C,), jnp.float32),
            "rel_table": 0.02
            * jax.random.normal(bk[4], ((2 * ws - 1) * (2 * ws - 1), nH), jnp.float32),
        }
        blocks.append(bp)
    params["blocks"] = blocks

    params["final_norm_g"] = jnp.ones((C,), jnp.float32)
    params["final_norm_b"] = jnp.zeros((C,), jnp.float32)
    params["pred_w"] = xavier_uniform(keys[1], C, nc)
    params["pred_b"] = jnp.zeros((nc,), jnp.float32)
    return params


def prepare_forward(params, cfg):
    """Hoist per-call constant work: relative-position bias gather/permute, shift masks,
    and lane-padded prediction head.  Returns (static python plan, device constants)."""
    H, W = cfg["H"], cfg["W"]
    ws = cfg["window_size"]
    if min(H, W) <= ws:
        ws = min(H, W)
    nH = cfg["num_heads"]
    N = ws * ws
    nW = (H // ws) * (W // ws)
    C = cfg["hidden_dim"]
    nc = cfg["num_class"]
    rel_index = relative_position_index(ws)

    shifts = []
    biases = []
    for i in range(cfg["depth"]):
        shift = 0 if (i % 2 == 0 or min(H, W) <= cfg["window_size"]) else ws // 2
        shifts.append(shift)
        rel_table = params["blocks"][i]["rel_table"]
        rel_bias = rel_table[rel_index.reshape(-1)].reshape(N, N, nH).transpose(2, 0, 1)
        if shift > 0:
            mask = jnp.asarray(shifted_window_attn_mask(H, W, ws, shift))   # (nW, N, N)
            bias = rel_bias[None, :, :, :] + mask[:, None, :, :]            # (nW, nH, N, N)
        else:
            bias = jnp.broadcast_to(rel_bias[None, :, :, :], (nW, nH, N, N))
        biases.append(jnp.asarray(bias, jnp.float32))

    # lane-dense padded prediction head (output last dim -> multiple of 128)
    Npad = ((nc + 127) // 128) * 128
    pred_w_pad = jnp.zeros((C, Npad), jnp.float32).at[:, :nc].set(params["pred_w"])
    pred_b_pad = jnp.zeros((Npad,), jnp.float32).at[:nc].set(params["pred_b"])

    static = dict(ws=ws, shifts=tuple(shifts))
    consts = dict(bias=biases, pred_w_pad=pred_w_pad, pred_b_pad=pred_b_pad)
    return static, consts


# ----------------------------------------------------------------------------
# Forward
# ----------------------------------------------------------------------------
def swin_block(x, bp, bias, H, W, ws, shift, num_heads):
    B, L, C = x.shape
    N = ws * ws
    hd = C // num_heads
    scale = hd ** -0.5

    xs = x.reshape(B, H, W, C)
    if shift > 0:
        xs = jnp.roll(xs, shift=(-shift, -shift), axis=(1, 2))
    xw = window_partition(xs, ws).reshape(-1, N, C)                 # (B_, N, C)

    # fused LN1 + QKV + window attention (+rel bias/mask) + out proj
    yw = pallas_swin_attention(xw, bp["norm1_g"], bp["norm1_b"],
                               bp["qkv_w"], bp["qkv_b"], bp["proj_w"], bp["proj_b"],
                               bias, num_heads, scale)

    yr = window_reverse(yw.reshape(-1, ws, ws, C), ws, H, W)
    if shift > 0:
        yr = jnp.roll(yr, shift=(shift, shift), axis=(1, 2))
    y = yr.reshape(B * L, C)

    # fused residual + LN2 + MLP + residual
    out = pallas_mlp_block(x.reshape(B * L, C), y,
                           bp["norm2_g"], bp["norm2_b"],
                           bp["fc1_w"], bp["fc1_b"], bp["fc2_w"], bp["fc2_b"])
    return out.reshape(B, L, C)


def forward(x, params, consts, *, cfg, ws, shifts):
    B, L, Cin = x.shape
    C = cfg["hidden_dim"]
    H, W = cfg["H"], cfg["W"]
    num_heads = cfg["num_heads"]
    nc = cfg["num_class"]

    # TODO(synk): on v6e/v7x a bf16-operand mode (f32 accumulate / f32 LN stats) would halve
    #             HBM+VMEM traffic; kept f32 here to match the PyTorch reference exactly.
    h = pallas_embed(x, params["embed_w"], params["embed_b"], params["pos_embed"])

    for i, bp in enumerate(params["blocks"]):
        h = swin_block(h, bp, consts["bias"][i], H, W, ws, shifts[i], num_heads)

    out = pallas_head(h.reshape(B * L, C), params["final_norm_g"], params["final_norm_b"],
                      consts["pred_w_pad"], consts["pred_b_pad"])
    return out[:, :nc].reshape(B, L, nc)


if __name__ == "__main__":
    cfg = dict(
        num_class=24,
        input_dim=16,
        H=8,
        W=8,
        hidden_dim=32,
        depth=2,
        num_heads=4,
        window_size=4,
    )
    key = jax.random.PRNGKey(0)
    pkey, xkey = jax.random.split(key)
    params = build_params(pkey, cfg)
    static, consts = prepare_forward(params, cfg)

    fwd = jax.jit(functools.partial(forward, cfg=cfg,
                                    ws=static["ws"], shifts=static["shifts"]))

    x = jax.random.normal(xkey, (2, cfg["H"] * cfg["W"], cfg["input_dim"]), jnp.float32)
    out = fwd(x, params, consts)
    out = jax.block_until_ready(out)
    assert out.shape == (2, cfg["H"] * cfg["W"], cfg["num_class"]), out.shape
    assert bool(jnp.all(jnp.isfinite(out)))
    print("KERNEL_OK")
</pallas_src>

<mosaic_0001>
module attributes {stable_mosaic.version = 11 : i64} {
  func.func @_embed_kernel(%arg0: i32, %arg1: memref<1x64x16xf32, #tpu.memory_space<vmem>>, %arg2: memref<16x32xf32, #tpu.memory_space<vmem>>, %arg3: memref<1x32xf32, #tpu.memory_space<vmem>>, %arg4: memref<1x64x32xf32, #tpu.memory_space<vmem>>, %arg5: memref<1x64x32xf32, #tpu.memory_space<vmem>>) attributes {dimension_semantics = [#tpu.dimension_semantics<parallel>], iteration_bounds = array<i64: 2>, scalar_prefetch = 0 : i64, scratch_operands = 0 : i64, tpu.core_type = #tpu.core_type<tc>, window_params = [{transform_indices = @transform_0, window_bounds = array<i64: 1, 64, 16>}, {pipeline_mode = #tpu.pipeline_mode<synchronous>, transform_indices = @transform_1, window_bounds = array<i64: 16, 32>}, {pipeline_mode = #tpu.pipeline_mode<synchronous>, transform_indices = @transform_2, window_bounds = array<i64: 1, 32>}, {pipeline_mode = #tpu.pipeline_mode<synchronous>, transform_indices = @transform_3, window_bounds = array<i64: 1, 64, 32>}, {transform_indices = @transform_4, window_bounds = array<i64: 1, 64, 32>}]} {
    %c0 = arith.constant 0 : index
    %c0_0 = arith.constant 0 : index
    %c0_1 = arith.constant 0 : index
    %0 = vector.load %arg1[%c0, %c0_0, %c0_1] : memref<1x64x16xf32, #tpu.memory_space<vmem>>, vector<1x64x16xf32>
    %1 = vector.shape_cast %0 : vector<1x64x16xf32> to vector<64x16xf32>
    %c0_2 = arith.constant 0 : index
    %c0_3 = arith.constant 0 : index
    %2 = vector.load %arg2[%c0_2, %c0_3] : memref<16x32xf32, #tpu.memory_space<vmem>>, vector<16x32xf32>
    %cst = arith.constant dense<0.000000e+00> : vector<64x32xf32>
    %3 = tpu.matmul %1, %2, %cst {dimension_numbers = #tpu.dot_dimension_numbers<[1], [0], [0], [1], [0, 0, 1, 1], [], []>} : vector<64x16xf32>, vector<16x32xf32>, vector<64x32xf32> -> vector<64x32xf32>
    %c0_4 = arith.constant 0 : index
    %c0_5 = arith.constant 0 : index
    %4 = vector.load %arg3[%c0_4, %c0_5] : memref<1x32xf32, #tpu.memory_space<vmem>>, vector<1x32xf32>
    %5 = vector.broadcast %4 : vector<1x32xf32> to vector<64x32xf32>
    %6 = arith.addf %3, %5 : vector<64x32xf32>
    %c0_6 = arith.constant 0 : index
    %c0_7 = arith.constant 0 : index
    %c0_8 = arith.constant 0 : index
    %7 = vector.load %arg4[%c0_6, %c0_7, %c0_8] : memref<1x64x32xf32, #tpu.memory_space<vmem>>, vector<1x64x32xf32>
    %8 = vector.shape_cast %7 : vector<1x64x32xf32> to vector<64x32xf32>
    %9 = arith.addf %6, %8 : vector<64x32xf32>
    %c0_9 = arith.constant 0 : index
    %c0_10 = arith.constant 0 : index
    %c0_11 = arith.constant 0 : index
    %10 = vector.load %arg5[%c0_9, %c0_10, %c0_11] : memref<1x64x32xf32, #tpu.memory_space<vmem>>, vector<1x64x32xf32>
    %11 = vector.shape_cast %10 : vector<1x64x32xf32> to vector<64x32xf32>
    %12 = vector.shape_cast %9 : vector<64x32xf32> to vector<1x64x32xf32>
    tpu.vector_store %arg5[%c0_9, %c0_10, %c0_11], %12 {strides = array<i32>} : memref<1x64x32xf32, #tpu.memory_space<vmem>>, vector<1x64x32xf32>,
    return
  }
  func.func @transform_0(%arg0: i32) -> (i32, i32, i32) {
    %c0_i32 = arith.constant 0 : i32
    %c0_i32_0 = arith.constant 0 : i32
    %c0_i32_1 = arith.constant 0 : i32
    return %arg0, %c0_i32, %c0_i32_0 : i32, i32, i32
  }
  func.func @transform_1(%arg0: i32) -> (i32, i32) {
    %c0_i32 = arith.constant 0 : i32
    %c0_i32_0 = arith.constant 0 : i32
    %c0_i32_1 = arith.constant 0 : i32
    return %c0_i32, %c0_i32_0 : i32, i32
  }
  func.func @transform_2(%arg0: i32) -> (i32, i32) {
    %c0_i32 = arith.constant 0 : i32
    %c0_i32_0 = arith.constant 0 : i32
    %c0_i32_1 = arith.constant 0 : i32
    return %c0_i32, %c0_i32_0 : i32, i32
  }
  func.func @transform_3(%arg0: i32) -> (i32, i32, i32) {
    %c0_i32 = arith.constant 0 : i32
    %c0_i32_0 = arith.constant 0 : i32
    %c0_i32_1 = arith.constant 0 : i32
    %c0_i32_2 = arith.constant 0 : i32
    return %c0_i32, %c0_i32_0, %c0_i32_1 : i32, i32, i32
  }
  func.func @transform_4(%arg0: i32) -> (i32, i32, i32) {
    %c0_i32 = arith.constant 0 : i32
    %c0_i32_0 = arith.constant 0 : i32
    %c0_i32_1 = arith.constant 0 : i32
    return %arg0, %c0_i32, %c0_i32_0 : i32, i32, i32
  }
}

module attributes {stable_mosaic.version = 11 : i64} {
  func.func @_attn_block_kernel(%arg0: i32, %arg1: memref<4x16x32xf32, #tpu.memory_space<vmem>>, %arg2: memref<1x32xf32, #tpu.memory_space<vmem>>, %arg3: memref<1x32xf32, #tpu.memory_space<vmem>>, %arg4: memref<32x96xf32, #tpu.memory_space<vmem>>, %arg5: memref<1x96xf32, #tpu.memory_space<vmem>>, %arg6: memref<32x32xf32, #tpu.memory_space<vmem>>, %arg7: memref<1x32xf32, #tpu.memory_space<vmem>>, %arg8: memref<4x4x16x16xf32, #tpu.memory_space<vmem>>, %arg9: memref<4x16x32xf32, #tpu.memory_space<vmem>>) attributes {dimension_semantics = [#tpu.dimension_semantics<parallel>], iteration_bounds = array<i64: 2>, scalar_prefetch = 0 : i64, scratch_operands = 0 : i64, tpu.core_type = #tpu.core_type<tc>, window_params = [{transform_indices = @transform_0, window_bounds = array<i64: 4, 16, 32>}, {pipeline_mode = #tpu.pipeline_mode<synchronous>, transform_indices = @transform_1, window_bounds = array<i64: 1, 32>}, {pipeline_mode = #tpu.pipeline_mode<synchronous>, transform_indices = @transform_2, window_bounds = array<i64: 1, 32>}, {pipeline_mode = #tpu.pipeline_mode<synchronous>, transform_indices = @transform_3, window_bounds = array<i64: 32, 96>}, {pipeline_mode = #tpu.pipeline_mode<synchronous>, transform_indices = @transform_4, window_bounds = array<i64: 1, 96>}, {pipeline_mode = #tpu.pipeline_mode<synchronous>, transform_indices = @transform_5, window_bounds = array<i64: 32, 32>}, {pipeline_mode = #tpu.pipeline_mode<synchronous>, transform_indices = @transform_6, window_bounds = array<i64: 1, 32>}, {pipeline_mode = #tpu.pipeline_mode<synchronous>, transform_indices = @transform_7, window_bounds = array<i64: 4, 4, 16, 16>}, {transform_indices = @transform_8, window_bounds = array<i64: 4, 16, 32>}]} {
    %c0 = arith.constant 0 : index
    %c0_0 = arith.constant 0 : index
    %c0_1 = arith.constant 0 : index
    %0 = vector.load %arg1[%c0, %c0_0, %c0_1] : memref<4x16x32xf32, #tpu.memory_space<vmem>>, vector<4x16x32xf32>
    %c0_2 = arith.constant 0 : index
    %c0_3 = arith.constant 0 : index
    %1 = vector.load %arg2[%c0_2, %c0_3] : memref<1x32xf32, #tpu.memory_space<vmem>>, vector<1x32xf32>
    %2 = vector.shape_cast %1 : vector<1x32xf32> to vector<32xf32>
    %c0_4 = arith.constant 0 : index
    %c0_5 = arith.constant 0 : index
    %3 = vector.load %arg3[%c0_4, %c0_5] : memref<1x32xf32, #tpu.memory_space<vmem>>, vector<1x32xf32>
    %4 = vector.shape_cast %3 : vector<1x32xf32> to vector<32xf32>
    %cst = arith.constant dense<0.000000e+00> : vector<4x16xf32>
    %5 = vector.multi_reduction <add>, %0, %cst [2] : vector<4x16x32xf32> to vector<4x16xf32>
    %6 = vector.shape_cast %5 : vector<4x16xf32> to vector<4x16x1xf32>
    %cst_6 = arith.constant 3.200000e+01 : f32
    %7 = vector.broadcast %cst_6 : f32 to vector<4x16x1xf32>
    %8 = arith.divf %6, %7 : vector<4x16x1xf32>
    %9 = vector.broadcast %8 : vector<4x16x1xf32> to vector<4x16x32xf32>
    %10 = arith.subf %0, %9 : vector<4x16x32xf32>
    %11 = arith.mulf %10, %10 : vector<4x16x32xf32>
    %cst_7 = arith.constant dense<0.000000e+00> : vector<4x16xf32>
    %12 = vector.multi_reduction <add>, %11, %cst_7 [2] : vector<4x16x32xf32> to vector<4x16xf32>
    %13 = vector.shape_cast %12 : vector<4x16xf32> to vector<4x16x1xf32>
    %cst_8 = arith.constant 3.200000e+01 : f32
    %14 = vector.broadcast %cst_8 : f32 to vector<4x16x1xf32>
    %15 = arith.divf %13, %14 : vector<4x16x1xf32>
    %16 = vector.broadcast %8 : vector<4x16x1xf32> to vector<4x16x32xf32>
    %17 = arith.subf %0, %16 : vector<4x16x32xf32>
    %cst_9 = arith.constant 9.99999974E-6 : f32
    %18 = vector.broadcast %cst_9 : f32 to vector<4x16x1xf32>
    %19 = arith.addf %15, %18 : vector<4x16x1xf32>
    %20 = math.rsqrt %19 : vector<4x16x1xf32>
    %21 = vector.broadcast %20 : vector<4x16x1xf32> to vector<4x16x32xf32>
    %22 = arith.mulf %17, %21 : vector<4x16x32xf32>
    %23 = vector.shape_cast %2 : vector<32xf32> to vector<1x1x32xf32>
    %24 = vector.broadcast %23 : vector<1x1x32xf32> to vector<4x16x32xf32>
    %25 = arith.mulf %22, %24 : vector<4x16x32xf32>
    %26 = vector.shape_cast %4 : vector<32xf32> to vector<1x1x32xf32>
    %27 = vector.broadcast %26 : vector<1x1x32xf32> to vector<4x16x32xf32>
    %28 = arith.addf %25, %27 : vector<4x16x32xf32>
    %29 = vector.shape_cast %28 : vector<4x16x32xf32> to vector<64x32xf32>
    %c0_10 = arith.constant 0 : index
    %c0_11 = arith.constant 0 : index
    %30 = vector.load %arg4[%c0_10, %c0_11] : memref<32x96xf32, #tpu.memory_space<vmem>>, vector<32x96xf32>
    %cst_12 = arith.constant dense<0.000000e+00> : vector<64x96xf32>
    %31 = tpu.matmul %29, %30, %cst_12 {dimension_numbers = #tpu.dot_dimension_numbers<[1], [0], [0], [1], [0, 0, 1, 1], [], []>} : vector<64x32xf32>, vector<32x96xf32>, vector<64x96xf32> -> vector<64x96xf32>
    %c0_13 = arith.constant 0 : index
    %c0_14 = arith.constant 0 : index
    %32 = vector.load %arg5[%c0_13, %c0_14] : memref<1x96xf32, #tpu.memory_space<vmem>>, vector<1x96xf32>
    %33 = vector.broadcast %32 : vector<1x96xf32> to vector<64x96xf32>
    %34 = arith.addf %31, %33 : vector<64x96xf32>
    %c0_15 = arith.constant 0 : index
    %c0_16 = arith.constant 0 : index
    %c0_17 = arith.constant 0 : index
    %c0_18 = arith.constant 0 : index
    %35 = vector.load %arg8[%c0_15, %c0_16, %c0_17, %c0_18] : memref<4x4x16x16xf32, #tpu.memory_space<vmem>>, vector<4x4x16x16xf32>
    %36 = vector.extract_strided_slice %34 {offsets = [0, 0], sizes = [64, 8], strides = [1, 1]} : vector<64x96xf32> to vector<64x8xf32>
    %37 = vector.shape_cast %36 : vector<64x8xf32> to vector<4x16x8xf32>
    %38 = vector.extract_strided_slice %34 {offsets = [0, 32], sizes = [64, 8], strides = [1, 1]} : vector<64x96xf32> to vector<64x8xf32>
    %39 = vector.shape_cast %38 : vector<64x8xf32> to vector<4x16x8xf32>
    %40 = vector.extract_strided_slice %34 {offsets = [0, 64], sizes = [64, 8], strides = [1, 1]} : vector<64x96xf32> to vector<64x8xf32>
    %41 = vector.shape_cast %40 : vector<64x8xf32> to vector<4x16x8xf32>
    "tpu.trace_start"() <{level = 10 : i32, message = "wqd,wkd->wqk"}> : () -> ()
    %cst_19 = arith.constant dense<0.000000e+00> : vector<4x16x16xf32>
    %42 = tpu.matmul %37, %39, %cst_19 {dimension_numbers = #tpu.dot_dimension_numbers<[2], [2], [1], [1], [0, 0, 0, 1, 1, 1], [0], [0]>} : vector<4x16x8xf32>, vector<4x16x8xf32>, vector<4x16x16xf32> -> vector<4x16x16xf32>
    "tpu.trace_stop"() : () -> ()
    %cst_20 = arith.constant 0.353553385 : f32
    %43 = vector.broadcast %cst_20 : f32 to vector<4x16x16xf32>
    %44 = arith.mulf %42, %43 : vector<4x16x16xf32>
    %45 = vector.extract_strided_slice %35 {offsets = [0, 0, 0, 0], sizes = [4, 1, 16, 16], strides = [1, 1, 1, 1]} : vector<4x4x16x16xf32> to vector<4x1x16x16xf32>
    %46 = vector.shape_cast %45 : vector<4x1x16x16xf32> to vector<4x16x16xf32>
    %47 = arith.addf %44, %46 : vector<4x16x16xf32>
    %cst_21 = arith.constant dense<0xFF800000> : vector<4x16xf32>
    %48 = vector.multi_reduction <maximumf>, %47, %cst_21 [2] : vector<4x16x16xf32> to vector<4x16xf32>
    %49 = vector.shape_cast %48 : vector<4x16xf32> to vector<4x16x1xf32>
    %50 = vector.broadcast %49 : vector<4x16x1xf32> to vector<4x16x16xf32>
    %51 = arith.subf %47, %50 : vector<4x16x16xf32>
    %52 = math.exp %51 : vector<4x16x16xf32>
    %cst_22 = arith.constant dense<0.000000e+00> : vector<4x16xf32>
    %53 = vector.multi_reduction <add>, %52, %cst_22 [2] : vector<4x16x16xf32> to vector<4x16xf32>
    %54 = vector.shape_cast %53 : vector<4x16xf32> to vector<4x16x1xf32>
    %55 = tpu.reciprocal %54 {approx = true} : vector<4x16x1xf32> -> vector<4x16x1xf32>
    %56 = vector.broadcast %55 : vector<4x16x1xf32> to vector<4x16x16xf32>
    %57 = arith.mulf %52, %56 : vector<4x16x16xf32>
    "tpu.trace_start"() <{level = 10 : i32, message = "wqk,wkd->wqd"}> : () -> ()
    %cst_23 = arith.constant dense<0.000000e+00> : vector<4x16x8xf32>
    %58 = tpu.matmul %57, %41, %cst_23 {dimension_numbers = #tpu.dot_dimension_numbers<[2], [1], [1], [2], [0, 0, 0, 1, 1, 2], [0], [0]>} : vector<4x16x16xf32>, vector<4x16x8xf32>, vector<4x16x8xf32> -> vector<4x16x8xf32>
    "tpu.trace_stop"() : () -> ()
    %59 = vector.extract_strided_slice %34 {offsets = [0, 8], sizes = [64, 8], strides = [1, 1]} : vector<64x96xf32> to vector<64x8xf32>
    %60 = vector.shape_cast %59 : vector<64x8xf32> to vector<4x16x8xf32>
    %61 = vector.extract_strided_slice %34 {offsets = [0, 40], sizes = [64, 8], strides = [1, 1]} : vector<64x96xf32> to vector<64x8xf32>
    %62 = vector.shape_cast %61 : vector<64x8xf32> to vector<4x16x8xf32>
    %63 = vector.extract_strided_slice %34 {offsets = [0, 72], sizes = [64, 8], strides = [1, 1]} : vector<64x96xf32> to vector<64x8xf32>
    %64 = vector.shape_cast %63 : vector<64x8xf32> to vector<4x16x8xf32>
    "tpu.trace_start"() <{level = 10 : i32, message = "wqd,wkd->wqk"}> : () -> ()
    %cst_24 = arith.constant dense<0.000000e+00> : vector<4x16x16xf32>
    %65 = tpu.matmul %60, %62, %cst_24 {dimension_numbers = #tpu.dot_dimension_numbers<[2], [2], [1], [1], [0, 0, 0, 1, 1, 1], [0], [0]>} : vector<4x16x8xf32>, vector<4x16x8xf32>, vector<4x16x16xf32> -> vector<4x16x16xf32>
    "tpu.trace_stop"() : () -> ()
    %cst_25 = arith.constant 0.353553385 : f32
    %66 = vector.broadcast %cst_25 : f32 to vector<4x16x16xf32>
    %67 = arith.mulf %65, %66 : vector<4x16x16xf32>
    %68 = vector.extract_strided_slice %35 {offsets = [0, 1, 0, 0], sizes = [4, 1, 16, 16], strides = [1, 1, 1, 1]} : vector<4x4x16x16xf32> to vector<4x1x16x16xf32>
    %69 = vector.shape_cast %68 : vector<4x1x16x16xf32> to vector<4x16x16xf32>
    %70 = arith.addf %67, %69 : vector<4x16x16xf32>
    %cst_26 = arith.constant dense<0xFF800000> : vector<4x16xf32>
    %71 = vector.multi_reduction <maximumf>, %70, %cst_26 [2] : vector<4x16x16xf32> to vector<4x16xf32>
    %72 = vector.shape_cast %71 : vector<4x16xf32> to vector<4x16x1xf32>
    %73 = vector.broadcast %72 : vector<4x16x1xf32> to vector<4x16x16xf32>
    %74 = arith.subf %70, %73 : vector<4x16x16xf32>
    %75 = math.exp %74 : vector<4x16x16xf32>
    %cst_27 = arith.constant dense<0.000000e+00> : vector<4x16xf32>
    %76 = vector.multi_reduction <add>, %75, %cst_27 [2] : vector<4x16x16xf32> to vector<4x16xf32>
    %77 = vector.shape_cast %76 : vector<4x16xf32> to vector<4x16x1xf32>
    %78 = tpu.reciprocal %77 {approx = true} : vector<4x16x1xf32> -> vector<4x16x1xf32>
    %79 = vector.broadcast %78 : vector<4x16x1xf32> to vector<4x16x16xf32>
    %80 = arith.mulf %75, %79 : vector<4x16x16xf32>
    "tpu.trace_start"() <{level = 10 : i32, message = "wqk,wkd->wqd"}> : () -> ()
    %cst_28 = arith.constant dense<0.000000e+00> : vector<4x16x8xf32>
    %81 = tpu.matmul %80, %64, %cst_28 {dimension_numbers = #tpu.dot_dimension_numbers<[2], [1], [1], [2], [0, 0, 0, 1, 1, 2], [0], [0]>} : vector<4x16x16xf32>, vector<4x16x8xf32>, vector<4x16x8xf32> -> vector<4x16x8xf32>
    "tpu.trace_stop"() : () -> ()
    %82 = vector.extract_strided_slice %34 {offsets = [0, 16], sizes = [64, 8], strides = [1, 1]} : vector<64x96xf32> to vector<64x8xf32>
    %83 = vector.shape_cast %82 : vector<64x8xf32> to vector<4x16x8xf32>
    %84 = vector.extract_strided_slice %34 {offsets = [0, 48], sizes = [64, 8], strides = [1, 1]} : vector<64x96xf32> to vector<64x8xf32>
    %85 = vector.shape_cast %84 : vector<64x8xf32> to vector<4x16x8xf32>
    %86 = vector.extract_strided_slice %34 {offsets = [0, 80], sizes = [64, 8], strides = [1, 1]} : vector<64x96xf32> to vector<64x8xf32>
    %87 = vector.shape_cast %86 : vector<64x8xf32> to vector<4x16x8xf32>
    "tpu.trace_start"() <{level = 10 : i32, message = "wqd,wkd->wqk"}> : () -> ()
    %cst_29 = arith.constant dense<0.000000e+00> : vector<4x16x16xf32>
    %88 = tpu.matmul %83, %85, %cst_29 {dimension_numbers = #tpu.dot_dimension_numbers<[2], [2], [1], [1], [0, 0, 0, 1, 1, 1], [0], [0]>} : vector<4x16x8xf32>, vector<4x16x8xf32>, vector<4x16x16xf32> -> vector<4x16x16xf32>
    "tpu.trace_stop"() : () -> ()
    %cst_30 = arith.constant 0.353553385 : f32
    %89 = vector.broadcast %cst_30 : f32 to vector<4x16x16xf32>
    %90 = arith.mulf %88, %89 : vector<4x16x16xf32>
    %91 = vector.extract_strided_slice %35 {offsets = [0, 2, 0, 0], sizes = [4, 1, 16, 16], strides = [1, 1, 1, 1]} : vector<4x4x16x16xf32> to vector<4x1x16x16xf32>
    %92 = vector.shape_cast %91 : vector<4x1x16x16xf32> to vector<4x16x16xf32>
    %93 = arith.addf %90, %92 : vector<4x16x16xf32>
    %cst_31 = arith.constant dense<0xFF800000> : vector<4x16xf32>
    %94 = vector.multi_reduction <maximumf>, %93, %cst_31 [2] : vector<4x16x16xf32> to vector<4x16xf32>
    %95 = vector.shape_cast %94 : vector<4x16xf32> to vector<4x16x1xf32>
    %96 = vector.broadcast %95 : vector<4x16x1xf32> to vector<4x16x16xf32>
    %97 = arith.subf %93, %96 : vector<4x16x16xf32>
    %98 = math.exp %97 : vector<4x16x16xf32>
    %cst_32 = arith.constant dense<0.000000e+00> : vector<4x16xf32>
    %99 = vector.multi_reduction <add>, %98, %cst_32 [2] : vector<4x16x16xf32> to vector<4x16xf32>
    %100 = vector.shape_cast %99 : vector<4x16xf32> to vector<4x16x1xf32>
    %101 = tpu.reciprocal %100 {approx = true} : vector<4x16x1xf32> -> vector<4x16x1xf32>
    %102 = vector.broadcast %101 : vector<4x16x1xf32> to vector<4x16x16xf32>
    %103 = arith.mulf %98, %102 : vector<4x16x16xf32>
    "tpu.trace_start"() <{level = 10 : i32, message = "wqk,wkd->wqd"}> : () -> ()
    %cst_33 = arith.constant dense<0.000000e+00> : vector<4x16x8xf32>
    %104 = tpu.matmul %103, %87, %cst_33 {dimension_numbers = #tpu.dot_dimension_numbers<[2], [1], [1], [2], [0, 0, 0, 1, 1, 2], [0], [0]>} : vector<4x16x16xf32>, vector<4x16x8xf32>, vector<4x16x8xf32> -> vector<4x16x8xf32>
    "tpu.trace_stop"() : () -> ()
    %105 = vector.extract_strided_slice %34 {offsets = [0, 24], sizes = [64, 8], strides = [1, 1]} : vector<64x96xf32> to vector<64x8xf32>
    %106 = vector.shape_cast %105 : vector<64x8xf32> to vector<4x16x8xf32>
    %107 = vector.extract_strided_slice %34 {offsets = [0, 56], sizes = [64, 8], strides = [1, 1]} : vector<64x96xf32> to vector<64x8xf32>
    %108 = vector.shape_cast %107 : vector<64x8xf32> to vector<4x16x8xf32>
    %109 = vector.extract_strided_slice %34 {offsets = [0, 88], sizes = [64, 8], strides = [1, 1]} : vector<64x96xf32> to vector<64x8xf32>
    %110 = vector.shape_cast %109 : vector<64x8xf32> to vector<4x16x8xf32>
    "tpu.trace_start"() <{level = 10 : i32, message = "wqd,wkd->wqk"}> : () -> ()
    %cst_34 = arith.constant dense<0.000000e+00> : vector<4x16x16xf32>
    %111 = tpu.matmul %106, %108, %cst_34 {dimension_numbers = #tpu.dot_dimension_numbers<[2], [2], [1], [1], [0, 0, 0, 1, 1, 1], [0], [0]>} : vector<4x16x8xf32>, vector<4x16x8xf32>, vector<4x16x16xf32> -> vector<4x16x16xf32>
    "tpu.trace_stop"() : () -> ()
    %cst_35 = arith.constant 0.353553385 : f32
    %112 = vector.broadcast %cst_35 : f32 to vector<4x16x16xf32>
    %113 = arith.mulf %111, %112 : vector<4x16x16xf32>
    %114 = vector.extract_strided_slice %35 {offsets = [0, 3, 0, 0], sizes = [4, 1, 16, 16], strides = [1, 1, 1, 1]} : vector<4x4x16x16xf32> to vector<4x1x16x16xf32>
    %115 = vector.shape_cast %114 : vector<4x1x16x16xf32> to vector<4x16x16xf32>
    %116 = arith.addf %113, %115 : vector<4x16x16xf32>
    %cst_36 = arith.constant dense<0xFF800000> : vector<4x16xf32>
    %117 = vector.multi_reduction <maximumf>, %116, %cst_36 [2] : vector<4x16x16xf32> to vector<4x16xf32>
    %118 = vector.shape_cast %117 : vector<4x16xf32> to vector<4x16x1xf32>
    %119 = vector.broadcast %118 : vector<4x16x1xf32> to vector<4x16x16xf32>
    %120 = arith.subf %116, %119 : vector<4x16x16xf32>
    %121 = math.exp %120 : vector<4x16x16xf32>
    %cst_37 = arith.constant dense<0.000000e+00> : vector<4x16xf32>
    %122 = vector.multi_reduction <add>, %121, %cst_37 [2] : vector<4x16x16xf32> to vector<4x16xf32>
    %123 = vector.shape_cast %122 : vector<4x16xf32> to vector<4x16x1xf32>
    %124 = tpu.reciprocal %123 {approx = true} : vector<4x16x1xf32> -> vector<4x16x1xf32>
    %125 = vector.broadcast %124 : vector<4x16x1xf32> to vector<4x16x16xf32>
    %126 = arith.mulf %121, %125 : vector<4x16x16xf32>
    "tpu.trace_start"() <{level = 10 : i32, message = "wqk,wkd->wqd"}> : () -> ()
    %cst_38 = arith.constant dense<0.000000e+00> : vector<4x16x8xf32>
    %127 = tpu.matmul %126, %110, %cst_38 {dimension_numbers = #tpu.dot_dimension_numbers<[2], [1], [1], [2], [0, 0, 0, 1, 1, 2], [0], [0]>} : vector<4x16x16xf32>, vector<4x16x8xf32>, vector<4x16x8xf32> -> vector<4x16x8xf32>
    "tpu.trace_stop"() : () -> ()
    %128 = tpu.concatenate %58, %81, %104, %127 in 2 : vector<4x16x8xf32>, vector<4x16x8xf32>, vector<4x16x8xf32>, vector<4x16x8xf32> -> vector<4x16x32xf32>
    %129 = vector.shape_cast %128 : vector<4x16x32xf32> to vector<64x32xf32>
    %c0_39 = arith.constant 0 : index
    %c0_40 = arith.constant 0 : index
    %130 = vector.load %arg6[%c0_39, %c0_40] : memref<32x32xf32, #tpu.memory_space<vmem>>, vector<32x32xf32>
    %cst_41 = arith.constant dense<0.000000e+00> : vector<64x32xf32>
    %131 = tpu.matmul %129, %130, %cst_41 {dimension_numbers = #tpu.dot_dimension_numbers<[1], [0], [0], [1], [0, 0, 1, 1], [], []>} : vector<64x32xf32>, vector<32x32xf32>, vector<64x32xf32> -> vector<64x32xf32>
    %c0_42 = arith.constant 0 : index
    %c0_43 = arith.constant 0 : index
    %132 = vector.load %arg7[%c0_42, %c0_43] : memref<1x32xf32, #tpu.memory_space<vmem>>, vector<1x32xf32>
    %133 = vector.broadcast %132 : vector<1x32xf32> to vector<64x32xf32>
    %134 = arith.addf %131, %133 : vector<64x32xf32>
    %135 = vector.shape_cast %134 : vector<64x32xf32> to vector<4x16x32xf32>
    %c0_44 = arith.constant 0 : index
    %c0_45 = arith.constant 0 : index
    %c0_46 = arith.constant 0 : index
    %136 = vector.load %arg9[%c0_44, %c0_45, %c0_46] : memref<4x16x32xf32, #tpu.memory_space<vmem>>, vector<4x16x32xf32>
    tpu.vector_store %arg9[%c0_44, %c0_45, %c0_46], %135 {strides = array<i32>} : memref<4x16x32xf32, #tpu.memory_space<vmem>>, vector<4x16x32xf32>,
    return
  }
  func.func @transform_0(%arg0: i32) -> (i32, i32, i32) {
    %c0_i32 = arith.constant 0 : i32
    %c0_i32_0 = arith.constant 0 : i32
    %c0_i32_1 = arith.constant 0 : i32
    return %arg0, %c0_i32, %c0_i32_0 : i32, i32, i32
  }
  func.func @transform_1(%arg0: i32) -> (i32, i32) {
    %c0_i32 = arith.constant 0 : i32
    %c0_i32_0 = arith.constant 0 : i32
    %c0_i32_1 = arith.constant 0 : i32
    return %c0_i32, %c0_i32_0 : i32, i32
  }
  func.func @transform_2(%arg0: i32) -> (i32, i32) {
    %c0_i32 = arith.constant 0 : i32
    %c0_i32_0 = arith.constant 0 : i32
    %c0_i32_1 = arith.constant 0 : i32
    return %c0_i32, %c0_i32_0 : i32, i32
  }
  func.func @transform_3(%arg0: i32) -> (i32, i32) {
    %c0_i32 = arith.constant 0 : i32
    %c0_i32_0 = arith.constant 0 : i32
    %c0_i32_1 = arith.constant 0 : i32
    return %c0_i32, %c0_i32_0 : i32, i32
  }
  func.func @transform_4(%arg0: i32) -> (i32, i32) {
    %c0_i32 = arith.constant 0 : i32
    %c0_i32_0 = arith.constant 0 : i32
    %c0_i32_1 = arith.constant 0 : i32
    return %c0_i32, %c0_i32_0 : i32, i32
  }
  func.func @transform_5(%arg0: i32) -> (i32, i32) {
    %c0_i32 = arith.constant 0 : i32
    %c0_i32_0 = arith.constant 0 : i32
    %c0_i32_1 = arith.constant 0 : i32
    return %c0_i32, %c0_i32_0 : i32, i32
  }
  func.func @transform_6(%arg0: i32) -> (i32, i32) {
    %c0_i32 = arith.constant 0 : i32
    %c0_i32_0 = arith.constant 0 : i32
    %c0_i32_1 = arith.constant 0 : i32
    return %c0_i32, %c0_i32_0 : i32, i32
  }
  func.func @transform_7(%arg0: i32) -> (i32, i32, i32, i32) {
    %c0_i32 = arith.constant 0 : i32
    %c0_i32_0 = arith.constant 0 : i32
    %c0_i32_1 = arith.constant 0 : i32
    %c0_i32_2 = arith.constant 0 : i32
    %c0_i32_3 = arith.constant 0 : i32
    return %c0_i32, %c0_i32_0, %c0_i32_1, %c0_i32_2 : i32, i32, i32, i32
  }
  func.func @transform_8(%arg0: i32) -> (i32, i32, i32) {
    %c0_i32 = arith.constant 0 : i32
    %c0_i32_0 = arith.constant 0 : i32
    %c0_i32_1 = arith.constant 0 : i32
    return %arg0, %c0_i32, %c0_i32_0 : i32, i32, i32
  }
}

module attributes {stable_mosaic.version = 11 : i64} {
  func.func @_mlp_block_kernel(%arg0: i32, %arg1: memref<64x32xf32, #tpu.memory_space<vmem>>, %arg2: memref<64x32xf32, #tpu.memory_space<vmem>>, %arg3: memref<1x32xf32, #tpu.memory_space<vmem>>, %arg4: memref<1x32xf32, #tpu.memory_space<vmem>>, %arg5: memref<32x128xf32, #tpu.memory_space<vmem>>, %arg6: memref<1x128xf32, #tpu.memory_space<vmem>>, %arg7: memref<128x32xf32, #tpu.memory_space<vmem>>, %arg8: memref<1x32xf32, #tpu.memory_space<vmem>>, %arg9: memref<64x32xf32, #tpu.memory_space<vmem>>) attributes {dimension_semantics = [#tpu.dimension_semantics<parallel>], iteration_bounds = array<i64: 2>, scalar_prefetch = 0 : i64, scratch_operands = 0 : i64, tpu.core_type = #tpu.core_type<tc>, window_params = [{transform_indices = @transform_0, window_bounds = array<i64: 64, 32>}, {transform_indices = @transform_1, window_bounds = array<i64: 64, 32>}, {pipeline_mode = #tpu.pipeline_mode<synchronous>, transform_indices = @transform_2, window_bounds = array<i64: 1, 32>}, {pipeline_mode = #tpu.pipeline_mode<synchronous>, transform_indices = @transform_3, window_bounds = array<i64: 1, 32>}, {pipeline_mode = #tpu.pipeline_mode<synchronous>, transform_indices = @transform_4, window_bounds = array<i64: 32, 128>}, {pipeline_mode = #tpu.pipeline_mode<synchronous>, transform_indices = @transform_5, window_bounds = array<i64: 1, 128>}, {pipeline_mode = #tpu.pipeline_mode<synchronous>, transform_indices = @transform_6, window_bounds = array<i64: 128, 32>}, {pipeline_mode = #tpu.pipeline_mode<synchronous>, transform_indices = @transform_7, window_bounds = array<i64: 1, 32>}, {transform_indices = @transform_8, window_bounds = array<i64: 64, 32>}]} {
    %c0 = arith.constant 0 : index
    %c0_0 = arith.constant 0 : index
    %0 = vector.load %arg1[%c0, %c0_0] : memref<64x32xf32, #tpu.memory_space<vmem>>, vector<64x32xf32>
    %c0_1 = arith.constant 0 : index
    %c0_2 = arith.constant 0 : index
    %1 = vector.load %arg2[%c0_1, %c0_2] : memref<64x32xf32, #tpu.memory_space<vmem>>, vector<64x32xf32>
    %2 = arith.addf %0, %1 : vector<64x32xf32>
    %c0_3 = arith.constant 0 : index
    %c0_4 = arith.constant 0 : index
    %3 = vector.load %arg3[%c0_3, %c0_4] : memref<1x32xf32, #tpu.memory_space<vmem>>, vector<1x32xf32>
    %c0_5 = arith.constant 0 : index
    %c0_6 = arith.constant 0 : index
    %4 = vector.load %arg4[%c0_5, %c0_6] : memref<1x32xf32, #tpu.memory_space<vmem>>, vector<1x32xf32>
    %cst = arith.constant dense<0.000000e+00> : vector<64xf32>
    %5 = vector.multi_reduction <add>, %2, %cst [1] : vector<64x32xf32> to vector<64xf32>
    %6 = vector.shape_cast %5 : vector<64xf32> to vector<64x1xf32>
    %cst_7 = arith.constant 3.200000e+01 : f32
    %7 = vector.broadcast %cst_7 : f32 to vector<64x1xf32>
    %8 = arith.divf %6, %7 : vector<64x1xf32>
    %9 = vector.broadcast %8 : vector<64x1xf32> to vector<64x32xf32>
    %10 = arith.subf %2, %9 : vector<64x32xf32>
    %11 = arith.mulf %10, %10 : vector<64x32xf32>
    %cst_8 = arith.constant dense<0.000000e+00> : vector<64xf32>
    %12 = vector.multi_reduction <add>, %11, %cst_8 [1] : vector<64x32xf32> to vector<64xf32>
    %13 = vector.shape_cast %12 : vector<64xf32> to vector<64x1xf32>
    %cst_9 = arith.constant 3.200000e+01 : f32
    %14 = vector.broadcast %cst_9 : f32 to vector<64x1xf32>
    %15 = arith.divf %13, %14 : vector<64x1xf32>
    %16 = vector.broadcast %8 : vector<64x1xf32> to vector<64x32xf32>
    %17 = arith.subf %2, %16 : vector<64x32xf32>
    %cst_10 = arith.constant 9.99999974E-6 : f32
    %18 = vector.broadcast %cst_10 : f32 to vector<64x1xf32>
    %19 = arith.addf %15, %18 : vector<64x1xf32>
    %20 = math.rsqrt %19 : vector<64x1xf32>
    %21 = vector.broadcast %20 : vector<64x1xf32> to vector<64x32xf32>
    %22 = arith.mulf %17, %21 : vector<64x32xf32>
    %23 = vector.broadcast %3 : vector<1x32xf32> to vector<64x32xf32>
    %24 = arith.mulf %22, %23 : vector<64x32xf32>
    %25 = vector.broadcast %4 : vector<1x32xf32> to vector<64x32xf32>
    %26 = arith.addf %24, %25 : vector<64x32xf32>
    %c0_11 = arith.constant 0 : index
    %c0_12 = arith.constant 0 : index
    %27 = vector.load %arg5[%c0_11, %c0_12] : memref<32x128xf32, #tpu.memory_space<vmem>>, vector<32x128xf32>
    %cst_13 = arith.constant dense<0.000000e+00> : vector<64x128xf32>
    %28 = tpu.matmul %26, %27, %cst_13 {dimension_numbers = #tpu.dot_dimension_numbers<[1], [0], [0], [1], [0, 0, 1, 1], [], []>} : vector<64x32xf32>, vector<32x128xf32>, vector<64x128xf32> -> vector<64x128xf32>
    %c0_14 = arith.constant 0 : index
    %c0_15 = arith.constant 0 : index
    %29 = vector.load %arg6[%c0_14, %c0_15] : memref<1x128xf32, #tpu.memory_space<vmem>>, vector<1x128xf32>
    %30 = vector.broadcast %29 : vector<1x128xf32> to vector<64x128xf32>
    %31 = arith.addf %28, %30 : vector<64x128xf32>
    %cst_16 = arith.constant 5.000000e-01 : f32
    %32 = vector.broadcast %cst_16 : f32 to vector<64x128xf32>
    %33 = arith.mulf %32, %31 : vector<64x128xf32>
    %cst_17 = arith.constant 1.41421354 : f32
    %34 = vector.broadcast %cst_17 : f32 to vector<64x128xf32>
    %35 = arith.divf %31, %34 : vector<64x128xf32>
    %36 = math.erf %35 : vector<64x128xf32>
    %cst_18 = arith.constant 1.000000e+00 : f32
    %37 = vector.broadcast %cst_18 : f32 to vector<64x128xf32>
    %38 = arith.addf %37, %36 : vector<64x128xf32>
    %39 = arith.mulf %33, %38 : vector<64x128xf32>
    %c0_19 = arith.constant 0 : index
    %c0_20 = arith.constant 0 : index
    %40 = vector.load %arg7[%c0_19, %c0_20] : memref<128x32xf32, #tpu.memory_space<vmem>>, vector<128x32xf32>
    %cst_21 = arith.constant dense<0.000000e+00> : vector<64x32xf32>
    %41 = tpu.matmul %39, %40, %cst_21 {dimension_numbers = #tpu.dot_dimension_numbers<[1], [0], [0], [1], [0, 0, 1, 1], [], []>} : vector<64x128xf32>, vector<128x32xf32>, vector<64x32xf32> -> vector<64x32xf32>
    %c0_22 = arith.constant 0 : index
    %c0_23 = arith.constant 0 : index
    %42 = vector.load %arg8[%c0_22, %c0_23] : memref<1x32xf32, #tpu.memory_space<vmem>>, vector<1x32xf32>
    %43 = vector.broadcast %42 : vector<1x32xf32> to vector<64x32xf32>
    %44 = arith.addf %41, %43 : vector<64x32xf32>
    %45 = arith.addf %2, %44 : vector<64x32xf32>
    %c0_24 = arith.constant 0 : index
    %c0_25 = arith.constant 0 : index
    %46 = vector.load %arg9[%c0_24, %c0_25] : memref<64x32xf32, #tpu.memory_space<vmem>>, vector<64x32xf32>
    tpu.vector_store %arg9[%c0_24, %c0_25], %45 {strides = array<i32>} : memref<64x32xf32, #tpu.memory_space<vmem>>, vector<64x32xf32>,
    return
  }
  func.func @transform_0(%arg0: i32) -> (i32, i32) {
    %c0_i32 = arith.constant 0 : i32
    %c0_i32_0 = arith.constant 0 : i32
    return %arg0, %c0_i32 : i32, i32
  }
  func.func @transform_1(%arg0: i32) -> (i32, i32) {
    %c0_i32 = arith.constant 0 : i32
    %c0_i32_0 = arith.constant 0 : i32
    return %arg0, %c0_i32 : i32, i32
  }
  func.func @transform_2(%arg0: i32) -> (i32, i32) {
    %c0_i32 = arith.constant 0 : i32
    %c0_i32_0 = arith.constant 0 : i32
    %c0_i32_1 = arith.constant 0 : i32
    return %c0_i32, %c0_i32_0 : i32, i32
  }
  func.func @transform_3(%arg0: i32) -> (i32, i32) {
    %c0_i32 = arith.constant 0 : i32
    %c0_i32_0 = arith.constant 0 : i32
    %c0_i32_1 = arith.constant 0 : i32
    return %c0_i32, %c0_i32_0 : i32, i32
  }
  func.func @transform_4(%arg0: i32) -> (i32, i32) {
    %c0_i32 = arith.constant 0 : i32
    %c0_i32_0 = arith.constant 0 : i32
    %c0_i32_1 = arith.constant 0 : i32
    return %c0_i32, %c0_i32_0 : i32, i32
  }
  func.func @transform_5(%arg0: i32) -> (i32, i32) {
    %c0_i32 = arith.constant 0 : i32
    %c0_i32_0 = arith.constant 0 : i32
    %c0_i32_1 = arith.constant 0 : i32
    return %c0_i32, %c0_i32_0 : i32, i32
  }
  func.func @transform_6(%arg0: i32) -> (i32, i32) {
    %c0_i32 = arith.constant 0 : i32
    %c0_i32_0 = arith.constant 0 : i32
    %c0_i32_1 = arith.constant 0 : i32
    return %c0_i32, %c0_i32_0 : i32, i32
  }
  func.func @transform_7(%arg0: i32) -> (i32, i32) {
    %c0_i32 = arith.constant 0 : i32
    %c0_i32_0 = arith.constant 0 : i32
    %c0_i32_1 = arith.constant 0 : i32
    return %c0_i32, %c0_i32_0 : i32, i32
  }
  func.func @transform_8(%arg0: i32) -> (i32, i32) {
    %c0_i32 = arith.constant 0 : i32
    %c0_i32_0 = arith.constant 0 : i32
    return %arg0, %c0_i32 : i32, i32
  }
}

module attributes {stable_mosaic.version = 11 : i64} {
  func.func @_head_kernel(%arg0: i32, %arg1: memref<64x32xf32, #tpu.memory_space<vmem>>, %arg2: memref<1x32xf32, #tpu.memory_space<vmem>>, %arg3: memref<1x32xf32, #tpu.memory_space<vmem>>, %arg4: memref<32x128xf32, #tpu.memory_space<vmem>>, %arg5: memref<1x128xf32, #tpu.memory_space<vmem>>, %arg6: memref<64x128xf32, #tpu.memory_space<vmem>>) attributes {dimension_semantics = [#tpu.dimension_semantics<parallel>], iteration_bounds = array<i64: 2>, scalar_prefetch = 0 : i64, scratch_operands = 0 : i64, tpu.core_type = #tpu.core_type<tc>, window_params = [{transform_indices = @transform_0, window_bounds = array<i64: 64, 32>}, {pipeline_mode = #tpu.pipeline_mode<synchronous>, transform_indices = @transform_1, window_bounds = array<i64: 1, 32>}, {pipeline_mode = #tpu.pipeline_mode<synchronous>, transform_indices = @transform_2, window_bounds = array<i64: 1, 32>}, {pipeline_mode = #tpu.pipeline_mode<synchronous>, transform_indices = @transform_3, window_bounds = array<i64: 32, 128>}, {pipeline_mode = #tpu.pipeline_mode<synchronous>, transform_indices = @transform_4, window_bounds = array<i64: 1, 128>}, {transform_indices = @transform_5, window_bounds = array<i64: 64, 128>}]} {
    %c0 = arith.constant 0 : index
    %c0_0 = arith.constant 0 : index
    %0 = vector.load %arg1[%c0, %c0_0] : memref<64x32xf32, #tpu.memory_space<vmem>>, vector<64x32xf32>
    %c0_1 = arith.constant 0 : index
    %c0_2 = arith.constant 0 : index
    %1 = vector.load %arg2[%c0_1, %c0_2] : memref<1x32xf32, #tpu.memory_space<vmem>>, vector<1x32xf32>
    %c0_3 = arith.constant 0 : index
    %c0_4 = arith.constant 0 : index
    %2 = vector.load %arg3[%c0_3, %c0_4] : memref<1x32xf32, #tpu.memory_space<vmem>>, vector<1x32xf32>
    %cst = arith.constant dense<0.000000e+00> : vector<64xf32>
    %3 = vector.multi_reduction <add>, %0, %cst [1] : vector<64x32xf32> to vector<64xf32>
    %4 = vector.shape_cast %3 : vector<64xf32> to vector<64x1xf32>
    %cst_5 = arith.constant 3.200000e+01 : f32
    %5 = vector.broadcast %cst_5 : f32 to vector<64x1xf32>
    %6 = arith.divf %4, %5 : vector<64x1xf32>
    %7 = vector.broadcast %6 : vector<64x1xf32> to vector<64x32xf32>
    %8 = arith.subf %0, %7 : vector<64x32xf32>
    %9 = arith.mulf %8, %8 : vector<64x32xf32>
    %cst_6 = arith.constant dense<0.000000e+00> : vector<64xf32>
    %10 = vector.multi_reduction <add>, %9, %cst_6 [1] : vector<64x32xf32> to vector<64xf32>
    %11 = vector.shape_cast %10 : vector<64xf32> to vector<64x1xf32>
    %cst_7 = arith.constant 3.200000e+01 : f32
    %12 = vector.broadcast %cst_7 : f32 to vector<64x1xf32>
    %13 = arith.divf %11, %12 : vector<64x1xf32>
    %14 = vector.broadcast %6 : vector<64x1xf32> to vector<64x32xf32>
    %15 = arith.subf %0, %14 : vector<64x32xf32>
    %cst_8 = arith.constant 9.99999974E-6 : f32
    %16 = vector.broadcast %cst_8 : f32 to vector<64x1xf32>
    %17 = arith.addf %13, %16 : vector<64x1xf32>
    %18 = math.rsqrt %17 : vector<64x1xf32>
    %19 = vector.broadcast %18 : vector<64x1xf32> to vector<64x32xf32>
    %20 = arith.mulf %15, %19 : vector<64x32xf32>
    %21 = vector.broadcast %1 : vector<1x32xf32> to vector<64x32xf32>
    %22 = arith.mulf %20, %21 : vector<64x32xf32>
    %23 = vector.broadcast %2 : vector<1x32xf32> to vector<64x32xf32>
    %24 = arith.addf %22, %23 : vector<64x32xf32>
    %cst_9 = arith.constant 5.000000e-01 : f32
    %25 = vector.broadcast %cst_9 : f32 to vector<64x32xf32>
    %26 = arith.mulf %25, %24 : vector<64x32xf32>
    %cst_10 = arith.constant 1.41421354 : f32
    %27 = vector.broadcast %cst_10 : f32 to vector<64x32xf32>
    %28 = arith.divf %24, %27 : vector<64x32xf32>
    %29 = math.erf %28 : vector<64x32xf32>
    %cst_11 = arith.constant 1.000000e+00 : f32
    %30 = vector.broadcast %cst_11 : f32 to vector<64x32xf32>
    %31 = arith.addf %30, %29 : vector<64x32xf32>
    %32 = arith.mulf %26, %31 : vector<64x32xf32>
    %c0_12 = arith.constant 0 : index
    %c0_13 = arith.constant 0 : index
    %33 = vector.load %arg4[%c0_12, %c0_13] : memref<32x128xf32, #tpu.memory_space<vmem>>, vector<32x128xf32>
    %cst_14 = arith.constant dense<0.000000e+00> : vector<64x128xf32>
    %34 = tpu.matmul %32, %33, %cst_14 {dimension_numbers = #tpu.dot_dimension_numbers<[1], [0], [0], [1], [0, 0, 1, 1], [], []>} : vector<64x32xf32>, vector<32x128xf32>, vector<64x128xf32> -> vector<64x128xf32>
    %c0_15 = arith.constant 0 : index
    %c0_16 = arith.constant 0 : index
    %35 = vector.load %arg5[%c0_15, %c0_16] : memref<1x128xf32, #tpu.memory_space<vmem>>, vector<1x128xf32>
    %36 = vector.broadcast %35 : vector<1x128xf32> to vector<64x128xf32>
    %37 = arith.addf %34, %36 : vector<64x128xf32>
    %c0_17 = arith.constant 0 : index
    %c0_18 = arith.constant 0 : index
    %38 = vector.load %arg6[%c0_17, %c0_18] : memref<64x128xf32, #tpu.memory_space<vmem>>, vector<64x128xf32>
    tpu.vector_store %arg6[%c0_17, %c0_18], %37 {strides = array<i32>} : memref<64x128xf32, #tpu.memory_space<vmem>>, vector<64x128xf32>,
    return
  }
  func.func @transform_0(%arg0: i32) -> (i32, i32) {
    %c0_i32 = arith.constant 0 : i32
    %c0_i32_0 = arith.constant 0 : i32
    return %arg0, %c0_i32 : i32, i32
  }
  func.func @transform_1(%arg0: i32) -> (i32, i32) {
    %c0_i32 = arith.constant 0 : i32
    %c0_i32_0 = arith.constant 0 : i32
    %c0_i32_1 = arith.constant 0 : i32
    return %c0_i32, %c0_i32_0 : i32, i32
  }
  func.func @transform_2(%arg0: i32) -> (i32, i32) {
    %c0_i32 = arith.constant 0 : i32
    %c0_i32_0 = arith.constant 0 : i32
    %c0_i32_1 = arith.constant 0 : i32
    return %c0_i32, %c0_i32_0 : i32, i32
  }
  func.func @transform_3(%arg0: i32) -> (i32, i32) {
    %c0_i32 = arith.constant 0 : i32
    %c0_i32_0 = arith.constant 0 : i32
    %c0_i32_1 = arith.constant 0 : i32
    return %c0_i32, %c0_i32_0 : i32, i32
  }
  func.func @transform_4(%arg0: i32) -> (i32, i32) {
    %c0_i32 = arith.constant 0 : i32
    %c0_i32_0 = arith.constant 0 : i32
    %c0_i32_1 = arith.constant 0 : i32
    return %c0_i32, %c0_i32_0 : i32, i32
  }
  func.func @transform_5(%arg0: i32) -> (i32, i32) {
    %c0_i32 = arith.constant 0 : i32
    %c0_i32_0 = arith.constant 0 : i32
    return %arg0, %c0_i32 : i32, i32
  }
}

</mosaic_0001>

<bundles_post_ra>
// kernel: forward.6
= control target key start
LH: loop header
LB: loop body
LE: loop exit
PB: predicated region body
PF: predicated region fallthrough
CT: control target
= control target key end

     0   :  { %s427_s15 = smov 0   ;;  %s506_s0 = inlined_call_operand.vmem [shape: f32[2,64,16], index: 0, kind: input, shape index: {}]   ;;  %s507_s1 = inlined_call_operand.vmem [shape: f32[16,32], index: 1, kind: input, shape index: {}]   ;;  %s508_s2 = inlined_call_operand.vmem [shape: f32[1,32], index: 2, kind: input, shape index: {}]   ;;  %s509_s3 = inlined_call_operand.vmem [shape: f32[1,64,32], index: 3, kind: input, shape index: {}]   ;;  %s510_s4 = inlined_call_operand.vmem [shape: f32[2,64,32], index: 4, kind: output, shape index: {}]  }
   0x1 LB: > { %s358_s16 = sadd.s32 4294967295, %s400_s15   ;;  %p362_p0 = scmp.ge.s32.totalorder %s400_s15, 1  ;;  %s400_s15 = sphi %s427_s15, %s14_s15  }
   0x2   : > { %p162_p1 = scmp.lt.s32.totalorder %s400_s15, 3 }
   0x4   : > { %p163_p2 = pnand %p362_p0, %p162_p1 }
   0x5   : > { %p188_p3 = scmp.lt.s32.totalorder (!%p163_p2), %s358_s16, 1 }
   0x6   : > { %166 = sbr.rel (%p163_p2) target bundleno = 162 (0xa2), region = 36 }
   0xb   : > { %v207_v0 = vld [vmem:[%s507_s1 + $0x8] sm:$0xff]  ;;  %v206_v1 = vld [vmem:[%s507_s1] sm:$0xff]  ;;  %s512_s16 = smov (!%p188_p3, %s358_s16), 1  ;;  %vm212_vm0 = vcmask 130048   ;;  %v280_v14 = vld [vmem:[%s509_s3 + $0x10] sm:$0xff]  ;;  %vm294_vm1 = vcmask 261120  }
   0xc   : > { %380 = vmatpush.msra.mxu2 %v207_v0  ;;  %381 = vmatpush.msra.mxu3 %v207_v0  ;;  %s377_s21 = sshll.u32 %s512_s16, 6  ;;  %v393_v10 = vld [vmem:[%s508_s2] ss:$0 sm:$0xff]  ;;  %v284_v22 = vld [vmem:[%s509_s3 + $0x30] sm:$0xff]  ;;  %v279_v28 = vld [vmem:[%s509_s3 + $0x8] sm:$0xff] }
   0xd   : > { %251 = vmatpush.msra.mxu0 %v207_v0  ;;  %379 = vmatpush.msra.mxu1 %v207_v0  ;;  %s192_s24 = scalar_lea.vmem %s506_s0, %s377_s21  ;;  %v278_v12 = vld [vmem:[%s509_s3] sm:$0xff]  ;;  %s467_s7 = scalar_lea.vmem %s510_s4, %s377_s21  ;;  %v281_v30 = vld [vmem:[%s509_s3 + $0x18] sm:$0xff]  ;;  %v283_v36 = vld [vmem:[%s509_s3 + $0x28] sm:$0xff] }
   0xe   : > { %383 = vmatpush.msra.mxu2 %v206_v1  ;;  %384 = vmatpush.msra.mxu3 %v206_v1  ;;  %v202_v2 = vld [vmem:[%s192_s24 + $0x20] sm:$0xff]  ;;  %v204_v3 = vld [vmem:[%s192_s24 + $0x30] sm:$0xff]  ;;  %v203_v6 = vld [vmem:[%s192_s24 + $0x28] sm:$0xff] }
   0xf   : > { %252 = vmatpush.msra.mxu0 %v206_v1  ;;  %382 = vmatpush.msra.mxu1 %v206_v1  ;;  %v198_v4 = vld [vmem:[%s192_s24] sm:$0xff]  ;;  %v200_v5 = vld [vmem:[%s192_s24 + $0x10] sm:$0xff]  ;;  %v205_v7 = vld [vmem:[%s192_s24 + $0x38] sm:$0xff] }
  0x10   : > { %371 = vmatmul.msk.f32.vlgmr.msra.gmra.mxu2 %vm212_vm0, %v202_v2  ;;  %373 = vmatmul.msk.f32.vlgmr.msra.gmra.mxu3 %vm212_vm0, %v204_v3  ;;  %v199_v8 = vld [vmem:[%s192_s24 + $0x8] sm:$0xff]  ;;  %v201_v9 = vld [vmem:[%s192_s24 + $0x18] sm:$0xff]  ;;  %v282_v20 = vld [vmem:[%s509_s3 + $0x20] sm:$0xff] }
  0x11   : > { %367 = vmatmul.msk.f32.vlgmr.msra.gmra.mxu0 %vm212_vm0, %v198_v4  ;;  %369 = vmatmul.msk.f32.vlgmr.msra.gmra.mxu1 %vm212_vm0, %v200_v5  ;;  %v285_v38 = vld [vmem:[%s509_s3 + $0x38] sm:$0xff] }
  0x18   : > { %372 = vmatmul.msk.f32.gmra.mxu2 %vm212_vm0, %v203_v6  ;;  %374 = vmatmul.msk.f32.gmra.mxu3 %vm212_vm0, %v205_v7 }
  0x19   : > { %368 = vmatmul.msk.f32.gmra.mxu0 %vm212_vm0, %v199_v8  ;;  %370 = vmatmul.msk.f32.gmra.mxu1 %vm212_vm0, %v201_v9 }
  0x8e   : > { %v254_v11 = vpop.f32.mrf.mxu0  ;;  %v260_v13 = vpop.f32.mrf.mxu1 }
  0x8f   : > { %v255_v15 = vadd.f32 %v393_v10, %v254_v11  ;;  %v261_v16 = vadd.f32 %v393_v10, %v260_v13 }
  0x91   : > { %v286_v17 = vadd.f32 %v278_v12, %v255_v15  ;;  %v288_v18 = vadd.f32 %v280_v14, %v261_v16 }
  0x93   : > { %295 = vst.msk [vmem:[%s467_s7] sm:$0xff] %vm294_vm1, %v286_v17  ;;  %v266_v19 = vpop.f32.mrf.mxu2  ;;  %v272_v21 = vpop.f32.mrf.mxu3 }
  0x94   : > { %297 = vst.msk [vmem:[%s467_s7 + $0x10] sm:$0xff] %vm294_vm1, %v288_v18  ;;  %v267_v23 = vadd.f32 %v393_v10, %v266_v19  ;;  %v273_v24 = vadd.f32 %v393_v10, %v272_v21 }
  0x96   : > { %v290_v25 = vadd.f32 %v282_v20, %v267_v23  ;;  %v292_v26 = vadd.f32 %v284_v22, %v273_v24  ;;  %v257_v27 = vpop.f32.mrf.mxu0  ;;  %v263_v29 = vpop.f32.mrf.mxu1 }
  0x97   : > { %v258_v31 = vadd.f32 %v393_v10, %v257_v27  ;;  %v264_v32 = vadd.f32 %v393_v10, %v263_v29 }
  0x98   : > { %299 = vst.msk [vmem:[%s467_s7 + $0x20] sm:$0xff] %vm294_vm1, %v290_v25 }
  0x99   : > { %301 = vst.msk [vmem:[%s467_s7 + $0x30] sm:$0xff] %vm294_vm1, %v292_v26  ;;  %v287_v33 = vadd.f32 %v279_v28, %v258_v31  ;;  %v289_v34 = vadd.f32 %v281_v30, %v264_v32 }
  0x9b   : > { %296 = vst.msk [vmem:[%s467_s7 + $0x8] sm:$0xff] %vm294_vm1, %v287_v33  ;;  %v269_v35 = vpop.f32.mrf.mxu2  ;;  %v275_v37 = vpop.f32.mrf.mxu3 }
  0x9c   : > { %298 = vst.msk [vmem:[%s467_s7 + $0x18] sm:$0xff] %vm294_vm1, %v289_v34  ;;  %v270_v39 = vadd.f32 %v393_v10, %v269_v35  ;;  %v276_v40 = vadd.f32 %v393_v10, %v275_v37 }
  0x9e   : > { %v291_v41 = vadd.f32 %v283_v36, %v270_v39  ;;  %v293_v42 = vadd.f32 %v285_v38, %v276_v40 }
  0xa0   : > { %300 = vst.msk [vmem:[%s467_s7 + $0x28] sm:$0xff] %vm294_vm1, %v291_v41 }
  0xa1   : > { %302 = vst.msk [vmem:[%s467_s7 + $0x38] sm:$0xff] %vm294_vm1, %v293_v42 }
  0xa2 PF: > { %s14_s15 = sadd.s32 1, %s400_s15  }
  0xa3   : > { %p11_p4 = scmp.ge.s32.totalorder %s14_s15, 4  }
  0xa5   :  { %13 = sbr.rel (!%p11_p4) target bundleno = 1 (0x1), region = 66 }

// kernel: forward.8
= control target key start
LH: loop header
LB: loop body
LE: loop exit
PB: predicated region body
PF: predicated region fallthrough
CT: control target
= control target key end

     0   :  { %s1310_s27 = smov 0   ;;  %s1956_s0 = inlined_call_operand.vmem [shape: f32[128,32], index: 0, kind: input, shape index: {}]   ;;  %s1957_s1 = inlined_call_operand.vmem [shape: f32[128,32], index: 1, kind: input, shape index: {}]   ;;  %s1958_s2 = inlined_call_operand.vmem [shape: f32[1,32], index: 2, kind: input, shape index: {}]   ;;  %s1959_s3 = inlined_call_operand.vmem [shape: f32[1,32], index: 3, kind: input, shape index: {}]   ;;  %s1960_s4 = inlined_call_operand.vmem [shape: f32[32,128], index: 4, kind: input, shape index: {}]   ;;  %s1961_s5 = inlined_call_operand.vmem [shape: f32[1,128], index: 5, kind: input, shape index: {}]   ;;  %s1962_s6 = inlined_call_operand.vmem [shape: f32[128,32], index: 6, kind: input, shape index: {}]   ;;  %s1963_s7 = inlined_call_operand.vmem [shape: f32[1,32], index: 7, kind: input, shape index: {}]   ;;  %s1964_s8 = inlined_call_operand.vmem [shape: f32[128,32], index: 8, kind: output, shape index: {}]  }
   0x1 LB: > { %s1140_s28 = sadd.s32 4294967295, %s1261_s27   ;;  %p1144_p0 = scmp.ge.s32.totalorder %s1261_s27, 1  ;;  %s1261_s27 = sphi %s1310_s27, %s18_s27  }
   0x2   : > { %p274_p1 = scmp.lt.s32.totalorder %s1261_s27, 3 }
   0x4   : > { %p275_p2 = pnand %p1144_p0, %p274_p1 }
   0x5   : > { %s1145_s29 = sshll.u32 (!%p275_p2), %s1140_s28, 3 }
   0x6   : > { %278 = sbr.rel (%p275_p2) target bundleno = 668 (0x29c), region = 52  ;;  %p314_p3 = scmp.lt.s32.totalorder (!%p275_p2), %s1145_s29, 15 }
   0xb   : > { %s1978_s29 = smov (!%p314_p3, %s1145_s29), 15  ;;  %vm357_vm0 = vcmask 261120   ;;  %v1263_v32 = vmov 32.0  }
   0xc   : > { %s1318_s30 = sshll.u32 %s1978_s29, 3  ;;  %1219 = vrcp.f32 %v1263_v32 }
   0xd   : > { %s1324_s11 = scalar_lea.vmem %s1956_s0, %s1318_s30  ;;  %s1330_s14 = scalar_lea.vmem %s1957_s1, %s1318_s30 }
   0xe   : > { %v337_v0 = vld [vmem:[%s1324_s11 + $0x30] sm:$0xff]  ;;  %v331_v5 = vld [vmem:[%s1324_s11] sm:$0xff]  ;;  %v334_v11 = vld [vmem:[%s1324_s11 + $0x18] sm:$0xff]  ;;  %s329_s25 = scalar_lea.vmem %s1964_s8, %s1318_s30 }
   0xf   : > { %v345_v1 = vld [vmem:[%s1330_s14 + $0x30] sm:$0xff]  ;;  %v339_v6 = vld [vmem:[%s1330_s14] sm:$0xff]  ;;  %v342_v13 = vld [vmem:[%s1330_s14 + $0x18] sm:$0xff] }
  0x10   : > { %v333_v2 = vld [vmem:[%s1324_s11 + $0x10] sm:$0xff]  ;;  %v1335_v3 = vadd.f32 %v345_v1, %v337_v0  ;;  %v1342_v8 = vadd.f32 %v339_v6, %v331_v5  ;;  %v335_v9 = vld [vmem:[%s1324_s11 + $0x20] sm:$0xff]  ;;  %v332_v14 = vld [vmem:[%s1324_s11 + $0x8] sm:$0xff]  ;;  %v1358_v19 = vadd.f32 %v342_v13, %v334_v11 }
  0x11   : > { %v341_v4 = vld [vmem:[%s1330_s14 + $0x10] sm:$0xff]  ;;  %v343_v10 = vld [vmem:[%s1330_s14 + $0x20] sm:$0xff]  ;;  %v340_v15 = vld [vmem:[%s1330_s14 + $0x8] sm:$0xff] }
  0x12   : > { %v1340_v7 = vadd.f32 %v341_v4, %v333_v2  ;;  %v376_v12 = vsel %vm357_vm0, %v1335_v3, 0.0  ;;  %v358_v17 = vsel %vm357_vm0, %v1342_v8, 0.0  ;;  %v1356_v18 = vadd.f32 %v343_v10, %v335_v9  ;;  %v338_v24 = vld [vmem:[%s1324_s11 + $0x38] sm:$0xff]  ;;  %v336_v26 = vld [vmem:[%s1324_s11 + $0x28] sm:$0xff]  ;;  %v1220_v33 = vpop.eup %1219 }
  0x13   : > { %377 = vadd.xlane.f32.xlu2 %v376_v12  ;;  %359 = vadd.xlane.f32.xlu0 %v358_v17  ;;  %v1360_v20 = vadd.f32 %v340_v15, %v332_v14  ;;  %v367_v22 = vsel %vm357_vm0, %v1358_v19, 0.0  ;;  %v346_v25 = vld [vmem:[%s1330_s14 + $0x38] sm:$0xff]  ;;  %v344_v27 = vld [vmem:[%s1330_s14 + $0x28] sm:$0xff]  ;;  %v383_v34 = vmul.f32 32.0, %v1220_v33  ;;  %vm387_vm1 = vweird.f32 %v1220_v33 }
  0x14   : > { %v364_v16 = vsel %vm357_vm0, %v1340_v7, 0.0  ;;  %v370_v21 = vsel %vm357_vm0, %v1356_v18, 0.0  ;;  %v1372_v28 = vadd.f32 %v346_v25, %v338_v24  ;;  %v1374_v29 = vadd.f32 %v344_v27, %v336_v26  ;;  %v563_v24 = vld [vmem:[%s1960_s4] sm:$0xff] }
  0x15   : > { %365 = vadd.xlane.f32.xlu1 %v364_v16  ;;  %v361_v23 = vsel %vm357_vm0, %v1360_v20, 0.0  ;;  %v384_v35 = vsub.f32 1.0, %v383_v34 }
  0x16   : > { %v379_v30 = vsel %vm357_vm0, %v1372_v28, 0.0  ;;  %v373_v31 = vsel %vm357_vm0, %v1374_v29, 0.0 }
  0x17   : > { %v385_v36 = vmul.f32 %v1220_v33, %v384_v35 }
  0x19   : > { %v386_v37 = vadd.f32 %v1220_v33, %v385_v36 }
  0x1b   : > { %371 = vadd.xlane.f32.xlu2 %v370_v21  ;;  %362 = vadd.xlane.f32.xlu0 %v361_v23  ;;  %v1380_v38 = vsel %vm387_vm1, %v1220_v33, %v386_v37  ;;  %v566_v21 = vld [vmem:[%s1960_s4 + $0x18] sm:$0xff]  ;;  %v564_v23 = vld [vmem:[%s1960_s4 + $0x8] sm:$0xff] }
  0x1c   : > { %607 = vmatpush.msra.mxu0 %v566_v21  ;;  %1169 = vmatpush.msra.mxu3 %v566_v21 }
  0x1d   : > { %368 = vadd.xlane.f32.xlu1 %v367_v22  ;;  %v565_v22 = vld [vmem:[%s1960_s4 + $0x10] sm:$0xff] }
  0x1e   : > { %608 = vmatpush.msra.mxu0 %v565_v22  ;;  %1170 = vmatpush.msra.mxu3 %v565_v22 }
  0x20   : > { %609 = vmatpush.msra.mxu0 %v564_v23  ;;  %1171 = vmatpush.msra.mxu3 %v564_v23 }
  0x22   : > { %610 = vmatpush.msra.mxu0 %v563_v24  ;;  %1172 = vmatpush.msra.mxu3 %v563_v24 }
  0x23   : > { %380 = vadd.xlane.f32.xlu0 %v379_v30 }
  0x25   : > { %374 = vadd.xlane.f32.xlu1 %v373_v31 }
  0x86   : > { %v378_v39 = vpop.xlane.xlu2 %377  ;;  %v360_v41 = vpop.xlane.xlu0 %359 }
  0x87   : > { %v389_v43 = vmul.f32 %v1380_v38, %v360_v41  ;;  %v395_v56 = vmul.f32 %v1380_v38, %v378_v39 }
  0x88   : > { %v366_v40 = vpop.xlane.xlu1 %365 }
  0x89   : > { %v391_v42 = vmul.f32 %v1380_v38, %v366_v40  ;;  %v1388_v45 = vsub.f32 %v1342_v8, %v389_v43  ;;  %v1416_v63 = vsub.f32 %v1335_v3, %v395_v56 }
  0x8b   : > { %v1385_v44 = vsub.f32 %v1340_v7, %v391_v42  ;;  %v405_v47 = vmul.f32 %v1388_v45, %v1388_v45  ;;  %v411_v10 = vmul.f32 %v1416_v63, %v1416_v63 }
  0x8d   : > { %v407_v46 = vmul.f32 %v1385_v44, %v1385_v44  ;;  %v413_v50 = vsel %vm357_vm0, %v405_v47, 0.0  ;;  %v431_v14 = vsel %vm357_vm0, %v411_v10, 0.0 }
  0x8e   : > { %v372_v48 = vpop.xlane.xlu2 %371  ;;  %414 = vadd.xlane.f32.xlu2 %v413_v50  ;;  %v363_v53 = vpop.xlane.xlu0 %362 }
  0x8f   : > { %v419_v49 = vsel %vm357_vm0, %v407_v46, 0.0  ;;  %v393_v51 = vmul.f32 %v1380_v38, %v372_v48  ;;  %v390_v55 = vmul.f32 %v1380_v38, %v363_v53 }
  0x90   : > { %420 = vadd.xlane.f32.xlu1 %v419_v49  ;;  %v369_v52 = vpop.xlane.xlu1 %368 }
  0x91   : > { %v392_v54 = vmul.f32 %v1380_v38, %v369_v52  ;;  %v1401_v57 = vsub.f32 %v1356_v18, %v393_v51  ;;  %v1407_v59 = vsub.f32 %v1360_v20, %v390_v55 }
  0x93   : > { %v1404_v58 = vsub.f32 %v1358_v19, %v392_v54  ;;  %v409_v60 = vmul.f32 %v1401_v57, %v1401_v57  ;;  %v406_v62 = vmul.f32 %v1407_v59, %v1407_v59 }
  0x95   : > { %v408_v61 = vmul.f32 %v1404_v58, %v1404_v58  ;;  %v425_v0 = vsel %vm357_vm0, %v409_v60, 0.0  ;;  %v416_v2 = vsel %vm357_vm0, %v406_v62, 0.0 }
  0x96   : > { %v381_v4 = vpop.xlane.xlu0 %380  ;;  %417 = vadd.xlane.f32.xlu0 %v416_v2 }
  0x97   : > { %v422_v1 = vsel %vm357_vm0, %v408_v61, 0.0  ;;  %v396_v6 = vmul.f32 %v1380_v38, %v381_v4 }
  0x98   : > { %426 = vadd.xlane.f32.xlu1 %v425_v0  ;;  %423 = vadd.xlane.f32.xlu2 %v422_v1  ;;  %v375_v5 = vpop.xlane.xlu1 %374 }
  0x99   : > { %v394_v9 = vmul.f32 %v1380_v38, %v375_v5  ;;  %v1426_v11 = vsub.f32 %v1372_v28, %v396_v6  ;;  %v1483_v6 = vld [vmem:[%s1958_s2] ss:$0 sm:$0xff] }
  0x9b   : > { %v412_v12 = vmul.f32 %v1426_v11, %v1426_v11  ;;  %v1431_v13 = vsub.f32 %v1374_v29, %v394_v9 }
  0x9d   : > { %v434_v15 = vsel %vm357_vm0, %v412_v12, 0.0  ;;  %v410_v16 = vmul.f32 %v1431_v13, %v1431_v13 }
  0x9e   : > { %432 = vadd.xlane.f32.xlu0 %v431_v14 }
  0x9f   : > { %v428_v17 = vsel %vm357_vm0, %v410_v16, 0.0  ;;  %v1490_v16 = vld [vmem:[%s1959_s3] ss:$0 sm:$0xff] }
  0xa0   : > { %435 = vadd.xlane.f32.xlu2 %v434_v15 }
  0xa6   : > { %429 = vadd.xlane.f32.xlu0 %v428_v17 }
 0x101   : > { %v415_v26 = vpop.xlane.xlu2 %414 }
 0x102   : > { %v437_v30 = vmul.f32 %v415_v26, %v1380_v38 }
 0x103   : > { %v421_v25 = vpop.xlane.xlu1 %420 }
 0x104   : > { %v439_v27 = vmul.f32 %v421_v25, %v1380_v38  ;;  %v445_v32 = vadd.f32 1e-05, %v437_v30 }
 0x106   : > { %v1452_v31 = vadd.f32 1e-05, %v439_v27  ;;  %vm459_vm3 = vweird.f32 %v445_v32 }
 0x108   : > { %1221 = vrsqrt.f32 %v1452_v31  ;;  %vm479_vm5 = vweird.f32 %v1452_v31 }
 0x109   : > { %1223 = vrsqrt.f32 %v445_v32  ;;  %v418_v36 = vpop.xlane.xlu0 %417 }
 0x10a   : > { %v438_v37 = vmul.f32 %v418_v36, %v1380_v38 }
 0x10b   : > { %v424_v33 = vpop.xlane.xlu2 %423  ;;  %v427_v34 = vpop.xlane.xlu1 %426 }
 0x10c   : > { %v440_v35 = vmul.f32 %v424_v33, %v1380_v38  ;;  %v441_v42 = vmul.f32 %v427_v34, %v1380_v38  ;;  %v446_v43 = vadd.f32 1e-05, %v438_v37 }
 0x10e   : > { %v1457_v39 = vpop.eup %1221  ;;  %v1459_v40 = vadd.f32 1e-05, %v440_v35  ;;  %v1465_v49 = vadd.f32 1e-05, %v441_v42  ;;  %vm469_vm7 = vweird.f32 %v446_v43 }
 0x10f   : > { %v1224_v41 = vpop.eup %1223  ;;  %v474_v46 = vmul.f32 %v1457_v39, %v1452_v31  ;;  %vm480_vm6 = vweird.f32 %v1457_v39 }
 0x110   : > { %v454_v47 = vmul.f32 %v1224_v41, %v445_v32  ;;  %1225 = vrsqrt.f32 %v1459_v40  ;;  %vm460_vm2 = vweird.f32 %v1224_v41  ;;  %vm1509_vm9 = vmor %vm479_vm5, %vm480_vm6  ;;  %vm489_vm11 = vweird.f32 %v1459_v40 }
 0x111   : > { %1227 = vrsqrt.f32 %v446_v43  ;;  %v475_v51 = vmul.f32 %v1457_v39, %v474_v46  ;;  %v433_v54 = vpop.xlane.xlu0 %432  ;;  %vm461_vm4 = vmor %vm459_vm3, %vm460_vm2  ;;  %vm499_vm5 = vweird.f32 %v1465_v49 }
 0x112   : > { %v455_v48 = vmul.f32 %v1224_v41, %v454_v47  ;;  %v443_v55 = vmul.f32 %v433_v54, %v1380_v38  ;;  %1229 = vrsqrt.f32 %v1465_v49 }
 0x113   : > { %v436_v50 = vpop.xlane.xlu2 %435  ;;  %v476_v1 = vmul.f32 0.5, %v475_v51 }
 0x114   : > { %v456_v52 = vmul.f32 0.5, %v455_v48  ;;  %v444_v53 = vmul.f32 %v436_v50, %v1380_v38  ;;  %v1475_v62 = vadd.f32 1e-05, %v443_v55 }
 0x115   : > { %v477_v14 = vsub.f32 1.5, %v476_v1 }
 0x116   : > { %v457_v56 = vsub.f32 1.5, %v456_v52  ;;  %v1470_v60 = vadd.f32 1e-05, %v444_v53  ;;  %v1472_v61 = vpop.eup %1225  ;;  %vm519_vm15 = vweird.f32 %v1475_v62 }
 0x117   : > { %v1228_v0 = vpop.eup %1227  ;;  %v484_v4 = vmul.f32 %v1472_v61, %v1459_v40  ;;  %v478_v30 = vmul.f32 %v1457_v39, %v477_v14  ;;  %vm490_vm12 = vweird.f32 %v1472_v61 }
 0x118   : > { %v458_v2 = vmul.f32 %v1224_v41, %v457_v56  ;;  %1231 = vrsqrt.f32 %v1470_v60  ;;  %v464_v5 = vmul.f32 %v1228_v0, %v446_v43  ;;  %v1492_v17 = vpop.eup %1229  ;;  %vm470_vm8 = vweird.f32 %v1228_v0  ;;  %vm1530_vm2 = vmor %vm489_vm11, %vm490_vm12 }
 0x119   : > { %1233 = vrsqrt.f32 %v1475_v62  ;;  %v430_v15 = vpop.xlane.xlu0 %429  ;;  %v485_v21 = vmul.f32 %v1472_v61, %v484_v4  ;;  %vm471_vm10 = vmor %vm469_vm7, %vm470_vm8  ;;  %v482_v48 = vsel %vm1509_vm9, %v1457_v39, %v478_v30  ;;  %vm529_vm13 = vweird.f32 %v1470_v60 }
 0x11a   : > { %v462_v9 = vsel %vm461_vm4, %v1224_v41, %v458_v2  ;;  %v465_v10 = vmul.f32 %v1228_v0, %v464_v5  ;;  %v442_v23 = vmul.f32 %v430_v15, %v1380_v38  ;;  %v494_v38 = vmul.f32 %v1492_v17, %v1465_v49 }
 0x11b   : > { %v533_v12 = vmul.f32 %v462_v9, %v1388_v45  ;;  %v486_v34 = vmul.f32 0.5, %v485_v21  ;;  %vm500_vm6 = vweird.f32 %v1492_v17 }
 0x11c   : > { %v466_v22 = vmul.f32 0.5, %v465_v10  ;;  %v1506_v32 = vadd.f32 1e-05, %v442_v23  ;;  %v495_v46 = vmul.f32 %v1492_v17, %v494_v38  ;;  %vm501_vm7 = vmor %vm499_vm5, %vm500_vm6 }
 0x11d   : > { %v544_v24 = vmul.f32 %v1483_v6, %v533_v12  ;;  %v487_v50 = vsub.f32 1.5, %v486_v34 }
 0x11e   : > { %v1497_v25 = vpop.eup %1231  ;;  %v467_v45 = vsub.f32 1.5, %v466_v22  ;;  %1235 = vrsqrt.f32 %v1506_v32  ;;  %v496_v56 = vmul.f32 0.5, %v495_v46  ;;  %vm509_vm8 = vweird.f32 %v1506_v32  ;;  %v1007_v46 = vld [vmem:[%s1962_s6 + $0x60] sm:$0xff] }
 0x11f   : > { %v524_v26 = vmul.f32 %v1497_v25, %v1470_v60  ;;  %v1234_v27 = vpop.eup %1233  ;;  %v555_v33 = vadd.f32 %v1490_v16, %v544_v24  ;;  %vm530_vm14 = vweird.f32 %v1497_v25  ;;  %v535_v60 = vmul.f32 %v482_v48, %v1385_v44 }
 0x120   : > { %v468_v35 = vmul.f32 %v1228_v0, %v467_v45  ;;  %v514_v37 = vmul.f32 %v1234_v27, %v1475_v62  ;;  %vm520_vm1 = vweird.f32 %v1234_v27  ;;  %vm1538_vm3 = vmor %vm529_vm13, %vm530_vm14  ;;  %v497_v44 = vsub.f32 1.5, %v496_v56 }
 0x121   : > { %v525_v36 = vmul.f32 %v1497_v25, %v524_v26  ;;  %1151 = vmatmul.msk.f32.vlgmr.msra.gmra.mxu0 %vm357_vm0, %v555_v33  ;;  %vm521_vm4 = vmor %vm519_vm15, %vm520_vm1  ;;  %v546_v5 = vmul.f32 %v1483_v6, %v535_v60 }
 0x122   : > { %v472_v41 = vsel %vm471_vm10, %v1228_v0, %v468_v35  ;;  %v515_v43 = vmul.f32 %v1234_v27, %v514_v37  ;;  %v488_v0 = vmul.f32 %v1472_v61, %v487_v50  ;;  %v1006_v50 = vld [vmem:[%s1962_s6 + $0x58] sm:$0xff] }
 0x123   : > { %v526_v42 = vmul.f32 0.5, %v525_v36  ;;  %v534_v47 = vmul.f32 %v472_v41, %v1407_v59  ;;  %v557_v21 = vadd.f32 %v1490_v16, %v546_v5  ;;  %v1003_v59 = vld [vmem:[%s1962_s6 + $0x40] sm:$0xff] }
 0x124   : > { %v516_v52 = vmul.f32 0.5, %v515_v43  ;;  %v1236_v55 = vpop.eup %1235  ;;  %v492_v10 = vsel %vm1530_vm2, %v1472_v61, %v488_v0  ;;  %v498_v61 = vmul.f32 %v1492_v17, %v497_v44  ;;  %v1590_v43 = vld [vmem:[%s1961_s5] ss:$0 sm:$0xff] }
 0x125   : > { %v527_v51 = vsub.f32 1.5, %v526_v42  ;;  %v545_v53 = vmul.f32 %v1483_v6, %v534_v47  ;;  %v504_v4 = vmul.f32 %v1236_v55, %v1506_v32  ;;  %v536_v22 = vmul.f32 %v492_v10, %v1404_v58  ;;  %v1010_v42 = vld [vmem:[%s1962_s6 + $0x78] sm:$0xff]  ;;  %v1000_v10 = vld [vmem:[%s1962_s6 + $0x28] sm:$0xff] }
 0x126   : > { %v517_v54 = vsub.f32 1.5, %v516_v52  ;;  %v502_v45 = vsel %vm501_vm7, %v1492_v17, %v498_v61  ;;  %vm510_vm9 = vweird.f32 %v1236_v55  ;;  %1015 = vmatpush.msra.mxu1 %v1010_v42  ;;  %1174 = vmatpush.msrb.mxu3 %v1010_v42 }
 0x127   : > { %v556_v39 = vadd.f32 %v1490_v16, %v545_v53  ;;  %v528_v1 = vmul.f32 %v1497_v25, %v527_v51  ;;  %v505_v14 = vmul.f32 %v1236_v55, %v504_v4  ;;  %v547_v49 = vmul.f32 %v1483_v6, %v536_v22  ;;  %vm511_vm10 = vmor %vm509_vm8, %vm510_vm9  ;;  %1173 = vmatpush.msra.mxu2 %v1010_v42  ;;  %v1005_v53 = vld [vmem:[%s1962_s6 + $0x50] sm:$0xff] }
 0x128   : > { %v518_v62 = vmul.f32 %v1234_v27, %v517_v54 }
 0x129   : > { %1152 = vmatmul.msk.f32.gmra.mxu0 %vm357_vm0, %v556_v39  ;;  %v532_v12 = vsel %vm1538_vm3, %v1497_v25, %v528_v1  ;;  %v506_v24 = vmul.f32 0.5, %v505_v14  ;;  %v558_v58 = vadd.f32 %v1490_v16, %v547_v49  ;;  %v1002_v1 = vld [vmem:[%s1962_s6 + $0x38] sm:$0xff] }
 0x12a   : > { %v522_v40 = vsel %vm521_vm4, %v1234_v27, %v518_v62  ;;  %v540_v23 = vmul.f32 %v532_v12, %v1426_v11  ;;  %v537_v27 = vmul.f32 %v502_v45, %v1401_v57  ;;  %v1264_v57 = vmov 1.4142135   ;;  %v998_v49 = vld [vmem:[%s1962_s6 + $0x18] sm:$0xff] }
 0x12b   : > { %v539_v9 = vmul.f32 %v522_v40, %v1416_v63  ;;  %v507_v26 = vsub.f32 1.5, %v506_v24  ;;  %1237 = vrcp.f32 %v1264_v57  ;;  %v1001_v40 = vld [vmem:[%s1962_s6 + $0x30] sm:$0xff] }
 0x12c   : > { %v551_v25 = vmul.f32 %v1483_v6, %v540_v23  ;;  %v548_v38 = vmul.f32 %v1483_v6, %v537_v27  ;;  %v997_v27 = vld [vmem:[%s1962_s6 + $0x10] sm:$0xff] }
 0x12d   : > { %v550_v15 = vmul.f32 %v1483_v6, %v539_v9  ;;  %v508_v30 = vmul.f32 %v1236_v55, %v507_v26 }
 0x12e   : > { %v562_v11 = vadd.f32 %v1490_v16, %v551_v25  ;;  %v559_v17 = vadd.f32 %v1490_v16, %v548_v38 }
 0x12f   : > { %v561_v63 = vadd.f32 %v1490_v16, %v550_v15  ;;  %v512_v33 = vsel %vm511_vm10, %v1236_v55, %v508_v30  ;;  %v1004_v55 = vld [vmem:[%s1962_s6 + $0x48] sm:$0xff] }
 0x130   : > { %v538_v32 = vmul.f32 %v512_v33, %v1431_v13  ;;  %v1009_v13 = vld [vmem:[%s1962_s6 + $0x70] sm:$0xff] }
 0x131   : > { %1153 = vmatmul.msk.f32.gmra.mxu0 %vm357_vm0, %v557_v21  ;;  %1157 = vmatmul.msk.f32.vlgmr.msra.gmra.mxu3 %vm357_vm0, %v561_v63  ;;  %v1238_v35 = vpop.eup %1237  ;;  %v999_v21 = vld [vmem:[%s1962_s6 + $0x20] sm:$0xff] }
 0x132   : > { %v549_v31 = vmul.f32 %v1483_v6, %v538_v32  ;;  %v645_v36 = vmul.f32 1.4142135, %v1238_v35  ;;  %1016 = vmatpush.msra.mxu1 %v1009_v13  ;;  %1176 = vmatpush.msrb.mxu3 %v1009_v13  ;;  %vm649_vm11 = vweird.f32 %v1238_v35  ;;  %v996_v32 = vld [vmem:[%s1962_s6 + $0x8] sm:$0xff] }
 0x133   : > { %1175 = vmatpush.msra.mxu2 %v1009_v13 }
 0x134   : > { %v560_v34 = vadd.f32 %v1490_v16, %v549_v31  ;;  %v646_v37 = vsub.f32 1.0, %v645_v36  ;;  %v1008_v16 = vld [vmem:[%s1962_s6 + $0x68] sm:$0xff] }
 0x135   : > { %1017 = vmatpush.msra.mxu1 %v1008_v16  ;;  %1178 = vmatpush.msrb.mxu3 %v1008_v16 }
 0x136   : > { %v647_v41 = vmul.f32 %v1238_v35, %v646_v37  ;;  %1177 = vmatpush.msra.mxu2 %v1008_v16 }
 0x137   : > { %1018 = vmatpush.msra.mxu1 %v1007_v46  ;;  %1180 = vmatpush.msrb.mxu3 %v1007_v46 }
 0x138   : > { %v648_v6 = vadd.f32 %v1238_v35, %v647_v41  ;;  %1179 = vmatpush.msra.mxu2 %v1007_v46  ;;  %v995_v41 = vld [vmem:[%s1962_s6] sm:$0xff] }
 0x139   : > { %1154 = vmatmul.msk.f32.gmra.mxu0 %vm357_vm0, %v558_v58  ;;  %1158 = vmatmul.msk.f32.gmra.mxu3 %vm357_vm0, %v562_v11 }
 0x13a   : > { %v1595_v48 = vsel %vm649_vm11, %v1238_v35, %v648_v6  ;;  %1019 = vmatpush.msra.mxu1 %v1006_v50  ;;  %1182 = vmatpush.msrb.mxu3 %v1006_v50 }
 0x13b   : > { %1181 = vmatpush.msra.mxu2 %v1006_v50 }
 0x13c   : > { %1020 = vmatpush.msra.mxu1 %v1005_v53  ;;  %1184 = vmatpush.msrb.mxu3 %v1005_v53 }
 0x13d   : > { %1183 = vmatpush.msra.mxu2 %v1005_v53 }
 0x13e   : > { %1021 = vmatpush.msra.mxu1 %v1004_v55  ;;  %1186 = vmatpush.msrb.mxu3 %v1004_v55 }
 0x13f   : > { %1185 = vmatpush.msra.mxu2 %v1004_v55 }
 0x140   : > { %1022 = vmatpush.msra.mxu1 %v1003_v59  ;;  %1188 = vmatpush.msrb.mxu3 %v1003_v59 }
 0x141   : > { %1155 = vmatmul.msk.f32.gmra.mxu0 %vm357_vm0, %v559_v17  ;;  %1187 = vmatpush.msra.mxu2 %v1003_v59 }
 0x142   : > { %1023 = vmatpush.msra.mxu1 %v1002_v1  ;;  %1190 = vmatpush.msrb.mxu3 %v1002_v1 }
 0x143   : > { %1189 = vmatpush.msra.mxu2 %v1002_v1 }
 0x144   : > { %1024 = vmatpush.msra.mxu1 %v1001_v40  ;;  %1192 = vmatpush.msrb.mxu3 %v1001_v40 }
 0x145   : > { %1191 = vmatpush.msra.mxu2 %v1001_v40 }
 0x146   : > { %1025 = vmatpush.msra.mxu1 %v1000_v10  ;;  %1194 = vmatpush.msrb.mxu3 %v1000_v10 }
 0x147   : > { %1193 = vmatpush.msra.mxu2 %v1000_v10 }
 0x148   : > { %1026 = vmatpush.msra.mxu1 %v999_v21  ;;  %1196 = vmatpush.msrb.mxu3 %v999_v21 }
 0x149   : > { %1156 = vmatmul.msk.f32.gmra.mxu0 %vm357_vm0, %v560_v34  ;;  %1195 = vmatpush.msra.mxu2 %v999_v21 }
 0x14a   : > { %1027 = vmatpush.msra.mxu1 %v998_v49  ;;  %1198 = vmatpush.msrb.mxu3 %v998_v49 }
 0x14b   : > { %1197 = vmatpush.msra.mxu2 %v998_v49 }
 0x14c   : > { %1028 = vmatpush.msra.mxu1 %v997_v27  ;;  %1200 = vmatpush.msrb.mxu3 %v997_v27 }
 0x14d   : > { %1199 = vmatpush.msra.mxu2 %v997_v27 }
 0x14e   : > { %1029 = vmatpush.msra.mxu1 %v996_v32  ;;  %1202 = vmatpush.msrb.mxu3 %v996_v32 }
 0x14f   : > { %1201 = vmatpush.msra.mxu2 %v996_v32 }
 0x150   : > { %1030 = vmatpush.msra.mxu1 %v995_v41  ;;  %1204 = vmatpush.msrb.mxu3 %v995_v41 }
 0x151   : > { %1203 = vmatpush.msra.mxu2 %v995_v41 }
 0x19e   : > { %v612_v47 = vpop.f32.mrf.mxu0 }
 0x19f   : > { %v1601_v51 = vadd.f32 %v1590_v43, %v612_v47 }
 0x1a1   : > { %v1605_v52 = vmul.f32 %v1595_v48, %v1601_v51 }
 0x1a3   : > { %v659_v54 = vmul.f32 %v1605_v52, %v1605_v52 }
 0x1a5   : > { %v1615_v56 = vmin.f32 %v659_v54, 16.0 }
 0x1a6   : > { %v615_v39 = vpop.f32.mrf.mxu0 }
 0x1a7   : > { %v661_v60 = vmul.f32 2.1237322e-06, %v1615_v56  ;;  %v1622_v0 = vadd.f32 %v1590_v43, %v615_v39  ;;  %v672_v2 = vmul.f32 3.8918573e-05, %v1615_v56 }
 0x1a9   : > { %v662_v62 = vadd.f32 0.00028619796, %v661_v60  ;;  %v1630_v4 = vmul.f32 %v1595_v48, %v1622_v0  ;;  %v673_v5 = vadd.f32 0.001143296, %v672_v2 }
 0x1ab   : > { %v663_v9 = vmul.f32 %v662_v62, %v1615_v56  ;;  %v699_v44 = vmul.f32 %v1630_v4, %v1630_v4  ;;  %v674_v12 = vmul.f32 %v673_v5, %v1615_v56 }
 0x1ad   : > { %v664_v14 = vadd.f32 0.0036580483, %v663_v9  ;;  %v1642_v15 = vmin.f32 %v699_v44, 16.0  ;;  %v675_v63 = vadd.f32 0.014752088, %v674_v12 }
 0x1ae   : > { %v618_v22 = vpop.f32.mrf.mxu0 }
 0x1af   : > { %v665_v23 = vmul.f32 %v664_v14, %v1615_v56  ;;  %v701_v61 = vmul.f32 2.1237322e-06, %v1642_v15  ;;  %v1650_v24 = vadd.f32 %v1590_v43, %v618_v22  ;;  %v676_v25 = vmul.f32 %v675_v63, %v1615_v56 }
 0x1b0   : > { %v712_v45 = vmul.f32 3.8918573e-05, %v1642_v15 }
 0x1b1   : > { %v666_v26 = vadd.f32 0.05243302, %v665_v23  ;;  %v702_v58 = vadd.f32 0.00028619796, %v701_v61  ;;  %v1659_v11 = vmul.f32 %v1595_v48, %v1650_v24  ;;  %v677_v30 = vadd.f32 0.112945676, %v676_v25 }
 0x1b2   : > { %v713_v38 = vadd.f32 0.001143296, %v712_v45 }
 0x1b3   : > { %v703_v33 = vmul.f32 %v702_v58, %v1642_v15  ;;  %v739_v17 = vmul.f32 %v1659_v11, %v1659_v11  ;;  %v678_v34 = vmul.f32 %v677_v30, %v1615_v56  ;;  %v667_v57 = vmul.f32 %v666_v26, %v1615_v56 }
 0x1b4   : > { %v630_v31 = vpop.f32.mrf.mxu3  ;;  %v714_v6 = vmul.f32 %v713_v38, %v1642_v15 }
 0x1b5   : > { %v704_v35 = vadd.f32 0.0036580483, %v703_v33  ;;  %v1672_v36 = vmin.f32 %v739_v17, 16.0  ;;  %v1675_v37 = vadd.f32 %v1590_v43, %v630_v31  ;;  %v679_v13 = vadd.f32 0.4994258, %v678_v34 }
 0x1b6   : > { %v621_v42 = vpop.f32.mrf.mxu0  ;;  %v668_v53 = vadd.f32 0.18741608, %v667_v57  ;;  %v715_v60 = vadd.f32 0.014752088, %v714_v6 }
 0x1b7   : > { %v741_v16 = vmul.f32 2.1237322e-06, %v1672_v36  ;;  %v1684_v46 = vmul.f32 %v1595_v48, %v1675_v37  ;;  %v1687_v47 = vadd.f32 %v1590_v43, %v621_v42  ;;  %v680_v50 = vmul.f32 %v679_v13, %v1615_v56 }
 0x1b8   : > { %v705_v54 = vmul.f32 %v704_v35, %v1642_v15  ;;  %v669_v5 = vmul.f32 %v668_v53, %v1615_v56  ;;  %v716_v63 = vmul.f32 %v715_v60, %v1642_v15 }
 0x1b9   : > { %v899_v55 = vmul.f32 %v1684_v46, %v1684_v46  ;;  %v1695_v59 = vmul.f32 %v1595_v48, %v1687_v47  ;;  %v1697_v39 = vadd.f32 1.0, %v680_v50  ;;  %v742_v1 = vadd.f32 0.00028619796, %v741_v16 }
 0x1ba   : > { %v706_v9 = vadd.f32 0.05243302, %v705_v54  ;;  %v670_v45 = vadd.f32 1.1283791, %v669_v5  ;;  %v717_v17 = vadd.f32 0.112945676, %v716_v63 }
 0x1bb   : > { %v1699_v2 = vmin.f32 %v899_v55, 16.0  ;;  %v779_v62 = vmul.f32 %v1695_v59, %v1695_v59  ;;  %1239 = vrcp.f32 %v1697_v39  ;;  %v743_v22 = vmul.f32 %v742_v1, %v1672_v36 }
 0x1bc   : > { %v633_v40 = vpop.f32.mrf.mxu3  ;;  %v707_v26 = vmul.f32 %v706_v9, %v1642_v15  ;;  %vm687_vm12 = vweird.f32 %v1697_v39  ;;  %v691_v50 = vand.u32 2147483647, %v1697_v39 }
 0x1bd   : > { %v1706_v44 = vadd.f32 %v1590_v43, %v633_v40  ;;  %v901_v10 = vmul.f32 2.1237322e-06, %v1699_v2  ;;  %v912_v12 = vmul.f32 3.8918573e-05, %v1699_v2  ;;  %v1710_v14 = vmin.f32 %v779_v62, 16.0 }
 0x1be   : > { %v624_v21 = vpop.f32.mrf.mxu0  ;;  %v744_v32 = vadd.f32 0.0036580483, %v743_v22  ;;  %v708_v13 = vadd.f32 0.18741608, %v707_v26  ;;  %vm692_vm15 = vcmp.eq.f32.partialorder %v691_v50, 8.507059e+37  ;;  %v636_v50 = vmul.f32 0.5, %v1601_v51 }
 0x1bf   : > { %v1716_v23 = vmul.f32 %v1595_v48, %v1706_v44  ;;  %v902_v56 = vadd.f32 0.00028619796, %v901_v10  ;;  %v913_v61 = vadd.f32 0.001143296, %v912_v12  ;;  %v781_v49 = vmul.f32 2.1237322e-06, %v1710_v14 }
 0x1c0   : > { %v1720_v25 = vadd.f32 %v1590_v43, %v624_v21  ;;  %v745_v62 = vmul.f32 %v744_v32, %v1672_v36 }
 0x1c1   : > { %v939_v58 = vmul.f32 %v1716_v23, %v1716_v23  ;;  %v1240_v27 = vpop.eup %1239  ;;  %v903_v30 = vmul.f32 %v902_v56, %v1699_v2  ;;  %v914_v38 = vmul.f32 %v913_v61, %v1699_v2  ;;  %v782_v33 = vadd.f32 0.00028619796, %v781_v49 }
 0x1c2   : > { %v1731_v34 = vmul.f32 %v1595_v48, %v1720_v25  ;;  %v683_v42 = vmul.f32 %v1240_v27, %v1697_v39  ;;  %vm688_vm13 = vweird.f32 %v1240_v27  ;;  %v693_v61 = vand.u32 2147483648, %v1697_v39 }
 0x1c3   : > { %v1727_v31 = vmin.f32 %v939_v58, 16.0  ;;  %v904_v57 = vadd.f32 0.0036580483, %v903_v30  ;;  %v915_v35 = vadd.f32 0.014752088, %v914_v38  ;;  %v783_v41 = vmul.f32 %v782_v33, %v1710_v14  ;;  %vm689_vm14 = vmor %vm687_vm12, %vm688_vm13 }
 0x1c4   : > { %v819_v16 = vmul.f32 %v1731_v34, %v1731_v34  ;;  %v684_v1 = vsub.f32 1.0, %v683_v42  ;;  %v709_v49 = vmul.f32 %v708_v13, %v1642_v15  ;;  %v746_v30 = vadd.f32 0.05243302, %v745_v62 }
 0x1c5   : > { %v941_v6 = vmul.f32 2.1237322e-06, %v1727_v31  ;;  %v905_v53 = vmul.f32 %v904_v57, %v1699_v2  ;;  %v916_v54 = vmul.f32 %v915_v35, %v1699_v2  ;;  %v784_v55 = vadd.f32 0.0036580483, %v783_v41 }
 0x1c6   : > { %v627_v60 = vpop.f32.mrf.mxu0  ;;  %v1743_v5 = vmin.f32 %v819_v16, 16.0  ;;  %v685_v63 = vmul.f32 %v1240_v27, %v684_v1  ;;  %v747_v1 = vmul.f32 %v746_v30, %v1672_v36  ;;  %v718_v39 = vmul.f32 %v717_v17, %v1642_v15 }
 0x1c7   : > { %v942_v40 = vadd.f32 0.00028619796, %v941_v6  ;;  %v1746_v9 = vadd.f32 %v1590_v43, %v627_v60  ;;  %v906_v10 = vadd.f32 0.05243302, %v905_v53  ;;  %v917_v12 = vadd.f32 0.112945676, %v916_v54 }
 0x1c8   : > { %v785_v21 = vmul.f32 %v784_v55, %v1710_v14  ;;  %v821_v56 = vmul.f32 2.1237322e-06, %v1743_v5  ;;  %v686_v32 = vadd.f32 %v1240_v27, %v685_v63  ;;  %v671_v53 = vmul.f32 %v670_v45, %v1605_v52 }
 0x1c9   : > { %v943_v22 = vmul.f32 %v942_v40, %v1727_v31  ;;  %v907_v26 = vmul.f32 %v906_v10, %v1699_v2  ;;  %v918_v58 = vmul.f32 %v917_v12, %v1699_v2  ;;  %v1757_v43 = vmul.f32 %v1595_v48, %v1746_v9 }
 0x1ca   : > { %v822_v33 = vadd.f32 0.00028619796, %v821_v56  ;;  %v786_v41 = vadd.f32 0.05243302, %v785_v21  ;;  %v690_v16 = vsel %vm689_vm14, %v1240_v27, %v686_v32  ;;  %v694_v48 = vor.u32 1.1754944e-38, %v693_v61 }
 0x1cb   : > { %v944_v38 = vadd.f32 0.0036580483, %v943_v22  ;;  %v908_v57 = vadd.f32 0.18741608, %v907_v26  ;;  %v919_v35 = vadd.f32 0.4994258, %v918_v58  ;;  %v859_v42 = vmul.f32 %v1757_v43, %v1757_v43 }
 0x1cc   : > { %v823_v6 = vmul.f32 %v822_v33, %v1743_v5  ;;  %v710_v60 = vadd.f32 1.1283791, %v709_v49  ;;  %v695_v62 = vsel %vm692_vm15, %v694_v48, %v690_v16  ;;  %v787_v10 = vmul.f32 %v786_v41, %v1710_v14 }
 0x1cd   : > { %v945_v13 = vmul.f32 %v944_v38, %v1727_v31  ;;  %v920_v54 = vmul.f32 %v919_v35, %v1699_v2  ;;  %v1767_v55 = vmin.f32 %v859_v42, 16.0  ;;  %v909_v52 = vmul.f32 %v908_v57, %v1699_v2 }
 0x1ce   : > { %v824_v12 = vadd.f32 0.0036580483, %v823_v6  ;;  %v696_v21 = vmul.f32 %v695_v62, %v671_v53  ;;  %v719_v63 = vadd.f32 0.4994258, %v718_v39  ;;  %v1779_v22 = vmul.f32 %v710_v60, %v1630_v4 }
 0x1cf   : > { %v1771_v40 = vadd.f32 1.0, %v920_v54  ;;  %v861_v27 = vmul.f32 2.1237322e-06, %v1767_v55  ;;  %v946_v45 = vadd.f32 0.05243302, %v945_v13  ;;  %v1782_v17 = vmul.f32 0.5, %v1675_v37 }
 0x1d0   : > { %v1159_v56 = vclamps-f32 %v696_v21, 1.0  ;;  %v748_v61 = vadd.f32 0.18741608, %v747_v1  ;;  %v825_v49 = vmul.f32 %v824_v12, %v1743_v5  ;;  %v720_v2 = vmul.f32 %v719_v63, %v1642_v15 }
 0x1d1   : > { %1241 = vrcp.f32 %v1771_v40  ;;  %v862_v26 = vadd.f32 0.00028619796, %v861_v27  ;;  %v910_v58 = vadd.f32 1.1283791, %v909_v52  ;;  %v788_v30 = vadd.f32 0.18741608, %v787_v10 }
 0x1d2   : > { %v947_v38 = vmul.f32 %v946_v45, %v1727_v31  ;;  %v979_v33 = vadd.f32 1.0, %v1159_v56  ;;  %v931_v51 = vand.u32 2147483647, %v1771_v40  ;;  %v1789_v32 = vadd.f32 1.0, %v720_v2 }
 0x1d3   : > { %v863_v4 = vmul.f32 %v862_v26, %v1767_v55  ;;  %v752_v37 = vmul.f32 3.8918573e-05, %v1672_v36  ;;  %v933_v57 = vand.u32 2147483648, %v1771_v40  ;;  %v792_v41 = vmul.f32 3.8918573e-05, %v1710_v14 }
 0x1d4   : > { %v987_v35 = vmul.f32 %v979_v33, %v636_v50  ;;  %v952_v15 = vmul.f32 3.8918573e-05, %v1727_v31  ;;  %v1796_v13 = vmul.f32 %v748_v61, %v1672_v36  ;;  %v826_v6 = vadd.f32 0.05243302, %v825_v49 }
 0x1d5   : > { %v864_v16 = vadd.f32 0.0036580483, %v863_v4  ;;  %1243 = vrcp.f32 %v1789_v32  ;;  %v911_v48 = vmul.f32 %v910_v58, %v1684_v46  ;;  %v1802_v54 = vmul.f32 %v788_v30, %v1710_v14 }
 0x1d6   : > { %v1804_v60 = vadd.f32 0.18741608, %v947_v38  ;;  %1031 = vmatmul.f32.vlgmr.msra.gmra.mxu1 %v987_v35  ;;  %vm927_vm1 = vweird.f32 %v1771_v40  ;;  %vm1807_vm2 = vcmp.eq.f32.partialorder %v931_v51, 8.507059e+37  ;;  %v731_v62 = vand.u32 2147483647, %v1789_v32 }
 0x1d7   : > { %v1242_v42 = vpop.eup %1241  ;;  %v753_v39 = vadd.f32 0.001143296, %v752_v37  ;;  %v934_v12 = vor.u32 1.1754944e-38, %v933_v57  ;;  %v793_v46 = vadd.f32 0.001143296, %v792_v41  ;;  %v827_v52 = vmul.f32 %v826_v6, %v1743_v5 }
 0x1d8   : > { %v923_v53 = vmul.f32 %v1242_v42, %v1771_v40  ;;  %v953_v27 = vadd.f32 0.001143296, %v952_v15  ;;  %vm928_vm3 = vweird.f32 %v1242_v42  ;;  %v865_v45 = vmul.f32 %v864_v16, %v1767_v55 }
 0x1d9   : > { %v754_v21 = vmul.f32 %v753_v39, %v1672_v36  ;;  %v794_v50 = vmul.f32 %v793_v46, %v1710_v14  ;;  %v832_v61 = vmul.f32 3.8918573e-05, %v1743_v5  ;;  %vm727_vm4 = vweird.f32 %v1789_v32  ;;  %vm929_vm6 = vmor %vm927_vm1, %vm928_vm3 }
 0x1da   : > { %v924_v10 = vsub.f32 1.0, %v923_v53  ;;  %v954_v56 = vmul.f32 %v953_v27, %v1727_v31  ;;  %v733_v26 = vand.u32 2147483648, %v1789_v32  ;;  %v872_v58 = vmul.f32 3.8918573e-05, %v1767_v55 }
 0x1db   : > { %v1244_v49 = vpop.eup %1243  ;;  %v755_v2 = vadd.f32 0.014752088, %v754_v21  ;;  %vm1822_vm5 = vcmp.eq.f32.partialorder %v731_v62, 8.507059e+37  ;;  %v795_v51 = vadd.f32 0.014752088, %v794_v50 }
 0x1dc   : > { %v925_v63 = vmul.f32 %v1242_v42, %v924_v10  ;;  %v723_v38 = vmul.f32 %v1244_v49, %v1789_v32  ;;  %v866_v4 = vadd.f32 0.05243302, %v865_v45  ;;  %v955_v57 = vadd.f32 0.014752088, %v954_v56 }
 0x1dd   : > { %v756_v37 = vmul.f32 %v755_v2, %v1672_v36  ;;  %v833_v35 = vadd.f32 0.001143296, %v832_v61  ;;  %v796_v6 = vmul.f32 %v795_v51, %v1710_v14  ;;  %v873_v16 = vadd.f32 0.001143296, %v872_v58 }
 0x1de   : > { %v926_v30 = vadd.f32 %v1242_v42, %v925_v63  ;;  %v724_v15 = vsub.f32 1.0, %v723_v38  ;;  %vm728_vm7 = vweird.f32 %v1244_v49  ;;  %v956_v39 = vmul.f32 %v955_v57, %v1727_v31 }
 0x1df   : > { %v757_v62 = vadd.f32 0.112945676, %v756_v37  ;;  %v797_v46 = vadd.f32 0.112945676, %v796_v6  ;;  %v834_v27 = vmul.f32 %v833_v35, %v1743_v5  ;;  %v734_v45 = vor.u32 1.1754944e-38, %v733_v26  ;;  %vm729_vm8 = vmor %vm727_vm4, %vm728_vm7 }
 0x1e0   : > { %v930_v41 = vsel %vm929_vm6, %v1242_v42, %v926_v30  ;;  %v725_v40 = vmul.f32 %v1244_v49, %v724_v15  ;;  %v957_v42 = vadd.f32 0.112945676, %v956_v39  ;;  %v874_v63 = vmul.f32 %v873_v16, %v1767_v55 }
 0x1e1   : > { %v935_v53 = vsel %vm1807_vm2, %v934_v12, %v930_v41  ;;  %v758_v21 = vmul.f32 %v757_v62, %v1672_v36  ;;  %v798_v1 = vmul.f32 %v797_v46, %v1710_v14  ;;  %v835_v12 = vadd.f32 0.014752088, %v834_v27 }
 0x1e2   : > { %v936_v10 = vmul.f32 %v935_v53, %v911_v48  ;;  %v726_v50 = vadd.f32 %v1244_v49, %v725_v40  ;;  %v867_v61 = vmul.f32 %v866_v4, %v1767_v55  ;;  %v958_v2 = vmul.f32 %v957_v42, %v1727_v31 }
 0x1e3   : > { %v759_v48 = vadd.f32 0.4994258, %v758_v21  ;;  %v875_v26 = vadd.f32 0.014752088, %v874_v63  ;;  %v799_v38 = vadd.f32 0.4994258, %v798_v1  ;;  %v836_v51 = vmul.f32 %v835_v12, %v1743_v5 }
 0x1e4   : > { %v1165_v56 = vclamps-f32 %v936_v10, 1.0  ;;  %v730_v58 = vsel %vm729_vm8, %v1244_v49, %v726_v50  ;;  %v959_v35 = vadd.f32 0.4994258, %v958_v2  ;;  %v949_v49 = vmul.f32 %v1804_v60, %v1727_v31 }
 0x1e5   : > { %v735_v37 = vsel %vm1822_vm5, %v734_v45, %v730_v58  ;;  %v760_v57 = vmul.f32 %v759_v48, %v1672_v36  ;;  %v876_v4 = vmul.f32 %v875_v26, %v1767_v55  ;;  %v800_v15 = vmul.f32 %v799_v38, %v1710_v14 }
 0x1e6   : > { %v985_v30 = vadd.f32 1.0, %v1165_v56  ;;  %v736_v32 = vmul.f32 %v735_v37, %v1779_v22  ;;  %v837_v6 = vadd.f32 0.112945676, %v836_v51  ;;  %v828_v16 = vadd.f32 0.18741608, %v827_v52 }
 0x1e7   : > { %v761_v53 = vadd.f32 1.0, %v760_v57  ;;  %v960_v33 = vmul.f32 %v959_v35, %v1727_v31  ;;  %v1854_v36 = vadd.f32 1.0, %v800_v15  ;;  %v877_v10 = vadd.f32 0.112945676, %v876_v4 }
 0x1e8   : > { %v993_v41 = vmul.f32 %v985_v30, %v1782_v17  ;;  %v1160_v62 = vclamps-f32 %v736_v32, 1.0  ;;  %v838_v39 = vmul.f32 %v837_v6, %v1743_v5  ;;  %v868_v22 = vadd.f32 0.18741608, %v867_v61 }
 0x1e9   : > { %1245 = vrcp.f32 %v761_v53  ;;  %v637_v17 = vmul.f32 0.5, %v1622_v0  ;;  %v750_v14 = vadd.f32 1.1283791, %v1796_v13  ;;  %v790_v60 = vadd.f32 1.1283791, %v1802_v54 }
 0x1ea   : > { %1049 = vmatmul.f32.vlgmr.msrb.gmra.mxu3 %v993_v41  ;;  %v980_v40 = vadd.f32 1.0, %v1160_v62  ;;  %1247 = vrcp.f32 %v1854_v36  ;;  %v950_v52 = vadd.f32 1.1283791, %v949_v49  ;;  %v1861_v31 = vadd.f32 1.0, %v960_v33 }
 0x1eb   : > { %v829_v46 = vmul.f32 %v828_v16, %v1743_v5  ;;  %v839_v45 = vadd.f32 0.4994258, %v838_v39  ;;  %v878_v21 = vmul.f32 %v877_v10, %v1767_v55  ;;  %v869_v42 = vmul.f32 %v868_v22, %v1767_v55 }
 0x1ec   : > { %v988_v27 = vmul.f32 %v980_v40, %v637_v17  ;;  %1249 = vrcp.f32 %v1861_v31  ;;  %v1868_v0 = vmul.f32 0.5, %v1650_v24  ;;  %v751_v50 = vmul.f32 %v750_v14, %v1659_v11 }
 0x1ed   : > { %v840_v13 = vmul.f32 %v839_v45, %v1743_v5  ;;  %v879_v54 = vadd.f32 0.4994258, %v878_v21  ;;  %v1873_v56 = vmul.f32 0.5, %v1687_v47  ;;  %v791_v1 = vmul.f32 %v790_v60, %v1695_v59 }
 0x1ee   : > { %1034 = vmatmul.f32.gmra.mxu1 %v988_v27  ;;  %v1877_v12 = vmul.f32 0.5, %v1706_v44  ;;  %v1880_v48 = vmul.f32 %v950_v52, %v1716_v23  ;;  %v1882_v24 = vadd.f32 1.1283791, %v829_v46  ;;  %v1886_v26 = vadd.f32 1.1283791, %v869_v42 }
 0x1ef   : > { %v1246_v63 = vpop.eup %1245  ;;  %v1884_v5 = vadd.f32 1.0, %v840_v13  ;;  %vm767_vm9 = vweird.f32 %v761_v53  ;;  %v880_v47 = vmul.f32 %v879_v54, %v1767_v55  ;;  %v771_v58 = vand.u32 2147483647, %v761_v53 }
 0x1f0   : > { %v1248_v61 = vpop.eup %1247  ;;  %v763_v2 = vmul.f32 %v1246_v63, %v761_v53  ;;  %v773_v44 = vand.u32 2147483648, %v761_v53  ;;  %v811_v38 = vand.u32 2147483647, %v1854_v36  ;;  %v813_v51 = vand.u32 2147483648, %v1854_v36 }
 0x1f1   : > { %v803_v11 = vmul.f32 %v1248_v61, %v1854_v36  ;;  %1251 = vrcp.f32 %v1884_v5  ;;  %v1893_v37 = vadd.f32 1.0, %v880_v47  ;;  %vm768_vm10 = vweird.f32 %v1246_v63 }
 0x1f2   : > { %v764_v59 = vsub.f32 1.0, %v763_v2  ;;  %v1250_v30 = vpop.eup %1249  ;;  %vm807_vm11 = vweird.f32 %v1854_v36  ;;  %vm808_vm12 = vweird.f32 %v1248_v61  ;;  %v971_v4 = vand.u32 2147483647, %v1861_v31  ;;  %vm769_vm14 = vmor %vm767_vm9, %vm768_vm10 }
 0x1f3   : > { %v804_v23 = vsub.f32 1.0, %v803_v11  ;;  %v963_v35 = vmul.f32 %v1250_v30, %v1861_v31  ;;  %1253 = vrcp.f32 %v1893_v37  ;;  %vm772_vm13 = vcmp.eq.f32.partialorder %v771_v58, 8.507059e+37  ;;  %vm809_vm1 = vmor %vm807_vm11, %vm808_vm12 }
 0x1f4   : > { %v765_v57 = vmul.f32 %v1246_v63, %v764_v59  ;;  %v774_v41 = vor.u32 1.1754944e-38, %v773_v44  ;;  %vm812_vm15 = vcmp.eq.f32.partialorder %v811_v38, 8.507059e+37  ;;  %v814_v49 = vor.u32 1.1754944e-38, %v813_v51 }
 0x1f5   : > { %v805_v55 = vmul.f32 %v1248_v61, %v804_v23  ;;  %v964_v15 = vsub.f32 1.0, %v963_v35  ;;  %v973_v16 = vand.u32 2147483648, %v1861_v31  ;;  %vm967_vm2 = vweird.f32 %v1861_v31 }
 0x1f6   : > { %v766_v32 = vadd.f32 %v1246_v63, %v765_v57  ;;  %vm968_vm3 = vweird.f32 %v1250_v30  ;;  %vm1904_vm4 = vcmp.eq.f32.partialorder %v971_v4, 8.507059e+37  ;;  %v853_v52 = vand.u32 2147483648, %v1884_v5 }
 0x1f7   : > { %v806_v6 = vadd.f32 %v1248_v61, %v805_v55  ;;  %v1252_v33 = vpop.eup %1251  ;;  %v965_v39 = vmul.f32 %v1250_v30, %v964_v15  ;;  %vm969_vm5 = vmor %vm967_vm2, %vm968_vm3  ;;  %v974_v27 = vor.u32 1.1754944e-38, %v973_v16  ;;  %vm847_vm6 = vweird.f32 %v1884_v5 }
 0x1f8   : > { %v770_v62 = vsel %vm769_vm14, %v1246_v63, %v766_v32  ;;  %v843_v53 = vmul.f32 %v1252_v33, %v1884_v5  ;;  %v851_v42 = vand.u32 2147483647, %v1884_v5  ;;  %vm848_vm7 = vweird.f32 %v1252_v33 }
 0x1f9   : > { %v775_v10 = vsel %vm772_vm13, %v774_v41, %v770_v62  ;;  %v810_v22 = vsel %vm809_vm1, %v1248_v61, %v806_v6  ;;  %v966_v60 = vadd.f32 %v1250_v30, %v965_v39  ;;  %v1254_v46 = vpop.eup %1253  ;;  %v854_v2 = vor.u32 1.1754944e-38, %v853_v52  ;;  %vm849_vm8 = vmor %vm847_vm6, %vm848_vm7 }
 0x1fa   : > { %v776_v14 = vmul.f32 %v775_v10, %v751_v50  ;;  %v815_v40 = vsel %vm812_vm15, %v814_v49, %v810_v22  ;;  %v844_v45 = vsub.f32 1.0, %v843_v53  ;;  %v883_v13 = vmul.f32 %v1254_v46, %v1893_v37 }
 0x1fb   : > { %v816_v36 = vmul.f32 %v815_v40, %v791_v1  ;;  %v970_v21 = vsel %vm969_vm5, %v1250_v30, %v966_v60  ;;  %v891_v58 = vand.u32 2147483647, %v1893_v37  ;;  %v893_v44 = vand.u32 2147483648, %v1893_v37 }
 0x1fc   : > { %v1161_v31 = vclamps-f32 %v776_v14, 1.0  ;;  %v975_v63 = vsel %vm1904_vm4, %v974_v27, %v970_v21  ;;  %v845_v50 = vmul.f32 %v1252_v33, %v844_v45  ;;  %v884_v11 = vsub.f32 1.0, %v883_v13 }
 0x1fd   : > { %v1162_v54 = vclamps-f32 %v816_v36, 1.0  ;;  %v976_v1 = vmul.f32 %v975_v63, %v1880_v48  ;;  %vm888_vm9 = vweird.f32 %v1254_v46  ;;  %v831_v51 = vmul.f32 %v1882_v24, %v1731_v34 }
 0x1fe   : > { %v981_v61 = vadd.f32 1.0, %v1161_v31  ;;  %v846_v59 = vadd.f32 %v1252_v33, %v845_v50  ;;  %v885_v38 = vmul.f32 %v1254_v46, %v884_v11  ;;  %vm852_vm10 = vcmp.eq.f32.partialorder %v851_v42, 8.507059e+37 }
 0x1ff   : > { %v982_v47 = vadd.f32 1.0, %v1162_v54  ;;  %v1166_v23 = vclamps-f32 %v976_v1, 1.0  ;;  %vm887_vm11 = vweird.f32 %v1893_v37  ;;  %v894_v5 = vor.u32 1.1754944e-38, %v893_v44 }
 0x200   : > { %v989_v30 = vmul.f32 %v981_v61, %v1868_v0  ;;  %v850_v57 = vsel %vm849_vm8, %v1252_v33, %v846_v59  ;;  %v886_v4 = vadd.f32 %v1254_v46, %v885_v38  ;;  %vm889_vm12 = vmor %vm887_vm11, %vm888_vm9  ;;  %v871_v32 = vmul.f32 %v1886_v26, %v1757_v43  ;;  %v1218_v43 = vld [vmem:[%s1963_s7] ss:$0 sm:$0xff] }
 0x201   : > { %v990_v48 = vmul.f32 %v982_v47, %v1873_v56  ;;  %v986_v35 = vadd.f32 1.0, %v1166_v23  ;;  %v855_v55 = vsel %vm852_vm10, %v854_v2, %v850_v57  ;;  %vm892_vm13 = vcmp.eq.f32.partialorder %v891_v58, 8.507059e+37 }
 0x202   : > { %1037 = vmatmul.f32.gmra.mxu1 %v989_v30  ;;  %v856_v0 = vmul.f32 %v855_v55, %v831_v51  ;;  %v890_v34 = vsel %vm889_vm12, %v1254_v46, %v886_v4  ;;  %v640_v6 = vmul.f32 0.5, %v1720_v25  ;;  %v641_v62 = vmul.f32 0.5, %v1746_v9 }
 0x203   : > { %1040 = vmatmul.f32.vlgmr.msra.gmra.mxu2 %v990_v48  ;;  %v994_v41 = vmul.f32 %v986_v35, %v1877_v12  ;;  %v895_v24 = vsel %vm892_vm13, %v894_v5, %v890_v34 }
 0x204   : > { %v1163_v56 = vclamps-f32 %v856_v0, 1.0  ;;  %v896_v15 = vmul.f32 %v895_v24, %v871_v32 }
 0x205   : > { %1052 = vmatmul.f32.gmra.mxu3 %v994_v41 }
 0x206   : > { %v983_v49 = vadd.f32 1.0, %v1163_v56  ;;  %v1164_v37 = vclamps-f32 %v896_v15, 1.0 }
 0x208   : > { %v991_v16 = vmul.f32 %v983_v49, %v640_v6  ;;  %v984_v33 = vadd.f32 1.0, %v1164_v37 }
 0x20a   : > { %v992_v39 = vmul.f32 %v984_v33, %v641_v62 }
 0x20b   : > { %1043 = vmatmul.f32.gmra.mxu2 %v991_v16 }
 0x213   : > { %1046 = vmatmul.f32.gmra.mxu2 %v992_v39 }
 0x253   : > { %v1032_v12 = vpop.f32.mrf.mxu1 }
 0x254   : > { %v1033_v26 = vadd.f32 %v1218_v43, %v1032_v12 }
 0x256   : > { %v1056_v25 = vadd.f32 %v1033_v26, %v1342_v8 }
 0x258   : > { %1064 = vst.msk [vmem:[%s329_s25] sm:$0xff] %vm357_vm0, %v1056_v25 }
 0x26b   : > { %v1035_v10 = vpop.f32.mrf.mxu1 }
 0x26c   : > { %v1036_v17 = vadd.f32 %v1218_v43, %v1035_v10 }
 0x26d   : > { %v1050_v22 = vpop.f32.mrf.mxu3 }
 0x26e   : > { %v1051_v9 = vadd.f32 %v1218_v43, %v1050_v22  ;;  %v1057_v53 = vadd.f32 %v1036_v17, %v1360_v20 }
 0x270   : > { %v1062_v14 = vadd.f32 %v1051_v9, %v1335_v3  ;;  %1065 = vst.msk [vmem:[%s329_s25 + $0x8] sm:$0xff] %vm357_vm0, %v1057_v53 }
 0x272   : > { %1070 = vst.msk [vmem:[%s329_s25 + $0x30] sm:$0xff] %vm357_vm0, %v1062_v14 }
 0x27f   : > { %v1038_v40 = vpop.f32.mrf.mxu1 }
 0x280   : > { %v1039_v60 = vadd.f32 %v1218_v43, %v1038_v40 }
 0x282   : > { %v1058_v52 = vadd.f32 %v1039_v60, %v1340_v7 }
 0x284   : > { %1066 = vst.msk [vmem:[%s329_s25 + $0x10] sm:$0xff] %vm357_vm0, %v1058_v52 }
 0x286   : > { %v1041_v8 = vpop.f32.mrf.mxu2 }
 0x287   : > { %v1042_v46 = vadd.f32 %v1218_v43, %v1041_v8 }
 0x288   : > { %v1053_v27 = vpop.f32.mrf.mxu3 }
 0x289   : > { %v1059_v36 = vadd.f32 %v1042_v46, %v1358_v19  ;;  %v1054_v45 = vadd.f32 %v1218_v43, %v1053_v27 }
 0x28b   : > { %1067 = vst.msk [vmem:[%s329_s25 + $0x18] sm:$0xff] %vm357_vm0, %v1059_v36  ;;  %v1063_v3 = vadd.f32 %v1054_v45, %v1372_v28 }
 0x28d   : > { %1071 = vst.msk [vmem:[%s329_s25 + $0x38] sm:$0xff] %vm357_vm0, %v1063_v3 }
 0x28e   : > { %v1044_v20 = vpop.f32.mrf.mxu2 }
 0x28f   : > { %v1045_v31 = vadd.f32 %v1218_v43, %v1044_v20 }
 0x291   : > { %v1060_v21 = vadd.f32 %v1045_v31, %v1356_v18 }
 0x293   : > { %1068 = vst.msk [vmem:[%s329_s25 + $0x20] sm:$0xff] %vm357_vm0, %v1060_v21 }
 0x296   : > { %v1047_v7 = vpop.f32.mrf.mxu2 }
 0x297   : > { %v1048_v42 = vadd.f32 %v1218_v43, %v1047_v7 }
 0x299   : > { %v1061_v13 = vadd.f32 %v1048_v42, %v1374_v29 }
 0x29b   : > { %1069 = vst.msk [vmem:[%s329_s25 + $0x28] sm:$0xff] %vm357_vm0, %v1061_v13 }
 0x29c PF: > { %s18_s27 = sadd.s32 1, %s1261_s27  }
 0x29d   : > { %p15_p4 = scmp.ge.s32.totalorder %s18_s27, 4  }
 0x29f   :  { %17 = sbr.rel (!%p15_p4) target bundleno = 1 (0x1), region = 85 }

// kernel: forward.11
= control target key start
LH: loop header
LB: loop body
LE: loop exit
PB: predicated region body
PF: predicated region fallthrough
CT: control target
= control target key end

     0   :  { %s1068_s18 = smov 0   ;;  %s1609_s0 = inlined_call_operand.vmem [shape: f32[128,32], index: 0, kind: input, shape index: {}]   ;;  %s1610_s1 = inlined_call_operand.vmem [shape: f32[1,32], index: 1, kind: input, shape index: {}]   ;;  %s1611_s2 = inlined_call_operand.vmem [shape: f32[1,32], index: 2, kind: input, shape index: {}]   ;;  %s1612_s3 = inlined_call_operand.vmem [shape: f32[32,128], index: 3, kind: input, shape index: {}]   ;;  %s1613_s4 = inlined_call_operand.vmem [shape: f32[1,128], index: 4, kind: input, shape index: {}]   ;;  %s1614_s5 = inlined_call_operand.vmem [shape: f32[128,128], index: 5, kind: output, shape index: {}]  }
   0x1 LB: > { %s940_s19 = sadd.s32 4294967295, %s1034_s18   ;;  %p944_p0 = scmp.ge.s32.totalorder %s1034_s18, 1  ;;  %s1034_s18 = sphi %s1068_s18, %s15_s18  }
   0x2   : > { %p188_p1 = scmp.lt.s32.totalorder %s1034_s18, 3 }
   0x4   : > { %p189_p2 = pnand %p944_p0, %p188_p1 }
   0x5   : > { %s945_s20 = sshll.u32 (!%p189_p2), %s940_s19, 3 }
   0x6   : > { %192 = sbr.rel (%p189_p2) target bundleno = 525 (0x20d), region = 40  ;;  %p217_p3 = scmp.lt.s32.totalorder (!%p189_p2), %s945_s20, 15 }
   0xb   : > { %s1630_s20 = smov (!%p217_p3, %s945_s20), 15  ;;  %vm238_vm0 = vcmask 261120   ;;  %v1036_v16 = vmov 32.0  }
   0xc   : > { %s946_s21 = sshll.u32 %s1630_s20, 3  ;;  %992 = vrcp.f32 %v1036_v16 }
   0xd   : > { %s220_s24 = scalar_lea.vmem %s1609_s0, %s946_s21  ;;  %s226_s16 = scalar_lea.vmem %s1614_s5, %s946_s21 }
   0xe   : > { %v233_v0 = vld [vmem:[%s220_s24 + $0x28] sm:$0xff]  ;;  %v232_v1 = vld [vmem:[%s220_s24 + $0x20] sm:$0xff]  ;;  %v235_v6 = vld [vmem:[%s220_s24 + $0x38] sm:$0xff] }
   0xf   : > { %v228_v2 = vld [vmem:[%s220_s24] sm:$0xff]  ;;  %v254_v3 = vsel %vm238_vm0, %v233_v0, 0.0  ;;  %v251_v4 = vsel %vm238_vm0, %v232_v1, 0.0  ;;  %v234_v7 = vld [vmem:[%s220_s24 + $0x30] sm:$0xff]  ;;  %v260_v9 = vsel %vm238_vm0, %v235_v6, 0.0  ;;  %v229_v12 = vld [vmem:[%s220_s24 + $0x8] sm:$0xff] }
  0x10   : > { %v239_v5 = vsel %vm238_vm0, %v228_v2, 0.0  ;;  %255 = vadd.xlane.f32.xlu2 %v254_v3  ;;  %252 = vadd.xlane.f32.xlu0 %v251_v4  ;;  %v230_v8 = vld [vmem:[%s220_s24 + $0x10] sm:$0xff]  ;;  %v257_v10 = vsel %vm238_vm0, %v234_v7, 0.0  ;;  %v231_v13 = vld [vmem:[%s220_s24 + $0x18] sm:$0xff]  ;;  %v242_v14 = vsel %vm238_vm0, %v229_v12, 0.0 }
  0x11   : > { %240 = vadd.xlane.f32.xlu1 %v239_v5  ;;  %v245_v11 = vsel %vm238_vm0, %v230_v8, 0.0  ;;  %v248_v15 = vsel %vm238_vm0, %v231_v13, 0.0 }
  0x12   : > { %v993_v17 = vpop.eup %992 }
  0x13   : > { %v264_v18 = vmul.f32 32.0, %v993_v17  ;;  %vm268_vm1 = vweird.f32 %v993_v17 }
  0x15   : > { %v265_v19 = vsub.f32 1.0, %v264_v18 }
  0x17   : > { %v266_v20 = vmul.f32 %v993_v17, %v265_v19 }
  0x18   : > { %261 = vadd.xlane.f32.xlu2 %v260_v9  ;;  %258 = vadd.xlane.f32.xlu0 %v257_v10 }
  0x19   : > { %246 = vadd.xlane.f32.xlu1 %v245_v11  ;;  %v267_v21 = vadd.f32 %v993_v17, %v266_v20 }
  0x1b   : > { %v1092_v22 = vsel %vm268_vm1, %v993_v17, %v267_v21 }
  0x20   : > { %243 = vadd.xlane.f32.xlu0 %v242_v14 }
  0x21   : > { %249 = vadd.xlane.f32.xlu1 %v248_v15 }
  0x83   : > { %v256_v23 = vpop.xlane.xlu2 %255  ;;  %v253_v24 = vpop.xlane.xlu0 %252 }
  0x84   : > { %v274_v25 = vmul.f32 %v1092_v22, %v253_v24  ;;  %v241_v26 = vpop.xlane.xlu1 %240  ;;  %v275_v40 = vmul.f32 %v1092_v22, %v256_v23 }
  0x85   : > { %v270_v27 = vmul.f32 %v1092_v22, %v241_v26  ;;  %v805_v26 = vld [vmem:[%s1612_s3 + $0x10] sm:$0xff] }
  0x86   : > { %v1096_v28 = vsub.f32 %v232_v1, %v274_v25  ;;  %v1122_v47 = vsub.f32 %v233_v0, %v275_v40  ;;  %v1037_v0 = vmov 1.4142135   ;;  %v806_v25 = vld [vmem:[%s1612_s3 + $0x18] sm:$0xff] }
  0x87   : > { %v1098_v29 = vsub.f32 %v228_v2, %v270_v27  ;;  %994 = vrcp.f32 %v1037_v0  ;;  %847 = vmatpush.msra.mxu0 %v806_v25  ;;  %968 = vmatpush.msra.mxu2 %v806_v25 }
  0x88   : > { %v290_v30 = vmul.f32 %v1096_v28, %v1096_v28  ;;  %v291_v56 = vmul.f32 %v1122_v47, %v1122_v47  ;;  %967 = vmatpush.msra.mxu1 %v806_v25  ;;  %969 = vmatpush.msra.mxu3 %v806_v25 }
  0x89   : > { %v286_v31 = vmul.f32 %v1098_v29, %v1098_v29  ;;  %848 = vmatpush.msra.mxu0 %v805_v26  ;;  %971 = vmatpush.msra.mxu2 %v805_v26 }
  0x8a   : > { %v306_v32 = vsel %vm238_vm0, %v290_v30, 0.0  ;;  %v309_v59 = vsel %vm238_vm0, %v291_v56, 0.0  ;;  %970 = vmatpush.msra.mxu1 %v805_v26  ;;  %972 = vmatpush.msra.mxu3 %v805_v26 }
  0x8b   : > { %v262_v33 = vpop.xlane.xlu2 %261  ;;  %307 = vadd.xlane.f32.xlu2 %v306_v32  ;;  %v259_v34 = vpop.xlane.xlu0 %258  ;;  %v294_v35 = vsel %vm238_vm0, %v286_v31, 0.0 }
  0x8c   : > { %v277_v36 = vmul.f32 %v1092_v22, %v262_v33  ;;  %v276_v37 = vmul.f32 %v1092_v22, %v259_v34  ;;  %295 = vadd.xlane.f32.xlu1 %v294_v35  ;;  %v247_v38 = vpop.xlane.xlu1 %246  ;;  %v804_v34 = vld [vmem:[%s1612_s3 + $0x8] sm:$0xff] }
  0x8d   : > { %v272_v39 = vmul.f32 %v1092_v22, %v247_v38  ;;  %849 = vmatpush.msra.mxu0 %v804_v34  ;;  %974 = vmatpush.msra.mxu2 %v804_v34 }
  0x8e   : > { %v1110_v41 = vsub.f32 %v235_v6, %v277_v36  ;;  %v1112_v42 = vsub.f32 %v234_v7, %v276_v37  ;;  %v1146_v6 = vpop.eup %994  ;;  %973 = vmatpush.msra.mxu1 %v804_v34  ;;  %975 = vmatpush.msra.mxu3 %v804_v34 }
  0x8f   : > { %v1114_v43 = vsub.f32 %v230_v8, %v272_v39  ;;  %v453_v11 = vmul.f32 1.4142135, %v1146_v6  ;;  %vm457_vm8 = vweird.f32 %v1146_v6 }
  0x90   : > { %v292_v44 = vmul.f32 %v1112_v42, %v1112_v42  ;;  %v293_v45 = vmul.f32 %v1110_v41, %v1110_v41 }
  0x91   : > { %v288_v46 = vmul.f32 %v1114_v43, %v1114_v43  ;;  %v454_v21 = vsub.f32 1.0, %v453_v11 }
  0x92   : > { %v312_v48 = vsel %vm238_vm0, %v292_v44, 0.0  ;;  %v315_v49 = vsel %vm238_vm0, %v293_v45, 0.0  ;;  %v803_v44 = vld [vmem:[%s1612_s3] sm:$0xff] }
  0x93   : > { %313 = vadd.xlane.f32.xlu0 %v312_v48  ;;  %v244_v50 = vpop.xlane.xlu0 %243  ;;  %v300_v51 = vsel %vm238_vm0, %v288_v46, 0.0  ;;  %v455_v35 = vmul.f32 %v1146_v6, %v454_v21  ;;  %850 = vmatpush.msra.mxu0 %v803_v44 }
  0x94   : > { %v271_v52 = vmul.f32 %v1092_v22, %v244_v50  ;;  %316 = vadd.xlane.f32.xlu1 %v315_v49  ;;  %301 = vadd.xlane.f32.xlu2 %v300_v51  ;;  %v250_v53 = vpop.xlane.xlu1 %249 }
  0x95   : > { %v273_v54 = vmul.f32 %v1092_v22, %v250_v53  ;;  %v1204_v53 = vld [vmem:[%s1610_s1] ss:$0 sm:$0xff]  ;;  %977 = vmatpush.msra.mxu2 %v803_v44  ;;  %976 = vmatpush.msra.mxu1 %v803_v44 }
  0x96   : > { %v1129_v55 = vsub.f32 %v229_v12, %v271_v52  ;;  %978 = vmatpush.msra.mxu3 %v803_v44 }
  0x97   : > { %v1135_v58 = vsub.f32 %v231_v13, %v273_v54  ;;  %v456_v54 = vadd.f32 %v1146_v6, %v455_v35 }
  0x98   : > { %v287_v57 = vmul.f32 %v1129_v55, %v1129_v55 }
  0x99   : > { %v289_v61 = vmul.f32 %v1135_v58, %v1135_v58 }
  0x9a   : > { %v297_v60 = vsel %vm238_vm0, %v287_v57, 0.0 }
  0x9b   : > { %310 = vadd.xlane.f32.xlu0 %v309_v59  ;;  %v303_v62 = vsel %vm238_vm0, %v289_v61, 0.0 }
  0x9c   : > { %298 = vadd.xlane.f32.xlu2 %v297_v60 }
  0xa3   : > { %304 = vadd.xlane.f32.xlu0 %v303_v62 }
  0xfe   : > { %v308_v63 = vpop.xlane.xlu2 %307 }
  0xff   : > { %v322_v1 = vmul.f32 %v308_v63, %v1092_v22  ;;  %v296_v2 = vpop.xlane.xlu1 %295 }
 0x100   : > { %v318_v3 = vmul.f32 %v296_v2, %v1092_v22 }
 0x101   : > { %v330_v4 = vadd.f32 1e-05, %v322_v1 }
 0x102   : > { %v1144_v5 = vadd.f32 1e-05, %v318_v3 }
 0x103   : > { %996 = vrsqrt.f32 %v330_v4  ;;  %vm380_vm5 = vweird.f32 %v330_v4 }
 0x104   : > { %998 = vrsqrt.f32 %v1144_v5  ;;  %vm340_vm3 = vweird.f32 %v1144_v5 }
 0x106   : > { %v314_v7 = vpop.xlane.xlu0 %313 }
 0x107   : > { %v324_v8 = vmul.f32 %v314_v7, %v1092_v22  ;;  %v302_v9 = vpop.xlane.xlu2 %301  ;;  %v317_v10 = vpop.xlane.xlu1 %316 }
 0x108   : > { %v320_v12 = vmul.f32 %v302_v9, %v1092_v22  ;;  %v325_v13 = vmul.f32 %v317_v10, %v1092_v22 }
 0x109   : > { %v997_v14 = vpop.eup %996  ;;  %v1153_v15 = vadd.f32 1e-05, %v324_v8 }
 0x10a   : > { %v1155_v16 = vpop.eup %998  ;;  %v375_v17 = vmul.f32 %v997_v14, %v330_v4  ;;  %v1157_v18 = vadd.f32 1e-05, %v320_v12  ;;  %v1159_v19 = vadd.f32 1e-05, %v325_v13  ;;  %vm381_vm2 = vweird.f32 %v997_v14 }
 0x10b   : > { %v335_v20 = vmul.f32 %v1155_v16, %v1144_v5  ;;  %1000 = vrsqrt.f32 %v1153_v15  ;;  %vm341_vm4 = vweird.f32 %v1155_v16  ;;  %vm382_vm6 = vmor %vm380_vm5, %vm381_vm2  ;;  %vm400_vm12 = vweird.f32 %v1153_v15 }
 0x10c   : > { %v376_v23 = vmul.f32 %v997_v14, %v375_v17  ;;  %1002 = vrsqrt.f32 %v1157_v18  ;;  %vm342_vm7 = vmor %vm340_vm3, %vm341_vm4  ;;  %vm360_vm10 = vweird.f32 %v1157_v18  ;;  %vm410_vm15 = vweird.f32 %v1159_v19 }
 0x10d   : > { %v336_v24 = vmul.f32 %v1155_v16, %v335_v20  ;;  %1004 = vrsqrt.f32 %v1159_v19  ;;  %v1254_v20 = vsel %vm457_vm8, %v1146_v6, %v456_v54 }
 0x10e   : > { %v377_v27 = vmul.f32 0.5, %v376_v23  ;;  %v311_v30 = vpop.xlane.xlu0 %310 }
 0x10f   : > { %v337_v31 = vmul.f32 0.5, %v336_v24  ;;  %v323_v32 = vmul.f32 %v311_v30, %v1092_v22  ;;  %v299_v33 = vpop.xlane.xlu2 %298 }
 0x110   : > { %v378_v36 = vsub.f32 1.5, %v377_v27  ;;  %v319_v37 = vmul.f32 %v299_v33, %v1092_v22 }
 0x111   : > { %v1179_v38 = vpop.eup %1000  ;;  %v338_v39 = vsub.f32 1.5, %v337_v31  ;;  %v1183_v40 = vadd.f32 1e-05, %v323_v32 }
 0x112   : > { %v1188_v45 = vpop.eup %1002  ;;  %v379_v46 = vmul.f32 %v997_v14, %v378_v36  ;;  %v395_v48 = vmul.f32 %v1179_v38, %v1153_v15  ;;  %v1192_v49 = vadd.f32 1e-05, %v319_v37  ;;  %vm401_vm9 = vweird.f32 %v1179_v38 }
 0x113   : > { %v1194_v50 = vpop.eup %1004  ;;  %v339_v51 = vmul.f32 %v1155_v16, %v338_v39  ;;  %v355_v52 = vmul.f32 %v1188_v45, %v1157_v18  ;;  %1006 = vrsqrt.f32 %v1183_v40  ;;  %vm361_vm11 = vweird.f32 %v1188_v45  ;;  %vm402_vm13 = vmor %vm400_vm12, %vm401_vm9 }
 0x114   : > { %v383_v56 = vsel %vm382_vm6, %v997_v14, %v379_v46  ;;  %v396_v57 = vmul.f32 %v1179_v38, %v395_v48  ;;  %v405_v59 = vmul.f32 %v1194_v50, %v1159_v19  ;;  %1008 = vrsqrt.f32 %v1192_v49  ;;  %vm362_vm14 = vmor %vm360_vm10, %vm361_vm11 }
 0x115   : > { %v418_v60 = vmul.f32 %v383_v56, %v1096_v28  ;;  %v343_v61 = vsel %vm342_vm7, %v1155_v16, %v339_v51  ;;  %v356_v62 = vmul.f32 %v1188_v45, %v355_v52  ;;  %v1224_v28 = vld [vmem:[%s1611_s2] ss:$0 sm:$0xff]  ;;  %vm411_vm1 = vweird.f32 %v1194_v50 }
 0x116   : > { %v414_v63 = vmul.f32 %v343_v61, %v1098_v29  ;;  %v397_v0 = vmul.f32 0.5, %v396_v57  ;;  %v406_v1 = vmul.f32 %v1194_v50, %v405_v59  ;;  %v305_v2 = vpop.xlane.xlu0 %304  ;;  %vm1289_vm2 = vmor %vm410_vm15, %vm411_vm1  ;;  %vm350_vm3 = vweird.f32 %v1192_v49 }
 0x117   : > { %v357_v3 = vmul.f32 0.5, %v356_v62  ;;  %v321_v4 = vmul.f32 %v305_v2, %v1092_v22  ;;  %v429_v5 = vmul.f32 %v1204_v53, %v418_v60  ;;  %vm390_vm7 = vweird.f32 %v1183_v40 }
 0x118   : > { %v398_v7 = vsub.f32 1.5, %v397_v0  ;;  %v407_v29 = vmul.f32 0.5, %v406_v1  ;;  %v425_v8 = vmul.f32 %v1204_v53, %v414_v63 }
 0x119   : > { %v1230_v9 = vpop.eup %1006  ;;  %v358_v10 = vsub.f32 1.5, %v357_v3  ;;  %v1234_v22 = vadd.f32 1e-05, %v321_v4  ;;  %v1244_v14 = vadd.f32 %v1224_v28, %v429_v5 }
 0x11a   : > { %v399_v11 = vmul.f32 %v1179_v38, %v398_v7  ;;  %v1241_v13 = vadd.f32 %v1224_v28, %v425_v8  ;;  %v1246_v16 = vpop.eup %1008  ;;  %v408_v18 = vsub.f32 1.5, %v407_v29  ;;  %v385_v15 = vmul.f32 %v1230_v9, %v1183_v40 }
 0x11b   : > { %v359_v12 = vmul.f32 %v1188_v45, %v358_v10  ;;  %1010 = vrsqrt.f32 %v1234_v22  ;;  %v345_v24 = vmul.f32 %v1246_v16, %v1192_v49  ;;  %v1269_v6 = vmul.f32 %v1254_v20, %v1244_v14 }
 0x11c   : > { %v403_v17 = vsel %vm402_vm13, %v1179_v38, %v399_v11  ;;  %v1265_v27 = vmul.f32 %v1254_v20, %v1241_v13  ;;  %v386_v30 = vmul.f32 %v1230_v9, %v385_v15  ;;  %vm351_vm4 = vweird.f32 %v1246_v16 }
 0x11d   : > { %v420_v21 = vmul.f32 %v403_v17, %v1112_v42  ;;  %v363_v23 = vsel %vm362_vm14, %v1188_v45, %v359_v12  ;;  %v346_v26 = vmul.f32 %v1246_v16, %v345_v24  ;;  %v409_v42 = vmul.f32 %v1194_v50, %v408_v18  ;;  %vm1324_vm5 = vmor %vm350_vm3, %vm351_vm4 }
 0x11e   : > { %v416_v25 = vmul.f32 %v363_v23, %v1114_v43  ;;  %v467_v33 = vmul.f32 %v1265_v27, %v1265_v27  ;;  %v627_v34 = vmul.f32 %v1269_v6, %v1269_v6  ;;  %v387_v48 = vmul.f32 0.5, %v386_v30 }
 0x11f   : > { %v347_v32 = vmul.f32 0.5, %v346_v26  ;;  %v431_v35 = vmul.f32 %v1204_v53, %v420_v21  ;;  %v413_v46 = vsel %vm1289_vm2, %v1194_v50, %v409_v42  ;;  %vm391_vm6 = vweird.f32 %v1230_v9 }
 0x120   : > { %v427_v43 = vmul.f32 %v1204_v53, %v416_v25  ;;  %v1294_v44 = vmin.f32 %v467_v33, 16.0  ;;  %v1296_v45 = vmin.f32 %v627_v34, 16.0  ;;  %v1318_v63 = vmul.f32 %v413_v46, %v1110_v41  ;;  %vm1377_vm10 = vmor %vm390_vm7, %vm391_vm6 }
 0x121   : > { %v1275_v31 = vpop.eup %1010  ;;  %v348_v39 = vsub.f32 1.5, %v347_v32  ;;  %v1310_v56 = vadd.f32 %v1224_v28, %v431_v35  ;;  %v388_v0 = vsub.f32 1.5, %v387_v48  ;;  %vm370_vm9 = vweird.f32 %v1234_v22 }
 0x122   : > { %v365_v36 = vmul.f32 %v1275_v31, %v1234_v22  ;;  %v1285_v37 = vadd.f32 %v1224_v28, %v427_v43  ;;  %v469_v52 = vmul.f32 2.1237322e-06, %v1294_v44  ;;  %v480_v54 = vmul.f32 3.8918573e-05, %v1294_v44 }
 0x123   : > { %v349_v57 = vmul.f32 %v1246_v16, %v348_v39  ;;  %v629_v50 = vmul.f32 2.1237322e-06, %v1296_v45  ;;  %v640_v59 = vmul.f32 3.8918573e-05, %v1296_v45  ;;  %v1334_v41 = vmul.f32 %v1254_v20, %v1310_v56 }
 0x124   : > { %v1304_v19 = vmul.f32 %v1254_v20, %v1285_v37  ;;  %v366_v51 = vmul.f32 %v1275_v31, %v365_v36  ;;  %v470_v61 = vadd.f32 0.00028619796, %v469_v52  ;;  %v481_v62 = vadd.f32 0.001143296, %v480_v54 }
 0x125   : > { %v630_v1 = vadd.f32 0.00028619796, %v629_v50  ;;  %v641_v2 = vadd.f32 0.001143296, %v640_v59  ;;  %v353_v29 = vsel %vm1324_vm5, %v1246_v16, %v349_v57  ;;  %v707_v18 = vmul.f32 %v1334_v41, %v1334_v41 }
 0x126   : > { %v547_v60 = vmul.f32 %v1304_v19, %v1304_v19  ;;  %v471_v4 = vmul.f32 %v470_v61, %v1294_v44  ;;  %v482_v5 = vmul.f32 %v481_v62, %v1294_v44  ;;  %v367_v8 = vmul.f32 0.5, %v366_v51 }
 0x127   : > { %v631_v49 = vmul.f32 %v630_v1, %v1296_v45  ;;  %v642_v10 = vmul.f32 %v641_v2, %v1296_v45  ;;  %v1346_v15 = vmul.f32 %v1230_v9, %v388_v0  ;;  %v415_v24 = vmul.f32 %v353_v29, %v1129_v55 }
 0x128   : > { %v1330_v7 = vmin.f32 %v547_v60, 16.0  ;;  %v472_v11 = vadd.f32 0.0036580483, %v471_v4  ;;  %v483_v12 = vadd.f32 0.014752088, %v482_v5  ;;  %vm371_vm8 = vweird.f32 %v1275_v31 }
 0x129   : > { %v632_v21 = vadd.f32 0.0036580483, %v631_v49  ;;  %v643_v23 = vadd.f32 0.014752088, %v642_v10  ;;  %v1356_v33 = vmin.f32 %v707_v18, 16.0  ;;  %v368_v34 = vsub.f32 1.5, %v367_v8  ;;  %vm1399_vm11 = vmor %vm370_vm9, %vm371_vm8 }
 0x12a   : > { %v549_v17 = vmul.f32 2.1237322e-06, %v1330_v7  ;;  %v560_v16 = vmul.f32 3.8918573e-05, %v1330_v7  ;;  %v473_v25 = vmul.f32 %v472_v11, %v1294_v44  ;;  %v484_v26 = vmul.f32 %v483_v12, %v1294_v44 }
 0x12b   : > { %v633_v30 = vmul.f32 %v632_v21, %v1296_v45  ;;  %v644_v43 = vmul.f32 %v643_v23, %v1296_v45  ;;  %v709_v48 = vmul.f32 2.1237322e-06, %v1356_v33  ;;  %v720_v57 = vmul.f32 3.8918573e-05, %v1356_v33 }
 0x12c   : > { %v550_v42 = vadd.f32 0.00028619796, %v549_v17  ;;  %v561_v32 = vadd.f32 0.001143296, %v560_v16  ;;  %v474_v35 = vadd.f32 0.05243302, %v473_v25  ;;  %v369_v17 = vmul.f32 %v1275_v31, %v368_v34 }
 0x12d   : > { %v485_v36 = vadd.f32 0.112945676, %v484_v26  ;;  %v634_v55 = vadd.f32 0.05243302, %v633_v30  ;;  %v645_v39 = vadd.f32 0.112945676, %v644_v43  ;;  %v426_v43 = vmul.f32 %v1204_v53, %v415_v24 }
 0x12e   : > { %v551_v38 = vmul.f32 %v550_v42, %v1330_v7  ;;  %v562_v46 = vmul.f32 %v561_v32, %v1330_v7  ;;  %v475_v51 = vmul.f32 %v474_v35, %v1294_v44  ;;  %v710_v61 = vadd.f32 0.00028619796, %v709_v48 }
 0x12f   : > { %v486_v52 = vmul.f32 %v485_v36, %v1294_v44  ;;  %v635_v50 = vmul.f32 %v634_v55, %v1296_v45  ;;  %v646_v59 = vmul.f32 %v645_v39, %v1296_v45  ;;  %v721_v2 = vadd.f32 0.001143296, %v720_v57 }
 0x130   : > { %v552_v54 = vadd.f32 0.0036580483, %v551_v38  ;;  %v563_v60 = vadd.f32 0.014752088, %v562_v46  ;;  %v476_v62 = vadd.f32 0.18741608, %v475_v51  ;;  %v711_v29 = vmul.f32 %v710_v61, %v1356_v33 }
 0x131   : > { %v487_v0 = vadd.f32 0.4994258, %v486_v52  ;;  %v636_v3 = vadd.f32 0.18741608, %v635_v50  ;;  %v647_v4 = vadd.f32 0.4994258, %v646_v59  ;;  %v722_v11 = vmul.f32 %v721_v2, %v1356_v33 }
 0x132   : > { %v553_v1 = vmul.f32 %v552_v54, %v1330_v7  ;;  %v564_v5 = vmul.f32 %v563_v60, %v1330_v7  ;;  %v477_v8 = vmul.f32 %v476_v62, %v1294_v44  ;;  %v712_v23 = vadd.f32 0.0036580483, %v711_v29 }
 0x133   : > { %v488_v49 = vmul.f32 %v487_v0, %v1294_v44  ;;  %v648_v18 = vmul.f32 %v647_v4, %v1296_v45  ;;  %v393_v44 = vsel %vm1377_vm10, %v1230_v9, %v1346_v15  ;;  %v637_v25 = vmul.f32 %v636_v3, %v1296_v45 }
 0x134   : > { %v554_v10 = vadd.f32 0.05243302, %v553_v1  ;;  %v565_v21 = vadd.f32 0.112945676, %v564_v5  ;;  %v723_v30 = vadd.f32 0.014752088, %v722_v11  ;;  %v713_v15 = vmul.f32 %v712_v23, %v1356_v33 }
 0x135   : > { %v1387_v16 = vadd.f32 1.0, %v488_v49  ;;  %v1391_v26 = vadd.f32 1.0, %v648_v18  ;;  %v478_v9 = vadd.f32 1.1283791, %v477_v8  ;;  %v1405_v45 = vmul.f32 0.5, %v1244_v14 }
 0x136   : > { %v555_v40 = vmul.f32 %v554_v10, %v1330_v7  ;;  %v566_v42 = vmul.f32 %v565_v21, %v1330_v7  ;;  %v373_v24 = vsel %vm1399_vm11, %v1275_v31, %v369_v17  ;;  %v1412_v34 = vmul.f32 0.5, %v1241_v13 }
 0x137   : > { %1012 = vrcp.f32 %v1387_v16  ;;  %v432_v22 = vmul.f32 %v1204_v53, %v1318_v63  ;;  %v419_v35 = vmul.f32 %v393_v44, %v1122_v47  ;;  %v638_v36 = vadd.f32 1.1283791, %v637_v25 }
 0x138   : > { %1014 = vrcp.f32 %v1391_v26  ;;  %v1419_v14 = vmul.f32 0.5, %v1285_v37  ;;  %v556_v38 = vadd.f32 0.18741608, %v555_v40  ;;  %v499_v55 = vand.u32 2147483647, %v1387_v16 }
 0x139   : > { %v567_v39 = vadd.f32 0.4994258, %v566_v42  ;;  %v724_v31 = vmul.f32 %v723_v30, %v1356_v33  ;;  %v1424_v13 = vadd.f32 %v1224_v28, %v426_v43  ;;  %v1427_v46 = vmul.f32 %v373_v24, %v1135_v58 }
 0x13a   : > { %v479_v63 = vmul.f32 %v478_v9, %v1265_v27  ;;  %v501_v47 = vand.u32 2147483648, %v1387_v16  ;;  %v714_v48 = vadd.f32 0.05243302, %v713_v15  ;;  %v659_v37 = vand.u32 2147483647, %v1391_v26 }
 0x13b   : > { %v557_v51 = vmul.f32 %v556_v38, %v1330_v7  ;;  %v568_v52 = vmul.f32 %v567_v39, %v1330_v7  ;;  %v725_v54 = vadd.f32 0.112945676, %v724_v31  ;;  %vm495_vm12 = vweird.f32 %v1387_v16 }
 0x13c   : > { %v639_v50 = vmul.f32 %v638_v36, %v1269_v6  ;;  %vm655_vm13 = vweird.f32 %v1391_v26  ;;  %v661_v58 = vand.u32 2147483648, %v1391_v26  ;;  %vm1439_vm14 = vcmp.eq.f32.partialorder %v499_v55, 8.507059e+37 }
 0x13d   : > { %v1013_v57 = vpop.eup %1012  ;;  %v1443_v61 = vadd.f32 1.0, %v568_v52  ;;  %v1447_v7 = vmul.f32 %v1254_v20, %v1424_v13  ;;  %v430_v62 = vmul.f32 %v1204_v53, %v419_v35  ;;  %v502_v6 = vor.u32 1.1754944e-38, %v501_v47 }
 0x13e   : > { %v1015_v27 = vpop.eup %1014  ;;  %v491_v59 = vmul.f32 %v1013_v57, %v1387_v16  ;;  %v715_v1 = vmul.f32 %v714_v48, %v1356_v33  ;;  %v726_v2 = vmul.f32 %v725_v54, %v1356_v33  ;;  %vm1453_vm15 = vcmp.eq.f32.partialorder %v659_v37, 8.507059e+37 }
 0x13f   : > { %v651_v0 = vmul.f32 %v1015_v27, %v1391_v26  ;;  %v558_v5 = vadd.f32 1.1283791, %v557_v51  ;;  %1016 = vrcp.f32 %v1443_v61  ;;  %v662_v8 = vor.u32 1.1754944e-38, %v661_v58 }
 0x140   : > { %v492_v3 = vsub.f32 1.0, %v491_v59  ;;  %v727_v49 = vadd.f32 0.4994258, %v726_v2  ;;  %v1459_v10 = vadd.f32 %v1224_v28, %v432_v22  ;;  %vm496_vm1 = vweird.f32 %v1013_v57 }
 0x141   : > { %v652_v29 = vsub.f32 1.0, %v651_v0  ;;  %v507_v12 = vmul.f32 %v1447_v7, %v1447_v7  ;;  %v1464_v17 = vadd.f32 %v1224_v28, %v430_v62  ;;  %vm656_vm2 = vweird.f32 %v1015_v27  ;;  %vm497_vm3 = vmor %vm495_vm12, %vm496_vm1 }
 0x142   : > { %v493_v11 = vmul.f32 %v1013_v57, %v492_v3  ;;  %v716_v21 = vadd.f32 0.18741608, %v715_v1  ;;  %v728_v23 = vmul.f32 %v727_v49, %v1356_v33  ;;  %v559_v25 = vmul.f32 %v558_v5, %v1304_v19  ;;  %vm657_vm4 = vmor %vm655_vm13, %vm656_vm2 }
 0x143   : > { %v653_v18 = vmul.f32 %v1015_v27, %v652_v29  ;;  %v1468_v40 = vmin.f32 %v507_v12, 16.0  ;;  %v1472_v42 = vmul.f32 %v1254_v20, %v1464_v17  ;;  %v579_v43 = vand.u32 2147483647, %v1443_v61 }
 0x144   : > { %v494_v44 = vadd.f32 %v1013_v57, %v493_v11  ;;  %v581_v32 = vand.u32 2147483648, %v1443_v61  ;;  %v1478_v9 = vadd.f32 1.0, %v728_v23  ;;  %v717_v55 = vmul.f32 %v716_v21, %v1356_v33 }
 0x145   : > { %v654_v30 = vadd.f32 %v1015_v27, %v653_v18  ;;  %v1017_v15 = vpop.eup %1016  ;;  %v509_v19 = vmul.f32 2.1237322e-06, %v1468_v40  ;;  %v520_v22 = vmul.f32 3.8918573e-05, %v1468_v40  ;;  %v667_v16 = vmul.f32 %v1472_v42, %v1472_v42 }
 0x146   : > { %v498_v24 = vsel %vm497_vm3, %v1013_v57, %v494_v44  ;;  %v571_v38 = vmul.f32 %v1017_v15, %v1443_v61  ;;  %vm575_vm5 = vweird.f32 %v1443_v61  ;;  %1018 = vrcp.f32 %v1478_v9 }
 0x147   : > { %v503_v35 = vsel %vm1439_vm14, %v502_v6, %v498_v24  ;;  %v658_v36 = vsel %vm657_vm4, %v1015_v27, %v654_v30  ;;  %vm1494_vm6 = vcmp.eq.f32.partialorder %v579_v43, 8.507059e+37  ;;  %v582_v37 = vor.u32 1.1754944e-38, %v581_v32 }
 0x148   : > { %v504_v39 = vmul.f32 %v503_v35, %v479_v63  ;;  %v663_v26 = vsel %vm1453_vm15, %v662_v8, %v658_v36  ;;  %v572_v47 = vsub.f32 1.0, %v571_v38  ;;  %v510_v52 = vadd.f32 0.00028619796, %v509_v19 }
 0x149   : > { %v664_v31 = vmul.f32 %v663_v26, %v639_v50  ;;  %v521_v54 = vadd.f32 0.001143296, %v520_v22  ;;  %v1498_v57 = vmin.f32 %v667_v16, 16.0  ;;  %vm576_vm7 = vweird.f32 %v1017_v15 }
 0x14a   : > { %v949_v51 = vclamps-f32 %v504_v39, 1.0  ;;  %v573_v63 = vmul.f32 %v1017_v15, %v572_v47  ;;  %v718_v58 = vadd.f32 1.1283791, %v717_v55  ;;  %v511_v59 = vmul.f32 %v510_v52, %v1468_v40  ;;  %vm577_vm9 = vmor %vm575_vm5, %vm576_vm7 }
 0x14b   : > { %v953_v33 = vclamps-f32 %v664_v31, 1.0  ;;  %v522_v50 = vmul.f32 %v521_v54, %v1468_v40  ;;  %v669_v60 = vmul.f32 2.1237322e-06, %v1498_v57  ;;  %vm735_vm8 = vweird.f32 %v1478_v9 }
 0x14c   : > { %v787_v27 = vadd.f32 1.0, %v949_v51  ;;  %v574_v6 = vadd.f32 %v1017_v15, %v573_v63  ;;  %v680_v0 = vmul.f32 3.8918573e-05, %v1498_v57  ;;  %v1507_v1 = vmul.f32 %v1254_v20, %v1459_v10  ;;  %v1019_v2 = vpop.eup %1018 }
 0x14d   : > { %v791_v62 = vadd.f32 1.0, %v953_v33  ;;  %v512_v4 = vadd.f32 0.0036580483, %v511_v59  ;;  %v523_v5 = vadd.f32 0.014752088, %v522_v50  ;;  %v731_v11 = vmul.f32 %v1019_v2, %v1478_v9 }
 0x14e   : > { %v795_v3 = vmul.f32 %v787_v27, %v1412_v34  ;;  %v670_v29 = vadd.f32 0.00028619796, %v669_v60  ;;  %v578_v49 = vsel %vm577_vm9, %v1017_v15, %v574_v6  ;;  %v739_v12 = vand.u32 2147483647, %v1478_v9 }
 0x14f   : > { %v799_v8 = vmul.f32 %v791_v62, %v1405_v45  ;;  %v583_v18 = vsel %vm1494_vm6, %v582_v37, %v578_v49  ;;  %v513_v34 = vmul.f32 %v512_v4, %v1468_v40  ;;  %v524_v61 = vmul.f32 %v523_v5, %v1468_v40 }
 0x150   : > { %957 = vmatmul.msk.f32.vlgmr.msra.gmra.mxu0 %vm238_vm0, %v795_v3  ;;  %v671_v21 = vmul.f32 %v670_v29, %v1498_v57  ;;  %v584_v23 = vmul.f32 %v583_v18, %v559_v25  ;;  %v732_v45 = vsub.f32 1.0, %v731_v11  ;;  %v681_v44 = vadd.f32 0.001143296, %v680_v0 }
 0x151   : > { %961 = vmatmul.msk.f32.vlgmr.msra.gmra.mxu2 %vm238_vm0, %v799_v8  ;;  %v747_v30 = vmul.f32 %v1507_v1, %v1507_v1  ;;  %vm736_vm10 = vweird.f32 %v1019_v2  ;;  %v741_v43 = vand.u32 2147483648, %v1478_v9  ;;  %v525_v32 = vadd.f32 0.112945676, %v524_v61 }
 0x152   : > { %v428_v15 = vmul.f32 %v1204_v53, %v1427_v46  ;;  %v951_v24 = vclamps-f32 %v584_v23, 1.0  ;;  %v733_v19 = vmul.f32 %v1019_v2, %v732_v45  ;;  %v682_v22 = vmul.f32 %v681_v44, %v1498_v57  ;;  %vm737_vm11 = vmor %vm735_vm8, %vm736_vm10 }
 0x153   : > { %v1528_v16 = vmin.f32 %v747_v30, 16.0  ;;  %v514_v35 = vadd.f32 0.05243302, %v513_v34  ;;  %v526_v25 = vmul.f32 %v525_v32, %v1468_v40  ;;  %v672_v36 = vadd.f32 0.0036580483, %v671_v21 }
 0x154   : > { %v1532_v38 = vadd.f32 %v1224_v28, %v428_v15  ;;  %v789_v55 = vadd.f32 1.0, %v951_v24  ;;  %v734_v39 = vadd.f32 %v1019_v2, %v733_v19  ;;  %v683_v26 = vadd.f32 0.014752088, %v682_v22 }
 0x155   : > { %v749_v31 = vmul.f32 2.1237322e-06, %v1528_v16  ;;  %v719_v53 = vmul.f32 %v718_v58, %v1334_v41  ;;  %v742_v46 = vor.u32 1.1754944e-38, %v741_v43  ;;  %v527_v47 = vadd.f32 0.4994258, %v526_v25 }
 0x156   : > { %v1541_v48 = vmul.f32 %v1254_v20, %v1532_v38  ;;  %v797_v28 = vmul.f32 %v789_v55, %v1419_v14  ;;  %v738_v37 = vsel %vm737_vm11, %v1019_v2, %v734_v39  ;;  %vm740_vm12 = vcmp.eq.f32.partialorder %v739_v12, 8.507059e+37 }
 0x157   : > { %v684_v51 = vmul.f32 %v683_v26, %v1498_v57  ;;  %v743_v52 = vsel %vm740_vm12, %v742_v46, %v738_v37  ;;  %v515_v54 = vmul.f32 %v514_v35, %v1468_v40  ;;  %v528_v41 = vmul.f32 %v527_v47, %v1468_v40 }
 0x158   : > { %v673_v9 = vmul.f32 %v672_v36, %v1498_v57  ;;  %959 = vmatmul.msk.f32.vlgmr.msra.gmra.mxu1 %vm238_vm0, %v797_v28  ;;  %v744_v33 = vmul.f32 %v743_v52, %v719_v53  ;;  %v750_v58 = vadd.f32 0.00028619796, %v749_v31  ;;  %v760_v20 = vmul.f32 3.8918573e-05, %v1528_v16 }
 0x159   : > { %v685_v63 = vadd.f32 0.112945676, %v684_v51  ;;  %v529_v27 = vadd.f32 1.0, %v528_v41  ;;  %v516_v60 = vadd.f32 0.18741608, %v515_v54  ;;  %v450_v6 = vmul.f32 0.5, %v1310_v56 }
 0x15a   : > { %v955_v14 = vclamps-f32 %v744_v33, 1.0  ;;  %v761_v50 = vadd.f32 0.001143296, %v760_v20  ;;  %v674_v62 = vadd.f32 0.05243302, %v673_v9  ;;  %v751_v3 = vmul.f32 %v750_v58, %v1528_v16 }
 0x15b   : > { %v686_v59 = vmul.f32 %v685_v63, %v1498_v57  ;;  %1020 = vrcp.f32 %v529_v27  ;;  %v587_v5 = vmul.f32 %v1541_v48, %v1541_v48  ;;  %v517_v49 = vmul.f32 %v516_v60, %v1468_v40 }
 0x15c   : > { %v793_v0 = vadd.f32 1.0, %v955_v14  ;;  %v762_v4 = vmul.f32 %v761_v50, %v1528_v16  ;;  %v675_v11 = vmul.f32 %v674_v62, %v1498_v57  ;;  %v752_v34 = vadd.f32 0.0036580483, %v751_v3 }
 0x15d   : > { %v687_v2 = vadd.f32 0.4994258, %v686_v59  ;;  %v1559_v18 = vmin.f32 %v587_v5, 16.0  ;;  %v518_v40 = vadd.f32 1.1283791, %v517_v49  ;;  %v541_v22 = vand.u32 2147483648, %v529_v27 }
 0x15e   : > { %v801_v29 = vmul.f32 %v793_v0, %v450_v6  ;;  %v763_v12 = vadd.f32 0.014752088, %v762_v4  ;;  %v676_v30 = vadd.f32 0.18741608, %v675_v11  ;;  %v753_v32 = vmul.f32 %v752_v34, %v1528_v16 }
 0x15f   : > { %v688_v8 = vmul.f32 %v687_v2, %v1498_v57  ;;  %v589_v23 = vmul.f32 2.1237322e-06, %v1559_v18  ;;  %v600_v45 = vmul.f32 3.8918573e-05, %v1559_v18  ;;  %v539_v19 = vand.u32 2147483647, %v529_v27 }
 0x160   : > { %963 = vmatmul.msk.f32.vlgmr.msra.gmra.mxu3 %vm238_vm0, %v801_v29  ;;  %v764_v21 = vmul.f32 %v763_v12, %v1528_v16  ;;  %v677_v39 = vmul.f32 %v676_v30, %v1498_v57  ;;  %vm535_vm14 = vweird.f32 %v529_v27  ;;  %v754_v46 = vadd.f32 0.05243302, %v753_v32 }
 0x161   : > { %v1562_v56 = vadd.f32 1.0, %v688_v8  ;;  %v1021_v61 = vpop.eup %1020  ;;  %v590_v24 = vadd.f32 0.00028619796, %v589_v23  ;;  %v601_v35 = vadd.f32 0.001143296, %v600_v45  ;;  %v519_v28 = vmul.f32 %v518_v40, %v1447_v7 }
 0x162   : > { %v531_v44 = vmul.f32 %v1021_v61, %v529_v27  ;;  %v765_v15 = vadd.f32 0.112945676, %v764_v21  ;;  %vm536_vm13 = vweird.f32 %v1021_v61  ;;  %v542_v37 = vor.u32 1.1754944e-38, %v541_v22 }
 0x163   : > { %1022 = vrcp.f32 %v1562_v56  ;;  %v591_v55 = vmul.f32 %v590_v24, %v1559_v18  ;;  %v602_v26 = vmul.f32 %v601_v35, %v1559_v18  ;;  %vm537_vm15 = vmor %vm535_vm14, %vm536_vm13  ;;  %vm540_vm1 = vcmp.eq.f32.partialorder %v539_v19, 8.507059e+37 }
 0x164   : > { %v532_v43 = vsub.f32 1.0, %v531_v44  ;;  %v766_v36 = vmul.f32 %v765_v15, %v1528_v16  ;;  %v678_v33 = vadd.f32 1.1283791, %v677_v39  ;;  %v701_v27 = vand.u32 2147483648, %v1562_v56 }
 0x165   : > { %v603_v52 = vadd.f32 0.014752088, %v602_v26  ;;  %v592_v9 = vadd.f32 0.0036580483, %v591_v55  ;;  %v755_v7 = vmul.f32 %v754_v46, %v1528_v16  ;;  %v699_v50 = vand.u32 2147483647, %v1562_v56 }
 0x166   : > { %v533_v25 = vmul.f32 %v1021_v61, %v532_v43  ;;  %v767_v47 = vadd.f32 0.4994258, %v766_v36  ;;  %vm695_vm3 = vweird.f32 %v1562_v56  ;;  %v445_v3 = vmul.f32 0.5, %v1424_v13 }
 0x167   : > { %v604_v58 = vmul.f32 %v603_v52, %v1559_v18  ;;  %v593_v6 = vmul.f32 %v592_v9, %v1559_v18  ;;  %v702_v5 = vor.u32 1.1754944e-38, %v701_v27  ;;  %v756_v29 = vadd.f32 0.18741608, %v755_v7 }
 0x168   : > { %v534_v53 = vadd.f32 %v1021_v61, %v533_v25  ;;  %v768_v41 = vmul.f32 %v767_v47, %v1528_v16  ;;  %v679_v8 = vmul.f32 %v678_v33, %v1472_v42  ;;  %vm700_vm5 = vcmp.eq.f32.partialorder %v699_v50, 8.507059e+37 }
 0x169   : > { %v1023_v31 = vpop.eup %1022  ;;  %v605_v60 = vadd.f32 0.112945676, %v604_v58  ;;  %v757_v13 = vmul.f32 %v756_v29, %v1528_v16  ;;  %v449_v42 = vmul.f32 0.5, %v1464_v17  ;;  %v447_v27 = vmul.f32 0.5, %v1532_v38 }
 0x16a   : > { %v691_v51 = vmul.f32 %v1023_v31, %v1562_v56  ;;  %v538_v54 = vsel %vm537_vm15, %v1021_v61, %v534_v53  ;;  %v769_v14 = vadd.f32 1.0, %v768_v41  ;;  %vm696_vm2 = vweird.f32 %v1023_v31 }
 0x16b   : > { %v543_v57 = vsel %vm540_vm1, %v542_v37, %v538_v54  ;;  %v606_v2 = vmul.f32 %v605_v60, %v1559_v18  ;;  %vm697_vm4 = vmor %vm695_vm3, %vm696_vm2  ;;  %v594_v61 = vadd.f32 0.05243302, %v593_v6  ;;  %v758_v15 = vadd.f32 1.1283791, %v757_v13 }
 0x16c   : > { %v692_v63 = vsub.f32 1.0, %v691_v51  ;;  %v544_v20 = vmul.f32 %v543_v57, %v519_v28  ;;  %1024 = vrcp.f32 %v769_v14  ;;  %v781_v24 = vand.u32 2147483648, %v769_v14 }
 0x16d   : > { %v607_v11 = vadd.f32 0.4994258, %v606_v2  ;;  %v595_v40 = vmul.f32 %v594_v61, %v1559_v18  ;;  %v779_v35 = vand.u32 2147483647, %v769_v14  ;;  %vm775_vm7 = vweird.f32 %v769_v14 }
 0x16e   : > { %v693_v59 = vmul.f32 %v1023_v31, %v692_v63  ;;  %v950_v62 = vclamps-f32 %v544_v20, 1.0  ;;  %v782_v36 = vor.u32 1.1754944e-38, %v781_v24  ;;  %v759_v55 = vmul.f32 %v758_v15, %v1507_v1 }
 0x16f   : > { %v608_v23 = vmul.f32 %v607_v11, %v1559_v18  ;;  %v596_v25 = vadd.f32 0.18741608, %v595_v40  ;;  %vm780_vm9 = vcmp.eq.f32.partialorder %v779_v35, 8.507059e+37  ;;  %v451_v37 = vmul.f32 0.5, %v1459_v10 }
 0x170   : > { %v694_v0 = vadd.f32 %v1023_v31, %v693_v59  ;;  %v788_v4 = vadd.f32 1.0, %v950_v62  ;;  %v991_v59 = vld [vmem:[%s1613_s4] ss:$0 sm:$0xff] }
 0x171   : > { %v609_v30 = vadd.f32 1.0, %v608_v23 }
 0x172   : > { %v698_v49 = vsel %vm697_vm4, %v1023_v31, %v694_v0  ;;  %v796_v12 = vmul.f32 %v788_v4, %v445_v3  ;;  %v1025_v56 = vpop.eup %1024  ;;  %v597_v31 = vmul.f32 %v596_v25, %v1559_v18 }
 0x173   : > { %v703_v34 = vsel %vm700_vm5, %v702_v5, %v698_v49  ;;  %v771_v44 = vmul.f32 %v1025_v56, %v769_v14  ;;  %1026 = vrcp.f32 %v609_v30  ;;  %vm776_vm6 = vweird.f32 %v1025_v56 }
 0x174   : > { %v704_v21 = vmul.f32 %v703_v34, %v679_v8  ;;  %958 = vmatmul.msk.f32.gmra.mxu0 %vm238_vm0, %v796_v12  ;;  %vm777_vm8 = vmor %vm775_vm7, %vm776_vm6  ;;  %v598_v51 = vadd.f32 1.1283791, %v597_v31  ;;  %v621_v52 = vand.u32 2147483648, %v609_v30  ;;  %v619_v9 = vand.u32 2147483647, %v609_v30 }
 0x175   : > { %v772_v32 = vsub.f32 1.0, %v771_v44  ;;  %vm615_vm11 = vweird.f32 %v609_v30 }
 0x176   : > { %v954_v45 = vclamps-f32 %v704_v21, 1.0  ;;  %v622_v33 = vor.u32 1.1754944e-38, %v621_v52  ;;  %v599_v18 = vmul.f32 %v598_v51, %v1541_v48  ;;  %vm620_vm13 = vcmp.eq.f32.partialorder %v619_v9, 8.507059e+37 }
 0x177   : > { %v773_v22 = vmul.f32 %v1025_v56, %v772_v32 }
 0x178   : > { %v792_v43 = vadd.f32 1.0, %v954_v45 }
 0x179   : > { %v774_v16 = vadd.f32 %v1025_v56, %v773_v22  ;;  %v1027_v17 = vpop.eup %1026 }
 0x17a   : > { %v800_v19 = vmul.f32 %v792_v43, %v449_v42  ;;  %v611_v46 = vmul.f32 %v1027_v17, %v609_v30  ;;  %vm616_vm10 = vweird.f32 %v1027_v17 }
 0x17b   : > { %v778_v39 = vsel %vm777_vm8, %v1025_v56, %v774_v16  ;;  %vm617_vm12 = vmor %vm615_vm11, %vm616_vm10 }
 0x17c   : > { %962 = vmatmul.msk.f32.gmra.mxu2 %vm238_vm0, %v800_v19  ;;  %v783_v26 = vsel %vm780_vm9, %v782_v36, %v778_v39  ;;  %v612_v28 = vsub.f32 1.0, %v611_v46 }
 0x17d   : > { %v784_v53 = vmul.f32 %v783_v26, %v759_v55 }
 0x17e   : > { %v613_v41 = vmul.f32 %v1027_v17, %v612_v28 }
 0x17f   : > { %v956_v47 = vclamps-f32 %v784_v53, 1.0 }
 0x180   : > { %v614_v1 = vadd.f32 %v1027_v17, %v613_v41 }
 0x181   : > { %v794_v54 = vadd.f32 1.0, %v956_v47 }
 0x182   : > { %v618_v63 = vsel %vm617_vm12, %v1027_v17, %v614_v1 }
 0x183   : > { %v802_v57 = vmul.f32 %v794_v54, %v451_v37  ;;  %v623_v58 = vsel %vm620_vm13, %v622_v33, %v618_v63 }
 0x184   : > { %v624_v10 = vmul.f32 %v623_v58, %v599_v18 }
 0x185   : > { %964 = vmatmul.msk.f32.gmra.mxu3 %vm238_vm0, %v802_v57 }
 0x186   : > { %v952_v20 = vclamps-f32 %v624_v10, 1.0 }
 0x188   : > { %v790_v7 = vadd.f32 1.0, %v952_v20 }
 0x18a   : > { %v798_v14 = vmul.f32 %v790_v7, %v447_v27 }
 0x18c   : > { %960 = vmatmul.msk.f32.gmra.mxu1 %vm238_vm0, %v798_v14 }
 0x1cd   : > { %v852_v48 = vpop.f32.mrf.mxu0 }
 0x1ce   : > { %v853_v50 = vadd.f32 %v991_v59, %v852_v48 }
 0x1d0   : > { %876 = vst [vmem:[%s226_s16] sm:$0xff] %v853_v50 }
 0x1d4   : > { %v864_v60 = vpop.f32.mrf.mxu2 }
 0x1d5   : > { %v865_v62 = vadd.f32 %v991_v59, %v864_v60  ;;  %v858_v6 = vpop.f32.mrf.mxu1 }
 0x1d6   : > { %v859_v38 = vadd.f32 %v991_v59, %v858_v6 }
 0x1d7   : > { %880 = vst [vmem:[%s226_s16 + $0x20] sm:$0xff] %v865_v62 }
 0x1d8   : > { %878 = vst [vmem:[%s226_s16 + $0x10] sm:$0xff] %v859_v38 }
 0x1e3   : > { %v870_v0 = vpop.f32.mrf.mxu3 }
 0x1e4   : > { %v871_v2 = vadd.f32 %v991_v59, %v870_v0 }
 0x1e6   : > { %882 = vst [vmem:[%s226_s16 + $0x30] sm:$0xff] %v871_v2 }
 0x1f1   : > { %v855_v3 = vpop.f32.mrf.mxu0 }
 0x1f2   : > { %v856_v4 = vadd.f32 %v991_v59, %v855_v3 }
 0x1f4   : > { %877 = vst [vmem:[%s226_s16 + $0x8] sm:$0xff] %v856_v4 }
 0x1ff   : > { %v867_v5 = vpop.f32.mrf.mxu2 }
 0x200   : > { %v868_v29 = vadd.f32 %v991_v59, %v867_v5 }
 0x202   : > { %881 = vst [vmem:[%s226_s16 + $0x28] sm:$0xff] %v868_v29 }
 0x208   : > { %v873_v8 = vpop.f32.mrf.mxu3 }
 0x209   : > { %v874_v49 = vadd.f32 %v991_v59, %v873_v8  ;;  %v861_v11 = vpop.f32.mrf.mxu1 }
 0x20a   : > { %v862_v12 = vadd.f32 %v991_v59, %v861_v11 }
 0x20b   : > { %883 = vst [vmem:[%s226_s16 + $0x38] sm:$0xff] %v874_v49 }
 0x20c   : > { %879 = vst [vmem:[%s226_s16 + $0x18] sm:$0xff] %v862_v12 }
 0x20d PF: > { %s15_s18 = sadd.s32 1, %s1034_s18  }
 0x20e   : > { %p12_p4 = scmp.ge.s32.totalorder %s15_s18, 4  }
 0x210   :  { %14 = sbr.rel (!%p12_p4) target bundleno = 1 (0x1), region = 70 }

// kernel: forward.7
= control target key start
LH: loop header
LB: loop body
LE: loop exit
PB: predicated region body
PF: predicated region fallthrough
CT: control target
= control target key end

     0   :  { %s2949_s27 = smov 0   ;;  %s3879_s0 = inlined_call_operand.vmem [shape: f32[8,16,32], index: 0, kind: input, shape index: {}]   ;;  %s3880_s1 = inlined_call_operand.vmem [shape: f32[1,32], index: 1, kind: input, shape index: {}]   ;;  %s3881_s2 = inlined_call_operand.vmem [shape: f32[1,32], index: 2, kind: input, shape index: {}]   ;;  %s3882_s3 = inlined_call_operand.vmem [shape: f32[32,96], index: 3, kind: input, shape index: {}]   ;;  %s3883_s4 = inlined_call_operand.vmem [shape: f32[1,96], index: 4, kind: input, shape index: {}]   ;;  %s3884_s5 = inlined_call_operand.vmem [shape: f32[32,32], index: 5, kind: input, shape index: {}]   ;;  %s3885_s6 = inlined_call_operand.vmem [shape: f32[1,32], index: 6, kind: input, shape index: {}]   ;;  %s3886_s7 = inlined_call_operand.vmem [shape: f32[4,4,16,16], index: 7, kind: input, shape index: {}]   ;;  %s3887_s8 = inlined_call_operand.vmem [shape: f32[8,16,32], index: 8, kind: output, shape index: {}]  }
   0x1 LB: > { %s2489_s28 = sadd.s32 4294967295, %s2887_s27   ;;  %p2493_p0 = scmp.ge.s32.totalorder %s2887_s27, 1  ;;  %s2887_s27 = sphi %s2949_s27, %s18_s27  }
   0x2   : > { %p264_p1 = scmp.lt.s32.totalorder %s2887_s27, 3 }
   0x4   : > { %p265_p2 = pnand %p2493_p0, %p264_p1 }
   0x5   : > { %s2494_s29 = sshll.u32 (!%p265_p2), %s2489_s28, 2  ;;  %s2890_s26 = smov (!%p265_p2), 96  }
   0x6   : > { %268 = sbr.rel (%p265_p2) target bundleno = 2750 (0xabe), region = 52  ;;  %p301_p3 = scmp.lt.s32.totalorder (!%p265_p2), %s2494_s29, 7 }
   0x7   : > { %s2891_s28 = smov (!%p265_p2), 64   ;;  %s2892_s9 = smov (!%p265_p2), 88  }
   0x8   : > { %s2893_s10 = smov (!%p265_p2), 120   ;;  %s2900_s12 = smov (!%p265_p2), 40  }
   0x9   : > { %s2901_s15 = smov (!%p265_p2), 8   ;;  %s2902_s16 = smov (!%p265_p2), 16  }
   0xb   : > { %s3899_s29 = smov (!%p301_p3, %s2494_s29), 7  ;;  %vm324_vm0 = vcmask 261120   ;;  %v2889_v16 = vmov 32.0   ;;  %v533_v63 = vld [vmem:[%s3882_s3 + $0x18] sm:$0xff] }
   0xc   : > { %s2614_s30 = sshll.u32 %s3899_s29, 4  ;;  %2735 = vrcp.f32 %v2889_v16  ;;  %2616 = vmatpush.msra.mxu1 %v533_v63  ;;  %574 = vmatpush.msra.mxu0 %v533_v63 }
   0xd   : > { %s305_s11 = scalar_lea.vmem %s3879_s0, %s2614_s30  ;;  %2617 = vmatpush.msra.mxu2 %v533_v63  ;;  %2618 = vmatpush.msra.mxu3 %v533_v63  ;;  %s3838_s21 = scalar_lea.vmem %s3887_s8, %s2614_s30 }
   0xe   : > { %v320_v0 = vld [vmem:[%s305_s11 + $0x30] sm:$0xff]  ;;  %v317_v1 = vld [vmem:[%s305_s11 + $0x18] sm:$0xff]  ;;  %v318_v6 = vld [vmem:[%s305_s11 + $0x20] sm:$0xff] }
   0xf   : > { %v316_v2 = vld [vmem:[%s305_s11 + $0x10] sm:$0xff]  ;;  %v343_v3 = vsel %vm324_vm0, %v320_v0, 0.0  ;;  %v334_v4 = vsel %vm324_vm0, %v317_v1, 0.0  ;;  %v315_v7 = vld [vmem:[%s305_s11 + $0x8] sm:$0xff]  ;;  %v314_v8 = vld [vmem:[%s305_s11] sm:$0xff]  ;;  %v337_v9 = vsel %vm324_vm0, %v318_v6, 0.0 }
  0x10   : > { %v331_v5 = vsel %vm324_vm0, %v316_v2, 0.0  ;;  %344 = vadd.xlane.f32.xlu2 %v343_v3  ;;  %335 = vadd.xlane.f32.xlu1 %v334_v4  ;;  %v328_v10 = vsel %vm324_vm0, %v315_v7, 0.0  ;;  %v325_v11 = vsel %vm324_vm0, %v314_v8, 0.0  ;;  %v319_v12 = vld [vmem:[%s305_s11 + $0x28] sm:$0xff]  ;;  %v321_v13 = vld [vmem:[%s305_s11 + $0x38] sm:$0xff]  ;;  %s2896_s11 = smov 112  }
  0x11   : > { %332 = vadd.xlane.f32.xlu0 %v331_v5  ;;  %v340_v14 = vsel %vm324_vm0, %v319_v12, 0.0  ;;  %v346_v15 = vsel %vm324_vm0, %v321_v13, 0.0 }
  0x12   : > { %v2736_v17 = vpop.eup %2735 }
  0x13   : > { %v350_v18 = vmul.f32 32.0, %v2736_v17  ;;  %vm354_vm1 = vweird.f32 %v2736_v17 }
  0x15   : > { %v351_v19 = vsub.f32 1.0, %v350_v18 }
  0x17   : > { %v352_v20 = vmul.f32 %v2736_v17, %v351_v19 }
  0x18   : > { %338 = vadd.xlane.f32.xlu2 %v337_v9  ;;  %329 = vadd.xlane.f32.xlu1 %v328_v10 }
  0x19   : > { %326 = vadd.xlane.f32.xlu0 %v325_v11  ;;  %v353_v21 = vadd.f32 %v2736_v17, %v352_v20 }
  0x1b   : > { %v2973_v22 = vsel %vm354_vm1, %v2736_v17, %v353_v21 }
  0x20   : > { %341 = vadd.xlane.f32.xlu1 %v340_v14 }
  0x21   : > { %347 = vadd.xlane.f32.xlu0 %v346_v15 }
  0x83   : > { %v345_v23 = vpop.xlane.xlu2 %344  ;;  %v336_v24 = vpop.xlane.xlu1 %335 }
  0x84   : > { %v359_v25 = vmul.f32 %v2973_v22, %v336_v24  ;;  %v333_v26 = vpop.xlane.xlu0 %332  ;;  %v362_v39 = vmul.f32 %v2973_v22, %v345_v23 }
  0x85   : > { %v358_v27 = vmul.f32 %v2973_v22, %v333_v26 }
  0x86   : > { %v2977_v28 = vsub.f32 %v317_v1, %v359_v25  ;;  %v3001_v46 = vsub.f32 %v320_v0, %v362_v39  ;;  %v532_v0 = vld [vmem:[%s3882_s3 + $0x10] sm:$0xff]  ;;  %v531_v1 = vld [vmem:[%s3882_s3 + $0x8] sm:$0xff] }
  0x87   : > { %v2979_v29 = vsub.f32 %v316_v2, %v358_v27  ;;  %2619 = vmatpush.msra.mxu1 %v532_v0  ;;  %575 = vmatpush.msra.mxu0 %v532_v0  ;;  %v530_v2 = vld [vmem:[%s3882_s3] sm:$0xff] }
  0x88   : > { %v375_v30 = vmul.f32 %v2977_v28, %v2977_v28  ;;  %v378_v55 = vmul.f32 %v3001_v46, %v3001_v46  ;;  %2620 = vmatpush.msra.mxu2 %v532_v0  ;;  %2621 = vmatpush.msra.mxu3 %v532_v0 }
  0x89   : > { %v374_v31 = vmul.f32 %v2979_v29, %v2979_v29  ;;  %2622 = vmatpush.msra.mxu1 %v531_v1  ;;  %576 = vmatpush.msra.mxu0 %v531_v1 }
  0x8a   : > { %v389_v32 = vsel %vm324_vm0, %v375_v30, 0.0  ;;  %v398_v58 = vsel %vm324_vm0, %v378_v55, 0.0  ;;  %2623 = vmatpush.msra.mxu2 %v531_v1  ;;  %2624 = vmatpush.msra.mxu3 %v531_v1 }
  0x8b   : > { %v339_v33 = vpop.xlane.xlu2 %338  ;;  %v386_v34 = vsel %vm324_vm0, %v374_v31, 0.0  ;;  %390 = vadd.xlane.f32.xlu1 %v389_v32  ;;  %v330_v35 = vpop.xlane.xlu1 %329  ;;  %2625 = vmatpush.msra.mxu1 %v530_v2 }
  0x8c   : > { %v360_v36 = vmul.f32 %v2973_v22, %v339_v33  ;;  %387 = vadd.xlane.f32.xlu2 %v386_v34  ;;  %v357_v37 = vmul.f32 %v2973_v22, %v330_v35  ;;  %v327_v38 = vpop.xlane.xlu0 %326  ;;  %577 = vmatpush.msra.mxu0 %v530_v2 }
  0x8d   : > { %v356_v40 = vmul.f32 %v2973_v22, %v327_v38  ;;  %2626 = vmatpush.msra.mxu2 %v530_v2  ;;  %2627 = vmatpush.msra.mxu3 %v530_v2 }
  0x8e   : > { %v2991_v41 = vsub.f32 %v318_v6, %v360_v36  ;;  %v2993_v42 = vsub.f32 %v315_v7, %v357_v37 }
  0x8f   : > { %v2995_v43 = vsub.f32 %v314_v8, %v356_v40 }
  0x90   : > { %v376_v44 = vmul.f32 %v2991_v41, %v2991_v41  ;;  %v373_v45 = vmul.f32 %v2993_v42, %v2993_v42 }
  0x91   : > { %v372_v47 = vmul.f32 %v2995_v43, %v2995_v43 }
  0x92   : > { %v392_v48 = vsel %vm324_vm0, %v376_v44, 0.0  ;;  %v383_v49 = vsel %vm324_vm0, %v373_v45, 0.0 }
  0x93   : > { %393 = vadd.xlane.f32.xlu1 %v392_v48  ;;  %v380_v50 = vsel %vm324_vm0, %v372_v47, 0.0  ;;  %v342_v51 = vpop.xlane.xlu1 %341 }
  0x94   : > { %384 = vadd.xlane.f32.xlu2 %v383_v49  ;;  %381 = vadd.xlane.f32.xlu0 %v380_v50  ;;  %v348_v52 = vpop.xlane.xlu0 %347  ;;  %v361_v54 = vmul.f32 %v2973_v22, %v342_v51  ;;  %v3069_v51 = vld [vmem:[%s3880_s1] ss:$0 sm:$0xff] }
  0x95   : > { %v363_v53 = vmul.f32 %v2973_v22, %v348_v52 }
  0x96   : > { %v3014_v57 = vsub.f32 %v319_v12, %v361_v54 }
  0x97   : > { %v3012_v56 = vsub.f32 %v321_v13, %v363_v53 }
  0x98   : > { %v377_v61 = vmul.f32 %v3014_v57, %v3014_v57 }
  0x99   : > { %v379_v59 = vmul.f32 %v3012_v56, %v3012_v56 }
  0x9a   : > { %v395_v62 = vsel %vm324_vm0, %v377_v61, 0.0  ;;  %v3080_v61 = vld [vmem:[%s3881_s2] ss:$0 sm:$0xff] }
  0x9b   : > { %v401_v60 = vsel %vm324_vm0, %v379_v59, 0.0 }
  0x9c   : > { %399 = vadd.xlane.f32.xlu0 %v398_v58  ;;  %402 = vadd.xlane.f32.xlu2 %v401_v60 }
  0xa4   : > { %396 = vadd.xlane.f32.xlu0 %v395_v62 }
  0xfe   : > { %v391_v3 = vpop.xlane.xlu1 %390 }
  0xff   : > { %v388_v4 = vpop.xlane.xlu2 %387  ;;  %v407_v5 = vmul.f32 %v391_v3, %v2973_v22 }
 0x100   : > { %v406_v6 = vmul.f32 %v388_v4, %v2973_v22 }
 0x101   : > { %v415_v7 = vadd.f32 1e-05, %v407_v5 }
 0x102   : > { %v414_v8 = vadd.f32 1e-05, %v406_v6 }
 0x103   : > { %2737 = vrsqrt.f32 %v415_v7  ;;  %vm456_vm2 = vweird.f32 %v415_v7 }
 0x104   : > { %2739 = vrsqrt.f32 %v414_v8  ;;  %vm446_vm3 = vweird.f32 %v414_v8 }
 0x106   : > { %v394_v9 = vpop.xlane.xlu1 %393 }
 0x107   : > { %v385_v10 = vpop.xlane.xlu2 %384  ;;  %v408_v11 = vmul.f32 %v394_v9, %v2973_v22  ;;  %v382_v12 = vpop.xlane.xlu0 %381 }
 0x108   : > { %v405_v13 = vmul.f32 %v385_v10, %v2973_v22  ;;  %v404_v14 = vmul.f32 %v382_v12, %v2973_v22 }
 0x109   : > { %v3040_v15 = vpop.eup %2737  ;;  %v416_v16 = vadd.f32 1e-05, %v408_v11 }
 0x10a   : > { %v2740_v17 = vpop.eup %2739  ;;  %v451_v18 = vmul.f32 %v3040_v15, %v415_v7  ;;  %v3043_v19 = vadd.f32 1e-05, %v405_v13  ;;  %v3045_v20 = vadd.f32 1e-05, %v404_v14  ;;  %vm457_vm5 = vweird.f32 %v3040_v15 }
 0x10b   : > { %v441_v21 = vmul.f32 %v2740_v17, %v414_v8  ;;  %2741 = vrsqrt.f32 %v416_v16  ;;  %vm447_vm4 = vweird.f32 %v2740_v17  ;;  %vm3072_vm7 = vmor %vm456_vm2, %vm457_vm5  ;;  %vm466_vm8 = vweird.f32 %v416_v16 }
 0x10c   : > { %v452_v23 = vmul.f32 %v3040_v15, %v451_v18  ;;  %2743 = vrsqrt.f32 %v3043_v19  ;;  %vm448_vm6 = vmor %vm446_vm3, %vm447_vm4  ;;  %vm436_vm10 = vweird.f32 %v3043_v19  ;;  %vm426_vm11 = vweird.f32 %v3045_v20 }
 0x10d   : > { %v442_v24 = vmul.f32 %v2740_v17, %v441_v21  ;;  %2745 = vrsqrt.f32 %v3045_v20 }
 0x10e   : > { %v453_v25 = vmul.f32 0.5, %v452_v23 }
 0x10f   : > { %v443_v26 = vmul.f32 0.5, %v442_v24  ;;  %v403_v27 = vpop.xlane.xlu2 %402  ;;  %v400_v30 = vpop.xlane.xlu0 %399 }
 0x110   : > { %v454_v31 = vsub.f32 1.5, %v453_v25  ;;  %v411_v32 = vmul.f32 %v403_v27, %v2973_v22  ;;  %v410_v33 = vmul.f32 %v400_v30, %v2973_v22 }
 0x111   : > { %v2742_v34 = vpop.eup %2741  ;;  %v444_v35 = vsub.f32 1.5, %v443_v26 }
 0x112   : > { %v3052_v36 = vpop.eup %2743  ;;  %v461_v37 = vmul.f32 %v2742_v34, %v416_v16  ;;  %v3054_v38 = vadd.f32 1e-05, %v411_v32  ;;  %v3059_v45 = vadd.f32 1e-05, %v410_v33  ;;  %v455_v47 = vmul.f32 %v3040_v15, %v454_v31 }
 0x113   : > { %v2746_v39 = vpop.eup %2745  ;;  %v445_v40 = vmul.f32 %v2740_v17, %v444_v35  ;;  %v431_v44 = vmul.f32 %v3052_v36, %v3043_v19  ;;  %vm467_vm9 = vweird.f32 %v2742_v34  ;;  %vm437_vm14 = vweird.f32 %v3052_v36 }
 0x114   : > { %v462_v48 = vmul.f32 %v2742_v34, %v461_v37  ;;  %v421_v49 = vmul.f32 %v2746_v39, %v3045_v20  ;;  %2747 = vrsqrt.f32 %v3054_v38  ;;  %v459_v1 = vsel %vm3072_vm7, %v3040_v15, %v455_v47  ;;  %vm3092_vm12 = vmor %vm466_vm8, %vm467_vm9 }
 0x115   : > { %v432_v50 = vmul.f32 %v3052_v36, %v431_v44  ;;  %2749 = vrsqrt.f32 %v3059_v45  ;;  %v449_v54 = vsel %vm448_vm6, %v2740_v17, %v445_v40  ;;  %vm427_vm13 = vweird.f32 %v2746_v39  ;;  %vm3114_vm1 = vmor %vm436_vm10, %vm437_vm14 }
 0x116   : > { %v463_v52 = vmul.f32 0.5, %v462_v48  ;;  %v422_v53 = vmul.f32 %v2746_v39, %v421_v49  ;;  %v502_v60 = vmul.f32 %v449_v54, %v2979_v29  ;;  %v503_v10 = vmul.f32 %v459_v1, %v2977_v28  ;;  %vm428_vm15 = vmor %vm426_vm11, %vm427_vm13 }
 0x117   : > { %v433_v58 = vmul.f32 0.5, %v432_v50  ;;  %v397_v59 = vpop.xlane.xlu0 %396  ;;  %vm486_vm2 = vweird.f32 %v3059_v45  ;;  %vm496_vm4 = vweird.f32 %v3054_v38  ;;  %vm641_vm11 = vcmask 64512  }
 0x118   : > { %v464_v62 = vsub.f32 1.5, %v463_v52  ;;  %v423_v63 = vmul.f32 0.5, %v422_v53  ;;  %v409_v0 = vmul.f32 %v397_v59, %v2973_v22  ;;  %v513_v29 = vmul.f32 %v3069_v51, %v502_v60 }
 0x119   : > { %v434_v2 = vsub.f32 1.5, %v433_v58  ;;  %v514_v23 = vmul.f32 %v3069_v51, %v503_v10  ;;  %vm2341_vm13 = vcmask 195584  }
 0x11a   : > { %v3089_v3 = vpop.eup %2747  ;;  %v465_v4 = vmul.f32 %v2742_v34, %v464_v62  ;;  %v424_v22 = vsub.f32 1.5, %v423_v63  ;;  %v417_v6 = vadd.f32 1e-05, %v409_v0  ;;  %v524_v9 = vadd.f32 %v3080_v61, %v513_v29 }
 0x11b   : > { %v2750_v7 = vpop.eup %2749  ;;  %v491_v8 = vmul.f32 %v3089_v3, %v3054_v38  ;;  %v435_v11 = vmul.f32 %v3052_v36, %v434_v2  ;;  %vm497_vm5 = vweird.f32 %v3089_v3 }
 0x11c   : > { %v425_v12 = vmul.f32 %v2746_v39, %v424_v22  ;;  %v481_v13 = vmul.f32 %v2750_v7, %v3059_v45  ;;  %2751 = vrsqrt.f32 %v417_v6  ;;  %2502 = vmatmul.msk.f32.vlgmr.msra.gmra.mxu1 %vm324_vm0, %v524_v9  ;;  %v469_v15 = vsel %vm3092_vm12, %v2742_v34, %v465_v4  ;;  %vm3138_vm7 = vmor %vm496_vm4, %vm497_vm5 }
 0x11d   : > { %v492_v14 = vmul.f32 %v3089_v3, %v491_v8  ;;  %v504_v28 = vmul.f32 %v469_v15, %v2991_v41  ;;  %vm487_vm3 = vweird.f32 %v2750_v7  ;;  %v439_v41 = vsel %vm3114_vm1, %v3052_v36, %v435_v11 }
 0x11e   : > { %v482_v16 = vmul.f32 %v2750_v7, %v481_v13  ;;  %v429_v17 = vsel %vm428_vm15, %v2746_v39, %v425_v12  ;;  %vm3129_vm6 = vmor %vm486_vm2, %vm487_vm3  ;;  %v525_v34 = vadd.f32 %v3080_v61, %v514_v23  ;;  %v501_v35 = vmul.f32 %v439_v41, %v2993_v42 }
 0x11f   : > { %v493_v20 = vmul.f32 0.5, %v492_v14  ;;  %v500_v21 = vmul.f32 %v429_v17, %v2995_v43  ;;  %v515_v25 = vmul.f32 %v3069_v51, %v504_v28  ;;  %vm476_vm8 = vweird.f32 %v417_v6 }
 0x120   : > { %v483_v24 = vmul.f32 0.5, %v482_v16  ;;  %v512_v42 = vmul.f32 %v3069_v51, %v501_v35  ;;  %vm800_vm12 = vcmask 130048  }
 0x121   : > { %v494_v19 = vsub.f32 1.5, %v493_v20  ;;  %v511_v26 = vmul.f32 %v3069_v51, %v500_v21  ;;  %v526_v43 = vadd.f32 %v3080_v61, %v515_v25 }
 0x122   : > { %v2752_v27 = vpop.eup %2751  ;;  %v484_v30 = vsub.f32 1.5, %v483_v24  ;;  %v523_v52 = vadd.f32 %v3080_v61, %v512_v42 }
 0x123   : > { %v471_v32 = vmul.f32 %v2752_v27, %v417_v6  ;;  %v522_v33 = vadd.f32 %v3080_v61, %v511_v26  ;;  %v495_v36 = vmul.f32 %v3089_v3, %v494_v19  ;;  %2504 = vmatmul.msk.f32.vlgmr.msra.gmra.mxu2 %vm324_vm0, %v526_v43  ;;  %vm477_vm9 = vweird.f32 %v2752_v27 }
 0x124   : > { %v485_v37 = vmul.f32 %v2750_v7, %v484_v30  ;;  %2503 = vmatmul.msk.f32.gmra.mxu1 %vm324_vm0, %v525_v34  ;;  %vm478_vm10 = vmor %vm476_vm8, %vm477_vm9 }
 0x125   : > { %v472_v39 = vmul.f32 %v2752_v27, %v471_v32  ;;  %2500 = vmatmul.msk.f32.vlgmr.msra.gmra.mxu0 %vm324_vm0, %v522_v33  ;;  %v499_v47 = vsel %vm3138_vm7, %v3089_v3, %v495_v36 }
 0x126   : > { %v489_v40 = vsel %vm3129_vm6, %v2750_v7, %v485_v37  ;;  %v507_v54 = vmul.f32 %v499_v47, %v3012_v56  ;;  %v2733_v56 = vld [vmem:[%s3883_s4] ss:$0 sm:$0xff] }
 0x127   : > { %v473_v44 = vmul.f32 0.5, %v472_v39  ;;  %v506_v45 = vmul.f32 %v489_v40, %v3001_v46 }
 0x128   : > { %v518_v58 = vmul.f32 %v3069_v51, %v507_v54 }
 0x129   : > { %v474_v48 = vsub.f32 1.5, %v473_v44  ;;  %v517_v49 = vmul.f32 %v3069_v51, %v506_v45  ;;  %v603_v44 = vld [vmem:[%s3886_s7] sm:$0xff] }
 0x12a   : > { %v529_v62 = vadd.f32 %v3080_v61, %v518_v58 }
 0x12b   : > { %v475_v50 = vmul.f32 %v2752_v27, %v474_v48  ;;  %v528_v53 = vadd.f32 %v3080_v61, %v517_v49  ;;  %v604_v49 = vld [vmem:[%s3886_s7 + $0x8] sm:$0xff] }
 0x12d   : > { %v479_v55 = vsel %vm478_vm10, %v2752_v27, %v475_v50  ;;  %2501 = vmatmul.msk.f32.gmra.mxu0 %vm324_vm0, %v523_v52  ;;  %2506 = vmatmul.msk.f32.vlgmr.msra.gmra.mxu3 %vm324_vm0, %v528_v53 }
 0x12e   : > { %v505_v46 = vmul.f32 %v479_v55, %v3014_v57  ;;  %v611_v55 = vld [vmem:[%s3886_s7 + $0x40] sm:$0xff] }
 0x130   : > { %v516_v59 = vmul.f32 %v3069_v51, %v505_v46 }
 0x132   : > { %v527_v60 = vadd.f32 %v3080_v61, %v516_v59 }
 0x134   : > { %2505 = vmatmul.msk.f32.gmra.mxu2 %vm324_vm0, %v527_v60 }
 0x135   : > { %2507 = vmatmul.msk.f32.gmra.mxu3 %vm324_vm0, %v529_v62  ;;  %v612_v62 = vld [vmem:[%s3886_s7 + $0x48] sm:$0xff] }
 0x199   : > { %v585_v63 = vpop.f32.mrf.mxu1 }
 0x19a   : > { %v3167_v0 = vadd.f32 %v2733_v56, %v585_v63 }
 0x19c   : > { %675 = vrot.lane.b32.xlu0 %v3167_v0, %s2890_s26 }
 0x1a1   : > { %v588_v51 = vpop.f32.mrf.mxu1 }
 0x1a2   : > { %v579_v57 = vpop.f32.mrf.mxu0  ;;  %v3170_v1 = vadd.f32 %v2733_v56, %v588_v51 }
 0x1a3   : > { %v3176_v4 = vadd.f32 %v2733_v56, %v579_v57 }
 0x1a4   : > { %677 = vrot.lane.b32.xlu1 %v3170_v1, %s2890_s26  ;;  %v3190_v9 = vpack.i.bf16 %v3167_v0, %v3170_v1 }
 0x1a6   : > { %v591_v29 = vpop.f32.mrf.mxu2 }
 0x1a7   : > { %v3192_v10 = vadd.f32 %v2733_v56, %v591_v29 }
 0x1aa   : > { %v582_v61 = vpop.f32.mrf.mxu0 }
 0x1ab   : > { %v3173_v2 = vadd.f32 %v2733_v56, %v582_v61  ;;  %v627_v61 = vld [vmem:[%s3886_s7 + $0xc0] sm:$0xff] }
 0x1ad   : > { %639 = vrot.lane.b32.xlu2 %v3173_v2, %s2890_s26  ;;  %v3198_v11 = vpack.i.bf16 %v3176_v4, %v3173_v2 }
 0x1b0   : > { %v597_v3 = vpop.f32.mrf.mxu3 }
 0x1b1   : > { %v3184_v8 = vadd.f32 %v2733_v56, %v597_v3 }
 0x1b5   : > { %637 = vrot.lane.b32.xlu2 %v3176_v4, %s2890_s26 }
 0x1b7   : > { %v594_v5 = vpop.f32.mrf.mxu2 }
 0x1b8   : > { %v3179_v22 = vadd.f32 %v2733_v56, %v594_v5  ;;  %v600_v6 = vpop.f32.mrf.mxu3 }
 0x1b9   : > { %v3181_v7 = vadd.f32 %v2733_v56, %v600_v6 }
 0x1ba   : > { %714 = vrot.lane.b32.xlu0 %v3179_v22, %s2890_s26  ;;  %v3218_v13 = vpack.i.bf16 %v3192_v10, %v3179_v22 }
 0x1bb   : > { %751 = vrot.lane.b32.xlu1 %v3181_v7, %s2890_s26  ;;  %v3209_v12 = vpack.i.bf16 %v3184_v8, %v3181_v7 }
 0x1bd   : > { %749 = vrot.lane.b32.xlu2 %v3184_v8, %s2890_s26 }
 0x1c2   : > { %2657 = vrot.lane.b32.xlu0 %v3190_v9, %s2891_s28 }
 0x1c3   : > { %712 = vrot.lane.b32.xlu1 %v3192_v10, %s2890_s26 }
 0x1c5   : > { %2652 = vrot.lane.b32.xlu2 %v3198_v11, %s2891_s28 }
 0x1ca   : > { %1033 = vrot.lane.b32.xlu0 %v3176_v4, %s2892_s9 }
 0x1cb   : > { %1029 = vrot.lane.b32.xlu1 %v3176_v4, %s2893_s10 }
 0x1cd   : > { %1035 = vrot.lane.b32.xlu2 %v3173_v2, %s2892_s9 }
 0x1d2   : > { %2662 = vrot.lane.b32.xlu0 %v3209_v12, %s2891_s28 }
 0x1d3   : > { %1031 = vrot.lane.b32.xlu1 %v3173_v2, %s2893_s10 }
 0x1d5   : > { %1111 = vrot.lane.b32.xlu2 %v3192_v10, %s2892_s9 }
 0x1da   : > { %2667 = vrot.lane.b32.xlu0 %v3218_v13, %s2891_s28  ;;  %s2894_s28 = smov 80  }
 0x1db   : > { %1107 = vrot.lane.b32.xlu1 %v3192_v10, %s2893_s10 }
 0x1e3   : > { %1074 = vrot.lane.b32.xlu1 %v3170_v1, %s2892_s9 }
 0x1eb   : > { %1113 = vrot.lane.b32.xlu1 %v3179_v22, %s2892_s9 }
 0x207   : > { %v640_v14 = vpop.permute.xlu2 %639 }
 0x208   : > { %2508 = vmatpush.xpose.msk.msrb.mxu1 %vm641_vm11, %v640_v14  ;;  %v628_v14 = vld [vmem:[%s3886_s7 + $0xc8] sm:$0xff] }
 0x20e   : > { %v676_v28 = vpop.permute.xlu0 %675 }
 0x20f   : > { %v638_v15 = vpop.permute.xlu2 %637 }
 0x210   : > { %2509 = vmatpush.xpose.msk.msrb.mxu1 %vm641_vm11, %v638_v15 }
 0x213   : > { %2510 = vmatmul.msk.f32.vlgmr.msrb.gmra.mxu1 %vm641_vm11, %v3176_v4 }
 0x216   : > { %v678_v16 = vpop.permute.xlu1 %677 }
 0x217   : > { %v750_v17 = vpop.permute.xlu2 %749  ;;  %2512 = vmatpush.xpose.msk.msrb.mxu2 %vm641_vm11, %v678_v16 }
 0x21b   : > { %2511 = vmatmul.msk.f32.gmra.mxu1 %vm641_vm11, %v3173_v2  ;;  %2513 = vmatpush.xpose.msk.msrb.mxu2 %vm641_vm11, %v676_v28 }
 0x21e   : > { %2514 = vmatmul.msk.f32.vlgmr.msrb.gmra.mxu2 %vm641_vm11, %v3167_v0 }
 0x21f   : > { %v2653_v18 = vpop.permute.xlu2 %2652 }
 0x220   : > { %v2654_v20 = vunpack.i.l.bf16 %v2653_v18  ;;  %v2655_v21 = vunpack.i.h.bf16 %v2653_v18 }
 0x222   : > { %915 = vmatpush.msra.mxu2 %v2654_v20 }
 0x224   : > { %916 = vmatpush.msra.mxu2 %v2655_v21 }
 0x226   : > { %2515 = vmatmul.msk.f32.gmra.mxu2 %vm641_vm11, %v3170_v1 }
 0x227   : > { %v1036_v27 = vpop.permute.xlu2 %1035 }
 0x22c   : > { %v715_v23 = vpop.permute.xlu0 %714 }
 0x22d   : > { %v752_v24 = vpop.permute.xlu1 %751  ;;  %2516 = vmatpush.xpose.msk.msrb.mxu3 %vm641_vm11, %v715_v23 }
 0x22e   : > { %2520 = vmatpush.xpose.msk.msra.mxu1 %vm641_vm11, %v752_v24 }
 0x232   : > { %2521 = vmatpush.xpose.msk.msra.mxu1 %vm641_vm11, %v750_v17  ;;  %v619_v17 = vld [vmem:[%s3886_s7 + $0x80] sm:$0xff] }
 0x234   : > { %v2658_v25 = vpop.permute.xlu0 %2657 }
 0x235   : > { %v713_v41 = vpop.permute.xlu1 %712  ;;  %2522 = vmatmul.msk.f32.vlgmr.msra.gmra.mxu1 %vm641_vm11, %v3184_v8  ;;  %v2659_v19 = vunpack.i.l.bf16 %v2658_v25  ;;  %v2660_v26 = vunpack.i.h.bf16 %v2658_v25  ;;  %v620_v25 = vld [vmem:[%s3886_s7 + $0x88] sm:$0xff] }
 0x236   : > { %2517 = vmatpush.xpose.msk.msrb.mxu3 %vm641_vm11, %v713_v41 }
 0x239   : > { %2518 = vmatmul.msk.f32.vlgmr.msrb.gmra.mxu3 %vm641_vm11, %v3192_v10 }
 0x23a   : > { %950 = vmatpush.msra.mxu3 %v2659_v19 }
 0x23c   : > { %951 = vmatpush.msra.mxu3 %v2660_v26  ;;  %v1034_v30 = vpop.permute.xlu0 %1033 }
 0x23d   : > { %v3248_v43 = vpop.permute.xlu1 %1029  ;;  %2523 = vmatmul.msk.f32.gmra.mxu1 %vm641_vm11, %v3181_v7 }
 0x23e   : > { %2532 = vmatpush.xpose.msk.msrb.mxu3 %vm641_vm11, %v1036_v27 }
 0x241   : > { %2519 = vmatmul.msk.f32.gmra.mxu3 %vm641_vm11, %v3179_v22 }
 0x242   : > { %2533 = vmatpush.xpose.msk.msrb.mxu3 %vm641_vm11, %v1034_v30 }
 0x244   : > { %v2663_v31 = vpop.permute.xlu0 %2662 }
 0x245   : > { %v3255_v32 = vpop.permute.xlu1 %1031  ;;  %v2664_v33 = vunpack.i.l.bf16 %v2663_v31  ;;  %v2665_v34 = vunpack.i.h.bf16 %v2663_v31 }
 0x247   : > { %1020 = vmatpush.msrb.mxu2 %v2664_v33  ;;  %v3303_v33 = vpop.permute.xlu2 %1111 }
 0x249   : > { %1021 = vmatpush.msrb.mxu2 %v2665_v34 }
 0x24c   : > { %v2668_v35 = vpop.permute.xlu0 %2667 }
 0x24d   : > { %v3257_v36 = vpop.permute.xlu1 %1107  ;;  %v2669_v37 = vunpack.i.l.bf16 %v2668_v35  ;;  %v2670_v38 = vunpack.i.h.bf16 %v2668_v35 }
 0x24f   : > { %985 = vmatpush.msrb.mxu1 %v2669_v37 }
 0x251   : > { %986 = vmatpush.msrb.mxu1 %v2670_v38 }
 0x255   : > { %v1075_v39 = vpop.permute.xlu1 %1074 }
 0x256   : > { %2536 = vmatpush.xpose.msk.msra.mxu1 %vm641_vm11, %v1075_v39 }
 0x290   : > { %v667_v40 = vpop.f32.mrf.mxu1 }
 0x291   : > { %v784_v42 = vmul.f32 0.35355338, %v667_v40 }
 0x293   : > { %v792_v45 = vadd.f32 %v784_v42, %v603_v44 }
 0x295   : > { %v801_v47 = vsel %vm800_vm12, %v792_v45, -inf }
 0x296   : > { %802 = vmax.xlane.f32.xlu0 %v801_v47 }
 0x298   : > { %v670_v48 = vpop.f32.mrf.mxu1 }
 0x299   : > { %v785_v50 = vmul.f32 0.35355338, %v670_v48 }
 0x29b   : > { %v3267_v52 = vadd.f32 %v785_v50, %v604_v49 }
 0x29d   : > { %v804_v53 = vsel %vm800_vm12, %v3267_v52, -inf }
 0x29e   : > { %805 = vmax.xlane.f32.xlu1 %v804_v53  ;;  %v1114_v53 = vpop.permute.xlu1 %1113 }
 0x2a1   : > { %v704_v54 = vpop.f32.mrf.mxu2 }
 0x2a2   : > { %v786_v46 = vmul.f32 0.35355338, %v704_v54 }
 0x2a4   : > { %v794_v58 = vadd.f32 %v786_v46, %v611_v55 }
 0x2a6   : > { %v807_v59 = vsel %vm800_vm12, %v794_v58, -inf }
 0x2a7   : > { %808 = vmax.xlane.f32.xlu2 %v807_v59 }
 0x2a9   : > { %v707_v60 = vpop.f32.mrf.mxu2 }
 0x2aa   : > { %v787_v56 = vmul.f32 0.35355338, %v707_v60 }
 0x2ac   : > { %v3278_v63 = vadd.f32 %v787_v56, %v612_v62 }
 0x2ae   : > { %v810_v57 = vsel %vm800_vm12, %v3278_v63, -inf }
 0x2af   : > { %811 = vmax.xlane.f32.xlu0 %v810_v57 }
 0x2b2   : > { %v778_v51 = vpop.f32.mrf.mxu1 }
 0x2b3   : > { %v790_v29 = vmul.f32 0.35355338, %v778_v51 }
 0x2b5   : > { %v3285_v3 = vadd.f32 %v790_v29, %v627_v61 }
 0x2b7   : > { %v819_v5 = vsel %vm800_vm12, %v3285_v3, -inf }
 0x2b8   : > { %820 = vmax.xlane.f32.xlu2 %v819_v5 }
 0x2ba   : > { %v781_v6 = vpop.f32.mrf.mxu1 }
 0x2bb   : > { %v791_v15 = vmul.f32 0.35355338, %v781_v6 }
 0x2bc   : > { %v741_v16 = vpop.f32.mrf.mxu3 }
 0x2bd   : > { %v788_v28 = vmul.f32 0.35355338, %v741_v16  ;;  %v799_v18 = vadd.f32 %v791_v15, %v628_v14 }
 0x2bf   : > { %v822_v20 = vsel %vm800_vm12, %v799_v18, -inf  ;;  %v796_v21 = vadd.f32 %v788_v28, %v619_v17 }
 0x2c0   : > { %823 = vmax.xlane.f32.xlu0 %v822_v20 }
 0x2c1   : > { %v813_v23 = vsel %vm800_vm12, %v796_v21, -inf }
 0x2c2   : > { %814 = vmax.xlane.f32.xlu1 %v813_v23  ;;  %v2676_v23 = vpack.i.bf16 %v3170_v1, %v3179_v22 }
 0x2c4   : > { %v744_v24 = vpop.f32.mrf.mxu3 }
 0x2c5   : > { %v789_v41 = vmul.f32 0.35355338, %v744_v24 }
 0x2c7   : > { %v797_v19 = vadd.f32 %v789_v41, %v620_v25 }
 0x2c9   : > { %v816_v26 = vsel %vm800_vm12, %v797_v19, -inf }
 0x2ca   : > { %817 = vmax.xlane.f32.xlu2 %v816_v26 }
 0x2e2   : > { %1109 = vrot.lane.b32.xlu2 %v3179_v22, %s2893_s10 }
 0x309   : > { %v803_v27 = vpop.xlane.xlu0 %802 }
 0x30a   : > { %v825_v30 = vsub.f32 %v792_v45, %v803_v27 }
 0x30c   : > { %v833_v31 = vmul.f32 1.442695, %v825_v30 }
 0x30e   : > { %2753 = vpow2.f32 %v833_v31 }
 0x311   : > { %v806_v55 = vpop.xlane.xlu1 %805 }
 0x312   : > { %v826_v46 = vsub.f32 %v3267_v52, %v806_v55 }
 0x314   : > { %v3305_v34 = vpop.eup %2753  ;;  %v835_v59 = vmul.f32 1.442695, %v826_v46 }
 0x315   : > { %v849_v35 = vsel %vm800_vm12, %v3305_v34, 0.0 }
 0x316   : > { %850 = vadd.xlane.f32.xlu1 %v849_v35 }
 0x31a   : > { %v809_v37 = vpop.xlane.xlu2 %808 }
 0x31b   : > { %v827_v38 = vsub.f32 %v794_v58, %v809_v37 }
 0x31d   : > { %v837_v39 = vmul.f32 1.442695, %v827_v38 }
 0x31f   : > { %2755 = vpow2.f32 %v837_v39 }
 0x322   : > { %v812_v42 = vpop.xlane.xlu0 %811 }
 0x323   : > { %v828_v29 = vsub.f32 %v3278_v63, %v812_v42 }
 0x325   : > { %v3309_v40 = vpop.eup %2755  ;;  %v839_v6 = vmul.f32 1.442695, %v828_v29 }
 0x326   : > { %v855_v44 = vsel %vm800_vm12, %v3309_v40, 0.0 }
 0x327   : > { %856 = vadd.xlane.f32.xlu0 %v855_v44 }
 0x32b   : > { %v821_v54 = vpop.xlane.xlu2 %820 }
 0x32c   : > { %v831_v16 = vsub.f32 %v3285_v3, %v821_v54 }
 0x32e   : > { %v845_v17 = vmul.f32 1.442695, %v831_v16 }
 0x32f   : > { %1068 = vrot.lane.b32.xlu1 %v3167_v0, %s2893_s10 }
 0x333   : > { %v824_v45 = vpop.xlane.xlu0 %823 }
 0x334   : > { %v832_v47 = vsub.f32 %v799_v18, %v824_v45  ;;  %v2681_v18 = vpack.i.bf16 %v3167_v0, %v3192_v10 }
 0x335   : > { %v815_v60 = vpop.xlane.xlu1 %814 }
 0x336   : > { %v847_v48 = vmul.f32 1.442695, %v832_v47  ;;  %v829_v56 = vsub.f32 %v796_v21, %v815_v60 }
 0x337   : > { %1152 = vrot.lane.b32.xlu1 %v3181_v7, %s2892_s9 }
 0x338   : > { %2757 = vpow2.f32 %v847_v48  ;;  %v841_v51 = vmul.f32 1.442695, %v829_v56 }
 0x339   : > { %2759 = vpow2.f32 %v835_v59 }
 0x33b   : > { %1072 = vrot.lane.b32.xlu0 %v3167_v0, %s2892_s9 }
 0x33d   : > { %v818_v58 = vpop.xlane.xlu2 %817 }
 0x33e   : > { %v3319_v49 = vpop.eup %2757  ;;  %v830_v62 = vsub.f32 %v797_v19, %v818_v58 }
 0x33f   : > { %v870_v50 = vsel %vm800_vm12, %v3319_v49, 0.0  ;;  %v2760_v61 = vpop.eup %2759 }
 0x340   : > { %871 = vadd.xlane.f32.xlu2 %v870_v50  ;;  %v843_v57 = vmul.f32 1.442695, %v830_v62  ;;  %v852_v52 = vsel %vm800_vm12, %v2760_v61, 0.0 }
 0x342   : > { %2761 = vpow2.f32 %v843_v57 }
 0x343   : > { %2763 = vpow2.f32 %v841_v51 }
 0x344   : > { %2765 = vpow2.f32 %v839_v6 }
 0x345   : > { %2767 = vpow2.f32 %v845_v17 }
 0x348   : > { %v3330_v5 = vpop.eup %2761 }
 0x349   : > { %v2764_v14 = vpop.eup %2763  ;;  %v864_v15 = vsel %vm800_vm12, %v3330_v5, 0.0 }
 0x34a   : > { %v861_v63 = vsel %vm800_vm12, %v2764_v14, 0.0  ;;  %v2766_v28 = vpop.eup %2765 }
 0x34b   : > { %v858_v20 = vsel %vm800_vm12, %v2766_v28, 0.0  ;;  %v2768_v3 = vpop.eup %2767 }
 0x34c   : > { %v867_v21 = vsel %vm800_vm12, %v2768_v3, 0.0 }
 0x358   : > { %1150 = vrot.lane.b32.xlu2 %v3184_v8, %s2892_s9  ;;  %s2895_s9 = smov 56  }
 0x360   : > { %1148 = vrot.lane.b32.xlu2 %v3181_v7, %s2893_s10 }
 0x361   : > { %853 = vadd.xlane.f32.xlu1 %v852_v52 }
 0x365   : > { %865 = vadd.xlane.f32.xlu0 %v864_v15 }
 0x368   : > { %1435 = vrot.lane.b32.xlu2 %v3173_v2, %s2894_s28 }
 0x369   : > { %862 = vadd.xlane.f32.xlu1 %v861_v63 }
 0x370   : > { %2682 = vrot.lane.b32.xlu2 %v2681_v18, %s2895_s9 }
 0x371   : > { %859 = vadd.xlane.f32.xlu1 %v858_v20 }
 0x379   : > { %868 = vadd.xlane.f32.xlu1 %v867_v21  ;;  %1146 = vrot.lane.b32.xlu0 %v3184_v8, %s2893_s10 }
 0x381   : > { %2677 = vrot.lane.b32.xlu0 %v2676_v23, %s2895_s9 }
 0x389   : > { %v851_v24 = vpop.xlane.xlu1 %850  ;;  %1433 = vrot.lane.b32.xlu0 %v3176_v4, %s2894_s28 }
 0x38a   : > { %2769 = vrcp.f32 %v851_v24  ;;  %v605_v24 = vld [vmem:[%s3886_s7 + $0x10] sm:$0xff] }
 0x390   : > { %v2770_v25 = vpop.eup %2769 }
 0x391   : > { %v881_v41 = vmul.f32 %v2770_v25, %v3305_v34  ;;  %1429 = vrot.lane.b32.xlu0 %v3176_v4, %s2896_s11  ;;  %v1110_v34 = vpop.permute.xlu2 %1109 }
 0x392   : > { %1070 = vrot.lane.b32.xlu1 %v3170_v1, %s2893_s10 }
 0x393   : > { %2524 = vmatmul.msk.f32.vlgmr.msra.gmra.mxu2 %vm800_vm12, %v881_v41 }
 0x394   : > { %2540 = vmatpush.xpose.msk.msra.mxu2 %vm641_vm11, %v1114_v53 }
 0x398   : > { %2541 = vmatpush.xpose.msk.msra.mxu2 %vm641_vm11, %v3303_v33 }
 0x39a   : > { %2672 = vrot.lane.b32.xlu1 %v3198_v11, %s2895_s9  ;;  %v857_v19 = vpop.xlane.xlu0 %856 }
 0x39b   : > { %2771 = vrcp.f32 %v857_v19 }
 0x3a1   : > { %v1069_v26 = vpop.permute.xlu1 %1068  ;;  %v2772_v27 = vpop.eup %2771 }
 0x3a2   : > { %1513 = vrot.lane.b32.xlu1 %v3179_v22, %s2894_s28  ;;  %v883_v30 = vmul.f32 %v2772_v27, %v3309_v40 }
 0x3a4   : > { %2526 = vmatmul.msk.f32.vlgmr.msra.gmra.mxu3 %vm800_vm12, %v883_v30  ;;  %v613_v30 = vld [vmem:[%s3886_s7 + $0x50] sm:$0xff] }
 0x3a9   : > { %v1153_v31 = vpop.permute.xlu1 %1152 }
 0x3aa   : > { %2544 = vmatpush.xpose.msk.msra.mxu3 %vm641_vm11, %v1153_v31 }
 0x3ad   : > { %v1073_v35 = vpop.permute.xlu0 %1072 }
 0x3ae   : > { %2537 = vmatpush.xpose.msk.msra.mxu1 %vm641_vm11, %v1073_v35  ;;  %v606_v35 = vld [vmem:[%s3886_s7 + $0x18] sm:$0xff] }
 0x3b3   : > { %v872_v33 = vpop.xlane.xlu2 %871 }
 0x3bb   : > { %v1151_v37 = vpop.permute.xlu2 %1150 }
 0x3bc   : > { %2545 = vmatpush.xpose.msk.msra.mxu3 %vm641_vm11, %v1151_v37 }
 0x3c3   : > { %v1149_v40 = vpop.permute.xlu2 %1148 }
 0x3cb   : > { %v1436_v54 = vpop.permute.xlu2 %1435 }
 0x3d3   : > { %v2683_v56 = vpop.permute.xlu2 %2682 }
 0x3d4   : > { %v854_v38 = vpop.xlane.xlu1 %853  ;;  %v2684_v52 = vunpack.i.l.bf16 %v2683_v56 }
 0x3d5   : > { %2773 = vrcp.f32 %v854_v38 }
 0x3d8   : > { %v866_v45 = vpop.xlane.xlu0 %865 }
 0x3db   : > { %v2774_v39 = vpop.eup %2773 }
 0x3dc   : > { %v863_v44 = vpop.xlane.xlu1 %862  ;;  %v882_v42 = vmul.f32 %v2774_v39, %v2760_v61  ;;  %v614_v39 = vld [vmem:[%s3886_s7 + $0x58] sm:$0xff] }
 0x3dd   : > { %2775 = vrcp.f32 %v863_v44 }
 0x3de   : > { %2525 = vmatmul.msk.f32.gmra.mxu2 %vm800_vm12, %v882_v42  ;;  %2777 = vrcp.f32 %v866_v45 }
 0x3e3   : > { %v2776_v47 = vpop.eup %2775 }
 0x3e4   : > { %v885_v48 = vmul.f32 %v2776_v47, %v2764_v14  ;;  %v860_v50 = vpop.xlane.xlu1 %859  ;;  %v2778_v53 = vpop.eup %2777 }
 0x3e5   : > { %2779 = vrcp.f32 %v860_v50  ;;  %v886_v60 = vmul.f32 %v2778_v53, %v3330_v5  ;;  %v2685_v5 = vunpack.i.h.bf16 %v2683_v56  ;;  %v621_v53 = vld [vmem:[%s3886_s7 + $0x90] sm:$0xff] }
 0x3e6   : > { %2528 = vmatmul.msk.f32.vlgmr.msrb.gmra.mxu1 %vm800_vm12, %v885_v48 }
 0x3eb   : > { %v2780_v55 = vpop.eup %2779  ;;  %v1147_v58 = vpop.permute.xlu0 %1146 }
 0x3ec   : > { %v869_v46 = vpop.xlane.xlu1 %868  ;;  %v884_v59 = vmul.f32 %v2780_v55, %v2766_v28 }
 0x3ed   : > { %2781 = vrcp.f32 %v869_v46 }
 0x3ee   : > { %2527 = vmatmul.msk.f32.gmra.mxu3 %vm800_vm12, %v884_v59  ;;  %2529 = vmatmul.msk.f32.gmra.mxu1 %vm800_vm12, %v886_v60  ;;  %2783 = vrcp.f32 %v872_v33 }
 0x3f3   : > { %v2782_v62 = vpop.eup %2781  ;;  %v2678_v51 = vpop.permute.xlu0 %2677 }
 0x3f4   : > { %v887_v57 = vmul.f32 %v2782_v62, %v2768_v3  ;;  %v2680_v61 = vunpack.i.h.bf16 %v2678_v51  ;;  %v2679_v29 = vunpack.i.l.bf16 %v2678_v51  ;;  %v2784_v6 = vpop.eup %2783  ;;  %v622_v62 = vld [vmem:[%s3886_s7 + $0x98] sm:$0xff] }
 0x3f5   : > { %v888_v14 = vmul.f32 %v2784_v6, %v3319_v49  ;;  %v630_v6 = vld [vmem:[%s3886_s7 + $0xd8] sm:$0xff] }
 0x3f6   : > { %2530 = vmatmul.msk.f32.vlgmr.msrb.gmra.mxu2 %vm800_vm12, %v887_v57  ;;  %2534 = vmatmul.msk.f32.vlgmr.msrb.gmra.mxu3 %vm641_vm11, %v3248_v43 }
 0x3f7   : > { %2538 = vmatmul.msk.f32.vlgmr.msra.gmra.mxu1 %vm641_vm11, %v1069_v26  ;;  %1385 = vmatpush.msrb.mxu2 %v2679_v29 }
 0x3f8   : > { %1350 = vmatpush.msrb.mxu1 %v2680_v61  ;;  %v629_v61 = vld [vmem:[%s3886_s7 + $0xd0] sm:$0xff] }
 0x3f9   : > { %1386 = vmatpush.msrb.mxu2 %v2684_v52 }
 0x3fa   : > { %1351 = vmatpush.msrb.mxu1 %v2685_v5 }
 0x3fb   : > { %v1434_v63 = vpop.permute.xlu0 %1433 }
 0x3fe   : > { %2531 = vmatmul.msk.f32.gmra.mxu2 %vm800_vm12, %v888_v14  ;;  %2535 = vmatmul.msk.f32.gmra.mxu3 %vm641_vm11, %v3255_v32 }
 0x404   : > { %v1071_v15 = vpop.permute.xlu1 %1070 }
 0x405   : > { %2539 = vmatmul.msk.f32.gmra.mxu1 %vm641_vm11, %v1071_v15 }
 0x406   : > { %2542 = vmatmul.msk.f32.vlgmr.msra.gmra.mxu2 %vm641_vm11, %v3257_v36  ;;  %2546 = vmatmul.msk.f32.vlgmr.msra.gmra.mxu3 %vm641_vm11, %v1147_v58 }
 0x40c   : > { %v2673_v43 = vpop.permute.xlu1 %2672 }
 0x40d   : > { %v2674_v16 = vunpack.i.l.bf16 %v2673_v43  ;;  %v2675_v49 = vunpack.i.h.bf16 %v2673_v43 }
 0x40e   : > { %2543 = vmatmul.msk.f32.gmra.mxu2 %vm641_vm11, %v1110_v34  ;;  %2547 = vmatmul.msk.f32.gmra.mxu3 %vm641_vm11, %v1149_v40 }
 0x40f   : > { %1315 = vmatpush.msrb.mxu0 %v2674_v16  ;;  %v3447_v16 = vpop.permute.xlu0 %1429 }
 0x411   : > { %1316 = vmatpush.msrb.mxu0 %v2675_v49 }
 0x413   : > { %2556 = vmatpush.xpose.msk.msra.mxu0 %vm641_vm11, %v1436_v54 }
 0x414   : > { %v1514_v32 = vpop.permute.xlu1 %1513 }
 0x415   : > { %2564 = vmatpush.xpose.msk.msra.mxu2 %vm641_vm11, %v1514_v32 }
 0x416   : > { %v3392_v17 = vpop.f32.mrf.mxu2 }
 0x417   : > { %2557 = vmatpush.xpose.msk.msra.mxu0 %vm641_vm11, %v1434_v63 }
 0x427   : > { %v3394_v28 = vpop.f32.mrf.mxu3 }
 0x461   : > { %v3398_v20 = vpop.f32.mrf.mxu2 }
 0x463   : > { %v3390_v36 = vpop.f32.mrf.mxu1 }
 0x46b   : > { %v3396_v18 = vpop.f32.mrf.mxu1 }
 0x471   : > { %v3400_v3 = vpop.f32.mrf.mxu3 }
 0x474   : > { %v1101_v25 = vpop.f32.mrf.mxu1 }
 0x475   : > { %v1187_v26 = vmul.f32 0.35355338, %v1101_v25 }
 0x477   : > { %v1195_v38 = vadd.f32 %v1187_v26, %v613_v30 }
 0x479   : > { %v3402_v21 = vpop.f32.mrf.mxu2  ;;  %v1062_v23 = vpop.f32.mrf.mxu3  ;;  %v1207_v45 = vsel %vm800_vm12, %v1195_v38, -inf }
 0x47a   : > { %v1185_v41 = vmul.f32 0.35355338, %v1062_v23 }
 0x47c   : > { %v1193_v19 = vadd.f32 %v1185_v41, %v605_v24 }
 0x47e   : > { %v1201_v27 = vsel %vm800_vm12, %v1193_v19, -inf }
 0x47f   : > { %1202 = vmax.xlane.f32.xlu1 %v1201_v27 }
 0x481   : > { %v3411_v31 = vpop.f32.mrf.mxu2  ;;  %v1065_v34 = vpop.f32.mrf.mxu3 }
 0x482   : > { %v1186_v33 = vmul.f32 0.35355338, %v1065_v34  ;;  %v1104_v37 = vpop.f32.mrf.mxu1 }
 0x483   : > { %v1188_v44 = vmul.f32 0.35355338, %v1104_v37 }
 0x484   : > { %v1194_v42 = vadd.f32 %v1186_v33, %v606_v35 }
 0x485   : > { %v1196_v40 = vadd.f32 %v1188_v44, %v614_v39 }
 0x486   : > { %v1204_v47 = vsel %vm800_vm12, %v1194_v42, -inf }
 0x487   : > { %1208 = vmax.xlane.f32.xlu1 %v1207_v45  ;;  %1205 = vmax.xlane.f32.xlu0 %v1204_v47  ;;  %v1210_v48 = vsel %vm800_vm12, %v1196_v40, -inf }
 0x488   : > { %1211 = vmax.xlane.f32.xlu2 %v1210_v48 }
 0x489   : > { %v1140_v50 = vpop.f32.mrf.mxu2  ;;  %v1179_v58 = vpop.f32.mrf.mxu3 }
 0x48a   : > { %v1189_v54 = vmul.f32 0.35355338, %v1140_v50  ;;  %v1191_v57 = vmul.f32 0.35355338, %v1179_v58 }
 0x48c   : > { %v1197_v55 = vadd.f32 %v1189_v54, %v621_v53  ;;  %v1199_v5 = vadd.f32 %v1191_v57, %v629_v61 }
 0x48e   : > { %v1213_v46 = vsel %vm800_vm12, %v1197_v55, -inf  ;;  %v1219_v15 = vsel %vm800_vm12, %v1199_v5, -inf }
 0x490   : > { %1214 = vmax.xlane.f32.xlu2 %v1213_v46 }
 0x491   : > { %v1143_v59 = vpop.f32.mrf.mxu2  ;;  %v1182_v51 = vpop.f32.mrf.mxu3 }
 0x492   : > { %v1190_v60 = vmul.f32 0.35355338, %v1143_v59  ;;  %v1192_v29 = vmul.f32 0.35355338, %v1182_v51 }
 0x494   : > { %v1198_v56 = vadd.f32 %v1190_v60, %v622_v62  ;;  %v3442_v14 = vadd.f32 %v1192_v29, %v630_v6 }
 0x496   : > { %v1216_v52 = vsel %vm800_vm12, %v1198_v56, -inf  ;;  %v1222_v43 = vsel %vm800_vm12, %v3442_v14, -inf }
 0x49b   : > { %2687 = vrot.lane.b32.xlu0 %v3209_v12, %s2895_s9  ;;  %s2897_s9 = smov 72  }
 0x4a0   : > { %1474 = vrot.lane.b32.xlu1 %v3170_v1, %s2894_s28 }
 0x4a8   : > { %1431 = vrot.lane.b32.xlu2 %v3173_v2, %s2896_s11 }
 0x4c5   : > { %1217 = vmax.xlane.f32.xlu0 %v1216_v52 }
 0x4ca   : > { %1220 = vmax.xlane.f32.xlu1 %v1219_v15 }
 0x4cd   : > { %1223 = vmax.xlane.f32.xlu0 %v1222_v43 }
 0x4f2   : > { %v1203_v49 = vpop.xlane.xlu1 %1202 }
 0x4f3   : > { %v1225_v32 = vsub.f32 %v1193_v19, %v1203_v49 }
 0x4f5   : > { %v1233_v63 = vmul.f32 1.442695, %v1225_v32 }
 0x4f7   : > { %2785 = vpow2.f32 %v1233_v63 }
 0x4fa   : > { %v1209_v23 = vpop.xlane.xlu1 %1208  ;;  %v1206_v24 = vpop.xlane.xlu0 %1205 }
 0x4fb   : > { %v1227_v25 = vsub.f32 %v1195_v38, %v1209_v23  ;;  %v1212_v41 = vpop.xlane.xlu2 %1211  ;;  %v1226_v34 = vsub.f32 %v1194_v42, %v1206_v24 }
 0x4fc   : > { %v1228_v26 = vsub.f32 %v1196_v40, %v1212_v41 }
 0x4fd   : > { %v3449_v27 = vpop.eup %2785  ;;  %v1237_v30 = vmul.f32 1.442695, %v1227_v25  ;;  %v1235_v37 = vmul.f32 1.442695, %v1226_v34 }
 0x4fe   : > { %v1239_v35 = vmul.f32 1.442695, %v1228_v26  ;;  %v1249_v33 = vsel %vm800_vm12, %v3449_v27, 0.0 }
 0x4ff   : > { %2787 = vpow2.f32 %v1237_v30  ;;  %1250 = vadd.xlane.f32.xlu2 %v1249_v33 }
 0x500   : > { %2789 = vpow2.f32 %v1239_v35 }
 0x501   : > { %2791 = vpow2.f32 %v1235_v37 }
 0x503   : > { %v1215_v19 = vpop.xlane.xlu2 %1214 }
 0x504   : > { %v1229_v39 = vsub.f32 %v1197_v55, %v1215_v19 }
 0x505   : > { %v3453_v44 = vpop.eup %2787 }
 0x506   : > { %v1241_v38 = vmul.f32 1.442695, %v1229_v39  ;;  %v1255_v40 = vsel %vm800_vm12, %v3453_v44, 0.0  ;;  %v3457_v45 = vpop.eup %2789 }
 0x507   : > { %1256 = vadd.xlane.f32.xlu0 %v1255_v40  ;;  %v1258_v42 = vsel %vm800_vm12, %v3457_v45, 0.0  ;;  %v3461_v47 = vpop.eup %2791 }
 0x508   : > { %2793 = vpow2.f32 %v1241_v38  ;;  %1259 = vadd.xlane.f32.xlu2 %v1258_v42  ;;  %v1252_v54 = vsel %vm800_vm12, %v3461_v47, 0.0 }
 0x50d   : > { %v2688_v48 = vpop.permute.xlu0 %2687 }
 0x50e   : > { %v3463_v50 = vpop.eup %2793  ;;  %v2689_v53 = vunpack.i.l.bf16 %v2688_v48  ;;  %v2690_v46 = vunpack.i.h.bf16 %v2688_v48 }
 0x50f   : > { %1253 = vadd.xlane.f32.xlu0 %v1252_v54  ;;  %v1261_v55 = vsel %vm800_vm12, %v3463_v50, 0.0 }
 0x510   : > { %1420 = vmatpush.msrb.mxu3 %v2689_v53  ;;  %1262 = vadd.xlane.f32.xlu2 %v1261_v55 }
 0x512   : > { %v1475_v58 = vpop.permute.xlu1 %1474  ;;  %1421 = vmatpush.msrb.mxu3 %v2690_v46 }
 0x513   : > { %2560 = vmatpush.xpose.msk.msra.mxu1 %vm641_vm11, %v1475_v58 }
 0x528   : > { %1472 = vrot.lane.b32.xlu2 %v3167_v0, %s2894_s28 }
 0x530   : > { %1468 = vrot.lane.b32.xlu2 %v3167_v0, %s2896_s11 }
 0x538   : > { %v1218_v59 = vpop.xlane.xlu0 %1217  ;;  %1552 = vrot.lane.b32.xlu2 %v3181_v7, %s2894_s28 }
 0x539   : > { %v1230_v60 = vsub.f32 %v1198_v56, %v1218_v59 }
 0x53b   : > { %v1243_v62 = vmul.f32 1.442695, %v1230_v60 }
 0x53d   : > { %2795 = vpow2.f32 %v1243_v62  ;;  %v1221_v57 = vpop.xlane.xlu1 %1220 }
 0x53e   : > { %v1231_v51 = vsub.f32 %v1199_v5, %v1221_v57  ;;  %v1432_v5 = vpop.permute.xlu2 %1431 }
 0x540   : > { %v1245_v61 = vmul.f32 1.442695, %v1231_v51  ;;  %1550 = vrot.lane.b32.xlu2 %v3184_v8, %s2894_s28  ;;  %v1224_v15 = vpop.xlane.xlu0 %1223 }
 0x541   : > { %v1232_v49 = vsub.f32 %v3442_v14, %v1224_v15 }
 0x542   : > { %2797 = vpow2.f32 %v1245_v61 }
 0x543   : > { %v3478_v29 = vpop.eup %2795  ;;  %v1247_v63 = vmul.f32 1.442695, %v1232_v49 }
 0x544   : > { %v1264_v52 = vsel %vm800_vm12, %v3478_v29, 0.0 }
 0x545   : > { %1265 = vadd.xlane.f32.xlu1 %v1264_v52 }
 0x548   : > { %v3482_v6 = vpop.eup %2797  ;;  %1548 = vrot.lane.b32.xlu2 %v3181_v7, %s2896_s11 }
 0x549   : > { %v1267_v56 = vsel %vm800_vm12, %v3482_v6, 0.0 }
 0x54a   : > { %1268 = vadd.xlane.f32.xlu0 %v1267_v56 }
 0x550   : > { %1833 = vrot.lane.b32.xlu2 %v3176_v4, %s2897_s9 }
 0x55e   : > { %1511 = vrot.lane.b32.xlu1 %v3192_v10, %s2894_s28  ;;  %1507 = vrot.lane.b32.xlu0 %v3192_v10, %s2896_s11  ;;  %s2898_s28 = smov 48  }
 0x566   : > { %1509 = vrot.lane.b32.xlu0 %v3179_v22, %s2896_s11 }
 0x56e   : > { %1470 = vrot.lane.b32.xlu0 %v3170_v1, %s2896_s11 }
 0x572   : > { %v1251_v43 = vpop.xlane.xlu2 %1250 }
 0x573   : > { %2799 = vrcp.f32 %v1251_v43 }
 0x576   : > { %1546 = vrot.lane.b32.xlu0 %v3184_v8, %s2896_s11  ;;  %s2899_s11 = smov 104  }
 0x579   : > { %v2800_v32 = vpop.eup %2799 }
 0x57a   : > { %v1257_v23 = vpop.xlane.xlu0 %1256  ;;  %v1281_v24 = vmul.f32 %v2800_v32, %v3449_v27  ;;  %v607_v32 = vld [vmem:[%s3886_s7 + $0x20] sm:$0xff] }
 0x57b   : > { %2801 = vrcp.f32 %v1257_v23  ;;  %v1260_v25 = vpop.xlane.xlu2 %1259 }
 0x57c   : > { %2548 = vmatmul.msk.f32.vlgmr.msrb.gmra.mxu0 %vm800_vm12, %v1281_v24  ;;  %2803 = vpow2.f32 %v1247_v63  ;;  %v615_v24 = vld [vmem:[%s3886_s7 + $0x60] sm:$0xff] }
 0x57d   : > { %2805 = vrcp.f32 %v1260_v25 }
 0x57e   : > { %2692 = vrot.lane.b32.xlu0 %v3198_v11, %s2898_s28 }
 0x581   : > { %v2802_v41 = vpop.eup %2801 }
 0x582   : > { %v1283_v14 = vmul.f32 %v2802_v41, %v3453_v44  ;;  %v1254_v26 = vpop.xlane.xlu0 %1253  ;;  %v3506_v30 = vpop.eup %2803 }
 0x583   : > { %2807 = vrcp.f32 %v1254_v26  ;;  %v1263_v34 = vpop.xlane.xlu2 %1262  ;;  %v2806_v27 = vpop.eup %2805  ;;  %v1270_v35 = vsel %vm800_vm12, %v3506_v30, 0.0 }
 0x584   : > { %2550 = vmatmul.msk.f32.vlgmr.msrb.gmra.mxu1 %vm800_vm12, %v1283_v14  ;;  %2809 = vrcp.f32 %v1263_v34  ;;  %v1284_v19 = vmul.f32 %v2806_v27, %v3457_v45 }
 0x586   : > { %2697 = vrot.lane.b32.xlu0 %v3190_v9, %s2898_s28 }
 0x588   : > { %1271 = vadd.xlane.f32.xlu1 %v1270_v35 }
 0x589   : > { %v2808_v33 = vpop.eup %2807 }
 0x58a   : > { %v1282_v37 = vmul.f32 %v2808_v33, %v3461_v47  ;;  %v2810_v39 = vpop.eup %2809  ;;  %v608_v33 = vld [vmem:[%s3886_s7 + $0x28] sm:$0xff] }
 0x58b   : > { %v1285_v44 = vmul.f32 %v2810_v39, %v3463_v50  ;;  %v1473_v38 = vpop.permute.xlu2 %1472 }
 0x58c   : > { %2549 = vmatmul.msk.f32.gmra.mxu0 %vm800_vm12, %v1282_v37  ;;  %2551 = vmatmul.msk.f32.gmra.mxu1 %vm800_vm12, %v1284_v19 }
 0x58d   : > { %2561 = vmatpush.xpose.msk.msra.mxu1 %vm641_vm11, %v1473_v38  ;;  %2552 = vmatmul.msk.f32.vlgmr.msrb.gmra.mxu2 %vm800_vm12, %v1285_v44 }
 0x593   : > { %v1469_v40 = vpop.permute.xlu2 %1468 }
 0x594   : > { %2558 = vmatmul.msk.f32.vlgmr.msra.gmra.mxu0 %vm641_vm11, %v3447_v16  ;;  %2562 = vmatmul.msk.f32.vlgmr.msra.gmra.mxu1 %vm641_vm11, %v1469_v40 }
 0x59b   : > { %v1553_v42 = vpop.permute.xlu2 %1552 }
 0x59c   : > { %2559 = vmatmul.msk.f32.gmra.mxu0 %vm641_vm11, %v1432_v5  ;;  %2568 = vmatpush.xpose.msk.msra.mxu3 %vm641_vm11, %v1553_v42 }
 0x5a1   : > { %1835 = vrot.lane.b32.xlu1 %v3173_v2, %s2897_s9 }
 0x5a3   : > { %v1551_v45 = vpop.permute.xlu2 %1550 }
 0x5a4   : > { %2569 = vmatpush.xpose.msk.msra.mxu3 %vm641_vm11, %v1551_v45 }
 0x5a9   : > { %1829 = vrot.lane.b32.xlu1 %v3176_v4, %s2899_s11 }
 0x5ab   : > { %v1549_v43 = vpop.permute.xlu2 %1548 }
 0x5b1   : > { %2702 = vrot.lane.b32.xlu1 %v3218_v13, %s2898_s28 }
 0x5b3   : > { %v1834_v34 = vpop.permute.xlu2 %1833 }
 0x5b8   : > { %v1266_v16 = vpop.xlane.xlu1 %1265 }
 0x5b9   : > { %2811 = vrcp.f32 %v1266_v16  ;;  %1831 = vrot.lane.b32.xlu1 %v3173_v2, %s2899_s11 }
 0x5bd   : > { %v1269_v47 = vpop.xlane.xlu0 %1268 }
 0x5be   : > { %2813 = vrcp.f32 %v1269_v47 }
 0x5bf   : > { %v2812_v48 = vpop.eup %2811 }
 0x5c0   : > { %v1286_v50 = vmul.f32 %v2812_v48, %v3478_v29 }
 0x5c1   : > { %1874 = vrot.lane.b32.xlu1 %v3170_v1, %s2897_s9 }
 0x5c2   : > { %2553 = vmatmul.msk.f32.gmra.mxu2 %vm800_vm12, %v1286_v50 }
 0x5c4   : > { %v2814_v53 = vpop.eup %2813 }
 0x5c5   : > { %v1287_v4 = vmul.f32 %v2814_v53, %v3482_v6 }
 0x5c7   : > { %2554 = vmatmul.msk.f32.vlgmr.msrb.gmra.mxu3 %vm800_vm12, %v1287_v4  ;;  %v616_v4 = vld [vmem:[%s3886_s7 + $0x68] sm:$0xff] }
 0x5c9   : > { %1872 = vrot.lane.b32.xlu1 %v3167_v0, %s2897_s9 }
 0x5d0   : > { %v1512_v54 = vpop.permute.xlu1 %1511  ;;  %v1508_v2 = vpop.permute.xlu0 %1507 }
 0x5d1   : > { %2565 = vmatpush.xpose.msk.msra.mxu2 %vm641_vm11, %v1512_v54  ;;  %1868 = vrot.lane.b32.xlu1 %v3167_v0, %s2899_s11 }
 0x5d4   : > { %2566 = vmatmul.msk.f32.vlgmr.msra.gmra.mxu2 %vm641_vm11, %v1508_v2 }
 0x5d8   : > { %v1510_v55 = vpop.permute.xlu0 %1509 }
 0x5dc   : > { %2567 = vmatmul.msk.f32.gmra.mxu2 %vm641_vm11, %v1510_v55 }
 0x5e0   : > { %v1471_v46 = vpop.permute.xlu0 %1470 }
 0x5e1   : > { %2563 = vmatmul.msk.f32.gmra.mxu1 %vm641_vm11, %v1471_v46 }
 0x5e8   : > { %v1547_v58 = vpop.permute.xlu0 %1546 }
 0x5f0   : > { %v2693_v59 = vpop.permute.xlu0 %2692 }
 0x5f1   : > { %v2694_v60 = vunpack.i.l.bf16 %v2693_v59  ;;  %v2695_v62 = vunpack.i.h.bf16 %v2693_v59  ;;  %v623_v59 = vld [vmem:[%s3886_s7 + $0xa0] sm:$0xff] }
 0x5f3   : > { %1715 = vmatpush.msrb.mxu0 %v2694_v60 }
 0x5f5   : > { %1716 = vmatpush.msrb.mxu0 %v2695_v62 }
 0x5f8   : > { %v2698_v57 = vpop.permute.xlu0 %2697 }
 0x5f9   : > { %v2699_v51 = vunpack.i.l.bf16 %v2698_v57  ;;  %v2700_v61 = vunpack.i.h.bf16 %v2698_v57  ;;  %v3548_v0 = vpop.f32.mrf.mxu0 }
 0x5fb   : > { %v1272_v29 = vpop.xlane.xlu1 %1271  ;;  %1750 = vmatpush.msrb.mxu1 %v2699_v51 }
 0x5fc   : > { %2815 = vrcp.f32 %v1272_v29 }
 0x5fd   : > { %1751 = vmatpush.msrb.mxu1 %v2700_v61 }
 0x601   : > { %v3550_v52 = vpop.f32.mrf.mxu1 }
 0x602   : > { %v2816_v6 = vpop.eup %2815 }
 0x603   : > { %v1288_v56 = vmul.f32 %v2816_v6, %v3506_v30 }
 0x605   : > { %2555 = vmatmul.msk.f32.gmra.mxu3 %vm800_vm12, %v1288_v56 }
 0x609   : > { %v3554_v5 = vpop.f32.mrf.mxu0  ;;  %v3556_v15 = vpop.f32.mrf.mxu1 }
 0x60d   : > { %2570 = vmatmul.msk.f32.vlgmr.msra.gmra.mxu3 %vm641_vm11, %v1547_v58 }
 0x610   : > { %v3585_v48 = vpop.f32.mrf.mxu2 }
 0x611   : > { %v1462_v49 = vpop.f32.mrf.mxu0  ;;  %v1501_v23 = vpop.f32.mrf.mxu1 }
 0x612   : > { %v1585_v63 = vmul.f32 0.35355338, %v1462_v49  ;;  %v1587_v25 = vmul.f32 0.35355338, %v1501_v23 }
 0x613   : > { %v1836_v41 = vpop.permute.xlu1 %1835 }
 0x614   : > { %2580 = vmatpush.xpose.msk.msra.mxu0 %vm641_vm11, %v1836_v41  ;;  %v1593_v14 = vadd.f32 %v1585_v63, %v607_v32  ;;  %v1595_v26 = vadd.f32 %v1587_v25, %v615_v24  ;;  %v631_v32 = vld [vmem:[%s3886_s7 + $0xe0] sm:$0xff] }
 0x615   : > { %2571 = vmatmul.msk.f32.gmra.mxu3 %vm641_vm11, %v1549_v43 }
 0x616   : > { %v1601_v30 = vsel %vm800_vm12, %v1593_v14, -inf  ;;  %v1607_v27 = vsel %vm800_vm12, %v1595_v26, -inf }
 0x617   : > { %1602 = vmax.xlane.f32.xlu0 %v1601_v30  ;;  %1608 = vmax.xlane.f32.xlu2 %v1607_v27 }
 0x618   : > { %2581 = vmatpush.xpose.msk.msra.mxu0 %vm641_vm11, %v1834_v34 }
 0x619   : > { %v1465_v35 = vpop.f32.mrf.mxu0 }
 0x61a   : > { %v1586_v37 = vmul.f32 0.35355338, %v1465_v35 }
 0x61b   : > { %v3573_v19 = vpop.permute.xlu1 %1829 }
 0x61c   : > { %v3575_v39 = vadd.f32 %v1586_v37, %v608_v33 }
 0x61e   : > { %v1604_v44 = vsel %vm800_vm12, %v3575_v39, -inf }
 0x61f   : > { %1605 = vmax.xlane.f32.xlu1 %v1604_v44 }
 0x623   : > { %v2703_v38 = vpop.permute.xlu1 %2702 }
 0x624   : > { %v2704_v40 = vunpack.i.l.bf16 %v2703_v38  ;;  %v2705_v42 = vunpack.i.h.bf16 %v2703_v38 }
 0x626   : > { %1785 = vmatpush.msrb.mxu2 %v2704_v40 }
 0x628   : > { %1786 = vmatpush.msrb.mxu2 %v2705_v42 }
 0x62b   : > { %v3579_v45 = vpop.permute.xlu1 %1831  ;;  %1913 = vrot.lane.b32.xlu0 %v3179_v22, %s2897_s9 }
 0x633   : > { %v1875_v16 = vpop.permute.xlu1 %1874 }
 0x634   : > { %2584 = vmatpush.xpose.msk.msra.mxu1 %vm641_vm11, %v1875_v16 }
 0x63b   : > { %v1873_v47 = vpop.permute.xlu1 %1872 }
 0x63c   : > { %2585 = vmatpush.xpose.msk.msra.mxu1 %vm641_vm11, %v1873_v47 }
 0x643   : > { %v3604_v63 = vpop.permute.xlu1 %1868 }
 0x645   : > { %v3587_v50 = vpop.f32.mrf.mxu2 }
 0x64a   : > { %v3597_v57 = vpop.f32.mrf.mxu3 }
 0x657   : > { %v1540_v2 = vpop.f32.mrf.mxu2 }
 0x658   : > { %v1589_v46 = vmul.f32 0.35355338, %v1540_v2 }
 0x65a   : > { %v1597_v60 = vadd.f32 %v1589_v46, %v623_v59 }
 0x65c   : > { %v1613_v62 = vsel %vm800_vm12, %v1597_v60, -inf }
 0x65e   : > { %v1504_v53 = vpop.f32.mrf.mxu1 }
 0x65f   : > { %v1588_v54 = vmul.f32 0.35355338, %v1504_v53  ;;  %v1543_v25 = vpop.f32.mrf.mxu2  ;;  %v632_v53 = vld [vmem:[%s3886_s7 + $0xe8] sm:$0xff] }
 0x660   : > { %v1590_v34 = vmul.f32 0.35355338, %v1543_v25 }
 0x661   : > { %v1596_v55 = vadd.f32 %v1588_v54, %v616_v4 }
 0x663   : > { %v1610_v58 = vsel %vm800_vm12, %v1596_v55, -inf }
 0x664   : > { %1611 = vmax.xlane.f32.xlu1 %v1610_v58 }
 0x66c   : > { %1614 = vmax.xlane.f32.xlu1 %v1613_v62 }
 0x688   : > { %v3599_v51 = vpop.f32.mrf.mxu3 }
 0x68a   : > { %v1603_v61 = vpop.xlane.xlu0 %1602  ;;  %v1609_v29 = vpop.xlane.xlu2 %1608 }
 0x68b   : > { %v1625_v6 = vsub.f32 %v1593_v14, %v1603_v61  ;;  %v1627_v56 = vsub.f32 %v1595_v26, %v1609_v29  ;;  %v624_v26 = vld [vmem:[%s3886_s7 + $0xa8] sm:$0xff] }
 0x68c   : > { %v1598_v33 = vadd.f32 %v1590_v34, %v624_v26 }
 0x68d   : > { %v1633_v43 = vmul.f32 1.442695, %v1625_v6  ;;  %v1637_v23 = vmul.f32 1.442695, %v1627_v56 }
 0x68e   : > { %v1616_v16 = vsel %vm800_vm12, %v1598_v33, -inf }
 0x68f   : > { %2817 = vpow2.f32 %v1633_v43 }
 0x690   : > { %v1579_v49 = vpop.f32.mrf.mxu3  ;;  %2819 = vpow2.f32 %v1637_v23 }
 0x691   : > { %v1591_v24 = vmul.f32 0.35355338, %v1579_v49 }
 0x692   : > { %v1606_v35 = vpop.xlane.xlu1 %1605 }
 0x693   : > { %v1599_v41 = vadd.f32 %v1591_v24, %v631_v32  ;;  %v1626_v38 = vsub.f32 %v3575_v39, %v1606_v35 }
 0x695   : > { %v2818_v30 = vpop.eup %2817  ;;  %v1619_v27 = vsel %vm800_vm12, %v1599_v41, -inf  ;;  %v1635_v4 = vmul.f32 1.442695, %v1626_v38 }
 0x696   : > { %1620 = vmax.xlane.f32.xlu1 %v1619_v27  ;;  %v1649_v14 = vsel %vm800_vm12, %v2818_v30, 0.0  ;;  %v2820_v44 = vpop.eup %2819 }
 0x697   : > { %1650 = vadd.xlane.f32.xlu2 %v1649_v14  ;;  %v1655_v47 = vsel %vm800_vm12, %v2820_v44, 0.0  ;;  %2821 = vpow2.f32 %v1635_v4 }
 0x698   : > { %v1582_v37 = vpop.f32.mrf.mxu3 }
 0x699   : > { %v1592_v40 = vmul.f32 0.35355338, %v1582_v37 }
 0x69b   : > { %v1600_v54 = vadd.f32 %v1592_v40, %v632_v53 }
 0x69d   : > { %v1914_v42 = vpop.permute.xlu0 %1913  ;;  %v1622_v2 = vsel %vm800_vm12, %v1600_v54, -inf  ;;  %v2822_v39 = vpop.eup %2821 }
 0x69e   : > { %1617 = vmax.xlane.f32.xlu1 %v1616_v16  ;;  %2588 = vmatpush.xpose.msk.msra.mxu2 %vm641_vm11, %v1914_v42  ;;  %v1652_v46 = vsel %vm800_vm12, %v2822_v39, 0.0 }
 0x69f   : > { %1656 = vadd.xlane.f32.xlu2 %v1655_v47 }
 0x6a6   : > { %1623 = vmax.xlane.f32.xlu1 %v1622_v2 }
 0x6ae   : > { %1653 = vadd.xlane.f32.xlu1 %v1652_v46 }
 0x6b7   : > { %1911 = vrot.lane.b32.xlu2 %v3192_v10, %s2897_s9 }
 0x6c7   : > { %2707 = vrot.lane.b32.xlu1 %v3209_v12, %s2898_s28 }
 0x6d7   : > { %v1612_v58 = vpop.xlane.xlu1 %1611 }
 0x6d8   : > { %v1628_v59 = vsub.f32 %v1596_v55, %v1612_v58 }
 0x6da   : > { %v1639_v62 = vmul.f32 1.442695, %v1628_v59 }
 0x6dc   : > { %2823 = vpow2.f32 %v1639_v62 }
 0x6df   : > { %v1615_v61 = vpop.xlane.xlu1 %1614 }
 0x6e0   : > { %v1629_v29 = vsub.f32 %v1597_v60, %v1615_v61 }
 0x6e2   : > { %v3624_v6 = vpop.eup %2823  ;;  %v1641_v56 = vmul.f32 1.442695, %v1629_v29 }
 0x6e3   : > { %v1658_v43 = vsel %vm800_vm12, %v3624_v6, 0.0 }
 0x6e4   : > { %2825 = vpow2.f32 %v1641_v56  ;;  %1659 = vadd.xlane.f32.xlu0 %v1658_v43 }
 0x6ea   : > { %v3628_v49 = vpop.eup %2825 }
 0x6eb   : > { %v1661_v32 = vsel %vm800_vm12, %v3628_v49, 0.0 }
 0x6ec   : > { %1662 = vadd.xlane.f32.xlu2 %v1661_v32 }
 0x709   : > { %v1621_v23 = vpop.xlane.xlu1 %1620 }
 0x70a   : > { %v1631_v55 = vsub.f32 %v1599_v41, %v1621_v23  ;;  %v1651_v24 = vpop.xlane.xlu2 %1650 }
 0x70b   : > { %2827 = vrcp.f32 %v1651_v24 }
 0x70c   : > { %v1645_v25 = vmul.f32 1.442695, %v1631_v55 }
 0x70e   : > { %2829 = vpow2.f32 %v1645_v25 }
 0x711   : > { %v2828_v60 = vpop.eup %2827  ;;  %v1618_v34 = vpop.xlane.xlu1 %1617 }
 0x712   : > { %v1681_v27 = vmul.f32 %v2828_v60, %v2818_v30  ;;  %v1630_v14 = vsub.f32 %v1598_v33, %v1618_v34  ;;  %v1657_v26 = vpop.xlane.xlu2 %1656 }
 0x713   : > { %2831 = vrcp.f32 %v1657_v26 }
 0x714   : > { %v2830_v35 = vpop.eup %2829  ;;  %v1643_v37 = vmul.f32 1.442695, %v1630_v14  ;;  %2572 = vmatmul.msk.f32.vlgmr.msrb.gmra.mxu0 %vm800_vm12, %v1681_v27  ;;  %v609_v14 = vld [vmem:[%s3886_s7 + $0x30] sm:$0xff] }
 0x715   : > { %v1667_v38 = vsel %vm800_vm12, %v2830_v35, 0.0 }
 0x716   : > { %2833 = vpow2.f32 %v1643_v37  ;;  %1668 = vadd.xlane.f32.xlu0 %v1667_v38 }
 0x719   : > { %v2832_v40 = vpop.eup %2831  ;;  %v1624_v41 = vpop.xlane.xlu1 %1623 }
 0x71a   : > { %v1683_v42 = vmul.f32 %v2832_v40, %v2820_v44  ;;  %v1632_v16 = vsub.f32 %v1600_v54, %v1624_v41  ;;  %v1912_v47 = vpop.permute.xlu2 %1911  ;;  %v610_v41 = vld [vmem:[%s3886_s7 + $0x38] sm:$0xff] }
 0x71b   : > { %2589 = vmatpush.xpose.msk.msra.mxu2 %vm641_vm11, %v1912_v47 }
 0x71c   : > { %v2834_v53 = vpop.eup %2833  ;;  %v1647_v30 = vmul.f32 1.442695, %v1632_v16  ;;  %2574 = vmatmul.msk.f32.vlgmr.msrb.gmra.mxu1 %vm800_vm12, %v1683_v42 }
 0x71d   : > { %v1664_v33 = vsel %vm800_vm12, %v2834_v53, 0.0 }
 0x71e   : > { %2835 = vpow2.f32 %v1647_v30  ;;  %1665 = vadd.xlane.f32.xlu2 %v1664_v33 }
 0x721   : > { %v1654_v4 = vpop.xlane.xlu1 %1653 }
 0x722   : > { %2837 = vrcp.f32 %v1654_v4 }
 0x724   : > { %v2836_v2 = vpop.eup %2835 }
 0x725   : > { %v1670_v46 = vsel %vm800_vm12, %v2836_v2, 0.0 }
 0x726   : > { %1671 = vadd.xlane.f32.xlu1 %v1670_v46 }
 0x728   : > { %v2838_v58 = vpop.eup %2837 }
 0x729   : > { %v1682_v44 = vmul.f32 %v2838_v58, %v2822_v39 }
 0x72a   : > { %1907 = vrot.lane.b32.xlu0 %v3192_v10, %s2899_s11 }
 0x72b   : > { %2573 = vmatmul.msk.f32.gmra.mxu0 %vm800_vm12, %v1682_v44 }
 0x732   : > { %1870 = vrot.lane.b32.xlu0 %v3170_v1, %s2899_s11 }
 0x733   : > { %2582 = vmatmul.msk.f32.vlgmr.msra.gmra.mxu0 %vm641_vm11, %v3573_v19 }
 0x736   : > { %1909 = vrot.lane.b32.xlu2 %v3179_v22, %s2899_s11 }
 0x739   : > { %v2708_v54 = vpop.permute.xlu1 %2707 }
 0x73a   : > { %v2709_v59 = vunpack.i.l.bf16 %v2708_v54  ;;  %1952 = vrot.lane.b32.xlu0 %v3181_v7, %s2897_s9  ;;  %v2710_v10 = vunpack.i.h.bf16 %v2708_v54 }
 0x73b   : > { %2583 = vmatmul.msk.f32.gmra.mxu0 %vm641_vm11, %v3579_v45 }
 0x73c   : > { %1820 = vmatpush.msrb.mxu3 %v2709_v59 }
 0x73e   : > { %1821 = vmatpush.msrb.mxu3 %v2710_v10  ;;  %1950 = vrot.lane.b32.xlu2 %v3184_v8, %s2897_s9  ;;  %s2903_s9 = smov 24  }
 0x742   : > { %1946 = vrot.lane.b32.xlu0 %v3184_v8, %s2899_s11 }
 0x746   : > { %1948 = vrot.lane.b32.xlu2 %v3181_v7, %s2899_s11 }
 0x757   : > { %v1660_v1 = vpop.xlane.xlu0 %1659 }
 0x758   : > { %2839 = vrcp.f32 %v1660_v1 }
 0x75e   : > { %v2840_v22 = vpop.eup %2839 }
 0x75f   : > { %v1663_v19 = vpop.xlane.xlu2 %1662  ;;  %v1684_v39 = vmul.f32 %v2840_v22, %v3624_v6 }
 0x760   : > { %2841 = vrcp.f32 %v1663_v19  ;;  %v625_v19 = vld [vmem:[%s3886_s7 + $0xb0] sm:$0xff] }
 0x761   : > { %2575 = vmatmul.msk.f32.gmra.mxu1 %vm800_vm12, %v1684_v39 }
 0x766   : > { %v2842_v45 = vpop.eup %2841 }
 0x767   : > { %v1685_v62 = vmul.f32 %v2842_v45, %v3628_v49 }
 0x769   : > { %2576 = vmatmul.msk.f32.vlgmr.msrb.gmra.mxu2 %vm800_vm12, %v1685_v62  ;;  %2586 = vmatmul.msk.f32.vlgmr.msra.gmra.mxu1 %vm641_vm11, %v3604_v63 }
 0x789   : > { %v1669_v8 = vpop.xlane.xlu0 %1668 }
 0x78a   : > { %2843 = vrcp.f32 %v1669_v8 }
 0x790   : > { %v2844_v7 = vpop.eup %2843 }
 0x791   : > { %v1687_v61 = vmul.f32 %v2844_v7, %v2830_v35  ;;  %v1666_v29 = vpop.xlane.xlu2 %1665  ;;  %v3665_v23 = vpop.f32.mrf.mxu0 }
 0x792   : > { %2845 = vrcp.f32 %v1666_v29 }
 0x793   : > { %2578 = vmatmul.msk.f32.vlgmr.msrb.gmra.mxu3 %vm800_vm12, %v1687_v61  ;;  %v626_v61 = vld [vmem:[%s3886_s7 + $0xb8] sm:$0xff] }
 0x798   : > { %v2846_v6 = vpop.eup %2845 }
 0x799   : > { %v1672_v56 = vpop.xlane.xlu1 %1671  ;;  %v1686_v43 = vmul.f32 %v2846_v6, %v2834_v53  ;;  %v1910_v24 = vpop.permute.xlu2 %1909 }
 0x79a   : > { %2847 = vrcp.f32 %v1672_v56  ;;  %v3683_v30 = vpop.f32.mrf.mxu1 }
 0x79b   : > { %2577 = vmatmul.msk.f32.gmra.mxu2 %vm800_vm12, %v1686_v43 }
 0x79c   : > { %v1908_v49 = vpop.permute.xlu0 %1907 }
 0x7a0   : > { %v2848_v32 = vpop.eup %2847 }
 0x7a1   : > { %v1688_v55 = vmul.f32 %v2848_v32, %v2836_v2  ;;  %v1951_v34 = vpop.permute.xlu2 %1950  ;;  %v617_v2 = vld [vmem:[%s3886_s7 + $0x70] sm:$0xff] }
 0x7a2   : > { %v633_v32 = vld [vmem:[%s3886_s7 + $0xf0] sm:$0xff] }
 0x7a3   : > { %2579 = vmatmul.msk.f32.gmra.mxu3 %vm800_vm12, %v1688_v55  ;;  %2590 = vmatmul.msk.f32.vlgmr.msra.gmra.mxu2 %vm641_vm11, %v1908_v49 }
 0x7a4   : > { %v1871_v63 = vpop.permute.xlu0 %1870 }
 0x7a5   : > { %2587 = vmatmul.msk.f32.gmra.mxu1 %vm641_vm11, %v1871_v63 }
 0x7a8   : > { %v1721_v25 = vpop.f32.mrf.mxu0 }
 0x7a9   : > { %v1949_v47 = vpop.permute.xlu2 %1948 }
 0x7ab   : > { %2591 = vmatmul.msk.f32.gmra.mxu2 %vm641_vm11, %v1910_v24 }
 0x7ac   : > { %v1953_v60 = vpop.permute.xlu0 %1952 }
 0x7ad   : > { %2592 = vmatpush.xpose.msk.msra.mxu3 %vm641_vm11, %v1953_v60 }
 0x7b0   : > { %v1862_v27 = vpop.f32.mrf.mxu0 }
 0x7b1   : > { %v1985_v26 = vmul.f32 0.35355338, %v1862_v27  ;;  %2593 = vmatpush.xpose.msk.msra.mxu3 %vm641_vm11, %v1951_v34 }
 0x7b3   : > { %v1993_v35 = vadd.f32 %v1985_v26, %v609_v14 }
 0x7b4   : > { %v1947_v37 = vpop.permute.xlu0 %1946 }
 0x7b5   : > { %2594 = vmatmul.msk.f32.vlgmr.msra.gmra.mxu3 %vm641_vm11, %v1947_v37  ;;  %v2001_v38 = vsel %vm800_vm12, %v1993_v35, -inf }
 0x7b6   : > { %2002 = vmax.xlane.f32.xlu0 %v2001_v38  ;;  %v634_v38 = vld [vmem:[%s3886_s7 + $0xf8] sm:$0xff] }
 0x7b8   : > { %v1865_v40 = vpop.f32.mrf.mxu0 }
 0x7b9   : > { %v1986_v42 = vmul.f32 0.35355338, %v1865_v40 }
 0x7bb   : > { %v1994_v16 = vadd.f32 %v1986_v42, %v610_v41 }
 0x7bd   : > { %2595 = vmatmul.msk.f32.gmra.mxu3 %vm641_vm11, %v1949_v47  ;;  %v2004_v53 = vsel %vm800_vm12, %v1994_v16, -inf }
 0x7be   : > { %2005 = vmax.xlane.f32.xlu2 %v2004_v53 }
 0x7d6   : > { %2712 = vrot.lane.b32.xlu2 %v3198_v11, %s2900_s12 }
 0x7de   : > { %v3687_v33 = vpop.f32.mrf.mxu1  ;;  %2722 = vrot.lane.b32.xlu2 %v3218_v13, %s2900_s12  ;;  %v618_v13 = vld [vmem:[%s3886_s7 + $0x78] sm:$0xff] }
 0x7e6   : > { %v1901_v4 = vpop.f32.mrf.mxu1  ;;  %2727 = vrot.lane.b32.xlu2 %v3209_v12, %s2900_s12 }
 0x7e7   : > { %v1987_v46 = vmul.f32 0.35355338, %v1901_v4 }
 0x7e9   : > { %v3696_v58 = vadd.f32 %v1987_v46, %v617_v2 }
 0x7eb   : > { %v2007_v44 = vsel %vm800_vm12, %v3696_v58, -inf }
 0x7ec   : > { %2008 = vmax.xlane.f32.xlu1 %v2007_v44  ;;  %v3705_v11 = vpop.f32.mrf.mxu2 }
 0x7ee   : > { %2237 = vrot.lane.b32.xlu2 %v3548_v0, %s2901_s15 }
 0x7f6   : > { %2239 = vrot.lane.b32.xlu2 %v3554_v5, %s2901_s15 }
 0x7fe   : > { %2271 = vrot.lane.b32.xlu2 %v1721_v25, %s2902_s16 }
 0x816   : > { %v3716_v22 = vpop.f32.mrf.mxu3 }
 0x81e   : > { %v3707_v12 = vpop.f32.mrf.mxu2 }
 0x822   : > { %v1904_v54 = vpop.f32.mrf.mxu1 }
 0x823   : > { %v1988_v59 = vmul.f32 0.35355338, %v1904_v54 }
 0x825   : > { %v3712_v10 = vadd.f32 %v1988_v59, %v618_v13 }
 0x826   : > { %v1940_v1 = vpop.f32.mrf.mxu2  ;;  %v3725_v7 = vpop.f32.mrf.mxu3 }
 0x827   : > { %v1989_v0 = vmul.f32 0.35355338, %v1940_v1  ;;  %v2010_v5 = vsel %vm800_vm12, %v3712_v10, -inf }
 0x828   : > { %2011 = vmax.xlane.f32.xlu1 %v2010_v5 }
 0x829   : > { %v3721_v39 = vadd.f32 %v1989_v0, %v625_v19  ;;  %v2003_v6 = vpop.xlane.xlu0 %2002 }
 0x82a   : > { %v2025_v43 = vsub.f32 %v1993_v35, %v2003_v6 }
 0x82b   : > { %v2013_v8 = vsel %vm800_vm12, %v3721_v39, -inf }
 0x82c   : > { %v2033_v25 = vmul.f32 1.442695, %v2025_v43 }
 0x82e   : > { %v1943_v45 = vpop.f32.mrf.mxu2  ;;  %2849 = vpow2.f32 %v2033_v25 }
 0x82f   : > { %v1990_v62 = vmul.f32 0.35355338, %v1943_v45 }
 0x830   : > { %2014 = vmax.xlane.f32.xlu1 %v2013_v8 }
 0x831   : > { %v2006_v29 = vpop.xlane.xlu2 %2005  ;;  %v3730_v56 = vadd.f32 %v1990_v62, %v626_v61 }
 0x832   : > { %v2026_v27 = vsub.f32 %v1994_v16, %v2006_v29 }
 0x833   : > { %v2016_v49 = vsel %vm800_vm12, %v3730_v56, -inf }
 0x834   : > { %v2035_v35 = vmul.f32 1.442695, %v2026_v27  ;;  %v2850_v53 = vpop.eup %2849 }
 0x835   : > { %v2049_v2 = vsel %vm800_vm12, %v2850_v53, 0.0 }
 0x836   : > { %2851 = vpow2.f32 %v2035_v35 }
 0x838   : > { %v1979_v55 = vpop.f32.mrf.mxu3  ;;  %2017 = vmax.xlane.f32.xlu1 %v2016_v49 }
 0x839   : > { %v1991_v63 = vmul.f32 0.35355338, %v1979_v55  ;;  %v2713_v24 = vpop.permute.xlu2 %2712 }
 0x83a   : > { %v2714_v60 = vunpack.i.l.bf16 %v2713_v24  ;;  %v2715_v14 = vunpack.i.h.bf16 %v2713_v24 }
 0x83b   : > { %v1999_v34 = vadd.f32 %v1991_v63, %v633_v32 }
 0x83c   : > { %2115 = vmatpush.msrb.mxu0 %v2714_v60  ;;  %v2852_v44 = vpop.eup %2851 }
 0x83d   : > { %v2019_v26 = vsel %vm800_vm12, %v1999_v34, -inf  ;;  %v2052_v59 = vsel %vm800_vm12, %v2852_v44, 0.0 }
 0x83e   : > { %2116 = vmatpush.msrb.mxu0 %v2715_v14 }
 0x840   : > { %v1982_v37 = vpop.f32.mrf.mxu3  ;;  %2020 = vmax.xlane.f32.xlu1 %v2019_v26 }
 0x841   : > { %v1992_v40 = vmul.f32 0.35355338, %v1982_v37  ;;  %v2723_v41 = vpop.permute.xlu2 %2722 }
 0x842   : > { %v2724_v42 = vunpack.i.l.bf16 %v2723_v41  ;;  %v2725_v16 = vunpack.i.h.bf16 %v2723_v41 }
 0x843   : > { %v2000_v47 = vadd.f32 %v1992_v40, %v634_v38 }
 0x844   : > { %2185 = vmatpush.msrb.mxu2 %v2724_v42 }
 0x845   : > { %v2022_v4 = vsel %vm800_vm12, %v2000_v47, -inf }
 0x846   : > { %2023 = vmax.xlane.f32.xlu0 %v2022_v4  ;;  %2186 = vmatpush.msrb.mxu2 %v2725_v16 }
 0x848   : > { %2050 = vadd.xlane.f32.xlu1 %v2049_v2 }
 0x849   : > { %v2728_v46 = vpop.permute.xlu2 %2727 }
 0x84a   : > { %v2729_v13 = vunpack.i.l.bf16 %v2728_v46  ;;  %v2730_v54 = vunpack.i.h.bf16 %v2728_v46 }
 0x84c   : > { %2220 = vmatpush.msrb.mxu3 %v2729_v13 }
 0x84e   : > { %2053 = vadd.xlane.f32.xlu0 %v2052_v59  ;;  %2221 = vmatpush.msrb.mxu3 %v2730_v54 }
 0x85f   : > { %v2009_v1 = vpop.xlane.xlu1 %2008 }
 0x860   : > { %v2027_v0 = vsub.f32 %v3696_v58, %v2009_v1 }
 0x862   : > { %v2037_v5 = vmul.f32 1.442695, %v2027_v0  ;;  %2717 = vrot.lane.b32.xlu0 %v3190_v9, %s2900_s12 }
 0x864   : > { %2853 = vpow2.f32 %v2037_v5 }
 0x86a   : > { %v2854_v19 = vpop.eup %2853 }
 0x86b   : > { %v2055_v45 = vsel %vm800_vm12, %v2854_v19, 0.0 }
 0x86c   : > { %2056 = vadd.xlane.f32.xlu1 %v2055_v45 }
 0x89b   : > { %v2012_v62 = vpop.xlane.xlu1 %2011 }
 0x89c   : > { %v2028_v8 = vsub.f32 %v3712_v10, %v2012_v62 }
 0x89e   : > { %v2039_v61 = vmul.f32 1.442695, %v2028_v8 }
 0x8a0   : > { %2855 = vpow2.f32 %v2039_v61 }
 0x8a3   : > { %v2015_v29 = vpop.xlane.xlu1 %2014 }
 0x8a4   : > { %v2029_v6 = vsub.f32 %v3721_v39, %v2015_v29 }
 0x8a6   : > { %v2856_v43 = vpop.eup %2855  ;;  %v2041_v49 = vmul.f32 1.442695, %v2029_v6  ;;  %v2353_v6 = vld [vmem:[%s3884_s5 + $0x18] sm:$0xff] }
 0x8a7   : > { %v2058_v58 = vsel %vm800_vm12, %v2856_v43, 0.0  ;;  %2394 = vmatpush.msra.mxu0 %v2353_v6 }
 0x8a8   : > { %2857 = vpow2.f32 %v2041_v49  ;;  %2059 = vadd.xlane.f32.xlu1 %v2058_v58  ;;  %v2351_v49 = vld [vmem:[%s3884_s5 + $0x8] sm:$0xff]  ;;  %v2238_v58 = vpop.permute.xlu2 %2237 }
 0x8ab   : > { %v2018_v9 = vpop.xlane.xlu1 %2017 }
 0x8ac   : > { %v2030_v32 = vsub.f32 %v3730_v56, %v2018_v9 }
 0x8ae   : > { %v2858_v55 = vpop.eup %2857  ;;  %v2043_v63 = vmul.f32 1.442695, %v2030_v32 }
 0x8af   : > { %v2061_v24 = vsel %vm800_vm12, %v2858_v55, 0.0 }
 0x8b0   : > { %2859 = vpow2.f32 %v2043_v63  ;;  %2062 = vadd.xlane.f32.xlu1 %v2061_v24  ;;  %v2240_v9 = vpop.permute.xlu2 %2239 }
 0x8b3   : > { %v2021_v10 = vpop.xlane.xlu1 %2020 }
 0x8b4   : > { %v2031_v25 = vsub.f32 %v1999_v34, %v2021_v10 }
 0x8b6   : > { %v2860_v60 = vpop.eup %2859  ;;  %v2045_v27 = vmul.f32 1.442695, %v2031_v25 }
 0x8b7   : > { %v2064_v39 = vsel %vm800_vm12, %v2860_v60, 0.0 }
 0x8b8   : > { %2861 = vpow2.f32 %v2045_v27  ;;  %2065 = vadd.xlane.f32.xlu0 %v2064_v39  ;;  %v2272_v32 = vpop.permute.xlu2 %2271 }
 0x8b9   : > { %v2024_v14 = vpop.xlane.xlu0 %2023 }
 0x8ba   : > { %v2032_v26 = vsub.f32 %v2000_v47, %v2024_v14 }
 0x8bb   : > { %v2051_v35 = vpop.xlane.xlu1 %2050 }
 0x8bc   : > { %v2047_v37 = vmul.f32 1.442695, %v2032_v26  ;;  %2863 = vrcp.f32 %v2051_v35 }
 0x8be   : > { %v2862_v56 = vpop.eup %2861  ;;  %2865 = vpow2.f32 %v2047_v37 }
 0x8bf   : > { %v2067_v38 = vsel %vm800_vm12, %v2862_v56, 0.0 }
 0x8c0   : > { %2068 = vadd.xlane.f32.xlu1 %v2067_v38 }
 0x8c1   : > { %v2054_v40 = vpop.xlane.xlu0 %2053 }
 0x8c2   : > { %v2864_v41 = vpop.eup %2863  ;;  %2867 = vrcp.f32 %v2054_v40 }
 0x8c3   : > { %v2081_v34 = vmul.f32 %v2864_v41, %v2850_v53 }
 0x8c4   : > { %v2866_v42 = vpop.eup %2865 }
 0x8c5   : > { %2596 = vmatmul.msk.f32.vlgmr.msrb.gmra.mxu0 %vm800_vm12, %v2081_v34  ;;  %v2070_v16 = vsel %vm800_vm12, %v2866_v42, 0.0 }
 0x8c8   : > { %v2868_v4 = vpop.eup %2867  ;;  %2071 = vadd.xlane.f32.xlu1 %v2070_v16 }
 0x8c9   : > { %v2082_v47 = vmul.f32 %v2868_v4, %v2852_v44 }
 0x8cc   : > { %2241 = vrot.lane.b32.xlu0 %v3550_v52, %s2901_s15 }
 0x8cd   : > { %2597 = vmatmul.msk.f32.gmra.mxu0 %vm800_vm12, %v2082_v47  ;;  %v2734_v47 = vld [vmem:[%s3885_s6] ss:$0 sm:$0xff] }
 0x8d4   : > { %2245 = vrot.lane.b32.xlu0 %v3585_v48, %s2901_s15  ;;  %v2718_v2 = vpop.permute.xlu0 %2717 }
 0x8d5   : > { %v2719_v46 = vunpack.i.l.bf16 %v2718_v2  ;;  %v2720_v13 = vunpack.i.h.bf16 %v2718_v2 }
 0x8d7   : > { %2150 = vmatpush.msrb.mxu1 %v2719_v46 }
 0x8d9   : > { %2151 = vmatpush.msrb.mxu1 %v2720_v13 }
 0x8dc   : > { %2247 = vrot.lane.b32.xlu0 %v3587_v50, %s2901_s15 }
 0x8df   : > { %v2057_v53 = vpop.xlane.xlu1 %2056 }
 0x8e0   : > { %2869 = vrcp.f32 %v2057_v53 }
 0x8e1   : > { %2269 = vrot.lane.b32.xlu1 %v3665_v23, %s2902_s16 }
 0x8e4   : > { %2249 = vrot.lane.b32.xlu0 %v3597_v57, %s2901_s15 }
 0x8e6   : > { %v2870_v52 = vpop.eup %2869 }
 0x8e7   : > { %v2083_v44 = vmul.f32 %v2870_v52, %v2854_v19 }
 0x8e9   : > { %2273 = vrot.lane.b32.xlu1 %v3683_v30, %s2902_s16  ;;  %2598 = vmatmul.msk.f32.vlgmr.msrb.gmra.mxu1 %vm800_vm12, %v2083_v44 }
 0x8ec   : > { %2251 = vrot.lane.b32.xlu0 %v3599_v51, %s2901_s15 }
 0x8f1   : > { %2243 = vrot.lane.b32.xlu1 %v3556_v15, %s2901_s15 }
 0x91b   : > { %v2060_v48 = vpop.xlane.xlu1 %2059 }
 0x91c   : > { %2871 = vrcp.f32 %v2060_v48 }
 0x922   : > { %v2872_v50 = vpop.eup %2871 }
 0x923   : > { %v2063_v23 = vpop.xlane.xlu1 %2062  ;;  %v2084_v54 = vmul.f32 %v2872_v50, %v2856_v43  ;;  %v2352_v43 = vld [vmem:[%s3884_s5 + $0x10] sm:$0xff] }
 0x924   : > { %2873 = vrcp.f32 %v2063_v23  ;;  %2395 = vmatpush.msra.mxu0 %v2352_v43 }
 0x925   : > { %2599 = vmatmul.msk.f32.gmra.mxu1 %vm800_vm12, %v2084_v54 }
 0x926   : > { %2396 = vmatpush.msra.mxu0 %v2351_v49 }
 0x92a   : > { %v2874_v57 = vpop.eup %2873 }
 0x92b   : > { %v2085_v59 = vmul.f32 %v2874_v57, %v2858_v55  ;;  %v2066_v1 = vpop.xlane.xlu0 %2065 }
 0x92c   : > { %2875 = vrcp.f32 %v2066_v1 }
 0x92d   : > { %2600 = vmatmul.msk.f32.vlgmr.msrb.gmra.mxu2 %vm800_vm12, %v2085_v59 }
 0x932   : > { %v2876_v30 = vpop.eup %2875 }
 0x933   : > { %v2069_v0 = vpop.xlane.xlu1 %2068  ;;  %v2086_v51 = vmul.f32 %v2876_v30, %v2860_v60 }
 0x934   : > { %2877 = vrcp.f32 %v2069_v0 }
 0x935   : > { %2601 = vmatmul.msk.f32.gmra.mxu2 %vm800_vm12, %v2086_v51 }
 0x93a   : > { %v2878_v15 = vpop.eup %2877 }
 0x93b   : > { %v2087_v5 = vmul.f32 %v2878_v15, %v2862_v56  ;;  %v2072_v19 = vpop.xlane.xlu1 %2071 }
 0x93c   : > { %2879 = vrcp.f32 %v2072_v19 }
 0x93d   : > { %2602 = vmatmul.msk.f32.vlgmr.msrb.gmra.mxu3 %vm800_vm12, %v2087_v5 }
 0x93e   : > { %v2242_v39 = vpop.permute.xlu0 %2241 }
 0x93f   : > { %v2327_v26 = vsel %vm641_vm11, %v3394_v28, %v2242_v39 }
 0x942   : > { %v2880_v45 = vpop.eup %2879  ;;  %v2118_v62 = vpop.f32.mrf.mxu0 }
 0x943   : > { %2301 = vrot.lane.b32.xlu2 %v2118_v62, %s2903_s9  ;;  %v2088_v8 = vmul.f32 %v2880_v45, %v2866_v42 }
 0x945   : > { %2603 = vmatmul.msk.f32.gmra.mxu3 %vm800_vm12, %v2088_v8 }
 0x946   : > { %v2246_v4 = vpop.permute.xlu0 %2245 }
 0x947   : > { %v2329_v13 = vsel %vm641_vm11, %v3390_v36, %v2246_v4 }
 0x94a   : > { %v2121_v61 = vpop.f32.mrf.mxu0 }
 0x94b   : > { %2303 = vrot.lane.b32.xlu2 %v2121_v61, %s2903_s9 }
 0x94e   : > { %v2248_v53 = vpop.permute.xlu0 %2247 }
 0x94f   : > { %v2330_v57 = vsel %vm641_vm11, %v3396_v18, %v2248_v53 }
 0x953   : > { %v2270_v55 = vpop.permute.xlu1 %2269 }
 0x956   : > { %v2250_v30 = vpop.permute.xlu0 %2249 }
 0x957   : > { %v2331_v51 = vsel %vm641_vm11, %v3402_v21, %v2250_v30 }
 0x95b   : > { %v2274_v14 = vpop.permute.xlu1 %2273 }
 0x95e   : > { %v2252_v18 = vpop.permute.xlu0 %2251 }
 0x95f   : > { %v2332_v62 = vsel %vm641_vm11, %v3411_v31, %v2252_v18 }
 0x963   : > { %v2244_v40 = vpop.permute.xlu1 %2243 }
 0x964   : > { %v2328_v34 = vsel %vm641_vm11, %v3400_v3, %v2244_v40 }
 0x966   : > { %v2153_v29 = vpop.f32.mrf.mxu1 }
 0x967   : > { %2305 = vrot.lane.b32.xlu2 %v2153_v29, %s2903_s9 }
 0x96f   : > { %2275 = vrot.lane.b32.xlu2 %v3687_v33, %s2902_s16  ;;  %v2350_v33 = vld [vmem:[%s3884_s5] sm:$0xff] }
 0x970   : > { %2397 = vmatpush.msra.mxu0 %v2350_v33 }
 0x977   : > { %2277 = vrot.lane.b32.xlu2 %v3705_v11, %s2902_s16  ;;  %v2325_v11 = vsel %vm641_vm11, %v3392_v17, %v2238_v58 }
 0x978   : > { %v2333_v63 = vsel %vm800_vm12, %v2325_v11, %v2270_v55 }
 0x97f   : > { %2279 = vrot.lane.b32.xlu2 %v3707_v12, %s2902_s16 }
 0x987   : > { %2281 = vrot.lane.b32.xlu2 %v3716_v22, %s2902_s16  ;;  %v2326_v22 = vsel %vm641_vm11, %v3398_v20, %v2240_v9  ;;  %v2335_v20 = vsel %vm800_vm12, %v2327_v26, %v2274_v14 }
 0x98f   : > { %2283 = vrot.lane.b32.xlu2 %v3725_v7, %s2902_s16  ;;  %v2334_v7 = vsel %vm800_vm12, %v2326_v22, %v2272_v32 }
 0x99d   : > { %v2302_v24 = vpop.permute.xlu2 %2301 }
 0x99e   : > { %v2342_v12 = vsel %vm2341_vm13, %v2333_v63, %v2302_v24 }
 0x99f   : > { %2604 = vmatmul.msk.f32.vlgmr.msra.gmra.mxu0 %vm324_vm0, %v2342_v12 }
 0x9a2   : > { %v2156_v10 = vpop.f32.mrf.mxu1 }
 0x9a3   : > { %2307 = vrot.lane.b32.xlu1 %v2156_v10, %s2903_s9 }
 0x9a5   : > { %v2304_v25 = vpop.permute.xlu2 %2303 }
 0x9a6   : > { %v2343_v60 = vsel %vm2341_vm13, %v2334_v7, %v2304_v25 }
 0x9a7   : > { %2605 = vmatmul.msk.f32.gmra.mxu0 %vm324_vm0, %v2343_v60 }
 0x9b0   : > { %v2188_v17 = vpop.f32.mrf.mxu2 }
 0x9b1   : > { %2309 = vrot.lane.b32.xlu1 %v2188_v17, %s2903_s9 }
 0x9b8   : > { %v2191_v27 = vpop.f32.mrf.mxu2 }
 0x9b9   : > { %2311 = vrot.lane.b32.xlu1 %v2191_v27, %s2903_s9 }
 0x9c0   : > { %v2223_v35 = vpop.f32.mrf.mxu3 }
 0x9c1   : > { %2313 = vrot.lane.b32.xlu1 %v2223_v35, %s2903_s9  ;;  %v2306_v37 = vpop.permute.xlu2 %2305 }
 0x9c2   : > { %v2344_v56 = vsel %vm2341_vm13, %v2335_v20, %v2306_v37 }
 0x9c3   : > { %2606 = vmatmul.msk.f32.gmra.mxu0 %vm324_vm0, %v2344_v56 }
 0x9c8   : > { %v2226_v38 = vpop.f32.mrf.mxu3 }
 0x9c9   : > { %2315 = vrot.lane.b32.xlu1 %v2226_v38, %s2903_s9  ;;  %v2276_v41 = vpop.permute.xlu2 %2275 }
 0x9ca   : > { %v2336_v28 = vsel %vm800_vm12, %v2328_v34, %v2276_v41 }
 0x9d1   : > { %v2278_v2 = vpop.permute.xlu2 %2277 }
 0x9d2   : > { %v2337_v52 = vsel %vm800_vm12, %v2329_v13, %v2278_v2 }
 0x9d9   : > { %v2280_v48 = vpop.permute.xlu2 %2279 }
 0x9da   : > { %v2338_v59 = vsel %vm800_vm12, %v2330_v57, %v2280_v48 }
 0x9e1   : > { %v2282_v0 = vpop.permute.xlu2 %2281 }
 0x9e2   : > { %v2339_v15 = vsel %vm800_vm12, %v2331_v51, %v2282_v0 }
 0x9e9   : > { %v2284_v45 = vpop.permute.xlu2 %2283 }
 0x9ea   : > { %v2340_v8 = vsel %vm800_vm12, %v2332_v62, %v2284_v45 }
 0xa15   : > { %v2308_v42 = vpop.permute.xlu1 %2307 }
 0xa16   : > { %v2345_v16 = vsel %vm2341_vm13, %v2336_v28, %v2308_v42 }
 0xa17   : > { %2607 = vmatmul.msk.f32.gmra.mxu0 %vm324_vm0, %v2345_v16 }
 0xa1c   : > { %v2399_v3 = vpop.f32.mrf.mxu0 }
 0xa1d   : > { %v2400_v46 = vadd.f32 %v2734_v47, %v2399_v3 }
 0xa1f   : > { %2423 = vst.msk [vmem:[%s3838_s21] sm:$0xff] %vm324_vm0, %v2400_v46 }
 0xa23   : > { %v2310_v44 = vpop.permute.xlu1 %2309 }
 0xa24   : > { %v2402_v50 = vpop.f32.mrf.mxu0  ;;  %v2346_v23 = vsel %vm2341_vm13, %v2337_v52, %v2310_v44 }
 0xa25   : > { %v2403_v54 = vadd.f32 %v2734_v47, %v2402_v50  ;;  %2608 = vmatmul.msk.f32.gmra.mxu0 %vm324_vm0, %v2346_v23 }
 0xa27   : > { %2424 = vst.msk [vmem:[%s3838_s21 + $0x8] sm:$0xff] %vm324_vm0, %v2403_v54 }
 0xa2b   : > { %v2312_v1 = vpop.permute.xlu1 %2311 }
 0xa2c   : > { %v2347_v36 = vsel %vm2341_vm13, %v2338_v59, %v2312_v1 }
 0xa2d   : > { %2609 = vmatmul.msk.f32.gmra.mxu0 %vm324_vm0, %v2347_v36 }
 0xa33   : > { %v2314_v5 = vpop.permute.xlu1 %2313 }
 0xa34   : > { %v2348_v19 = vsel %vm2341_vm13, %v2339_v15, %v2314_v5 }
 0xa35   : > { %2610 = vmatmul.msk.f32.gmra.mxu0 %vm324_vm0, %v2348_v19 }
 0xa3b   : > { %v2316_v61 = vpop.permute.xlu1 %2315 }
 0xa3c   : > { %v2349_v21 = vsel %vm2341_vm13, %v2340_v8, %v2316_v61 }
 0xa3d   : > { %2611 = vmatmul.msk.f32.gmra.mxu0 %vm324_vm0, %v2349_v21 }
 0xa40   : > { %v2405_v29 = vpop.f32.mrf.mxu0 }
 0xa41   : > { %v2406_v6 = vadd.f32 %v2734_v47, %v2405_v29 }
 0xa43   : > { %2425 = vst.msk [vmem:[%s3838_s21 + $0x10] sm:$0xff] %vm324_vm0, %v2406_v6 }
 0xa94   : > { %v2408_v43 = vpop.f32.mrf.mxu0 }
 0xa95   : > { %v2409_v49 = vadd.f32 %v2734_v47, %v2408_v43 }
 0xa97   : > { %2426 = vst.msk [vmem:[%s3838_s21 + $0x18] sm:$0xff] %vm324_vm0, %v2409_v49 }
 0xaa2   : > { %v2411_v33 = vpop.f32.mrf.mxu0 }
 0xaa3   : > { %v2412_v31 = vadd.f32 %v2734_v47, %v2411_v33 }
 0xaa5   : > { %2427 = vst.msk [vmem:[%s3838_s21 + $0x20] sm:$0xff] %vm324_vm0, %v2412_v31 }
 0xaaa   : > { %v2414_v58 = vpop.f32.mrf.mxu0 }
 0xaab   : > { %v2415_v9 = vadd.f32 %v2734_v47, %v2414_v58 }
 0xaad   : > { %2428 = vst.msk [vmem:[%s3838_s21 + $0x28] sm:$0xff] %vm324_vm0, %v2415_v9 }
 0xab2   : > { %v2417_v32 = vpop.f32.mrf.mxu0 }
 0xab3   : > { %v2418_v55 = vadd.f32 %v2734_v47, %v2417_v32 }
 0xab5   : > { %2429 = vst.msk [vmem:[%s3838_s21 + $0x30] sm:$0xff] %vm324_vm0, %v2418_v55 }
 0xaba   : > { %v2420_v11 = vpop.f32.mrf.mxu0 }
 0xabb   : > { %v2421_v63 = vadd.f32 %v2734_v47, %v2420_v11 }
 0xabd   : > { %2430 = vst.msk [vmem:[%s3838_s21 + $0x38] sm:$0xff] %vm324_vm0, %v2421_v63 }
 0xabe PF: > { %s18_s27 = sadd.s32 1, %s2887_s27  }
 0xabf   : > { %p15_p4 = scmp.ge.s32.totalorder %s18_s27, 4  }
 0xac1   :  { %17 = sbr.rel (!%p15_p4) target bundleno = 1 (0x1), region = 82 }

</bundles_post_ra>
